<compile_context>
chip_gen: v7x
topology: tpu7x:2x2x1
jax: 0.10.0
libtpu: 0.0.40
codegen_flags: <defaults>
</compile_context>

<pallas_src>
import math
from functools import partial

import jax
import jax.numpy as jnp
from jax.experimental import pallas as pl
from jax.experimental.pallas import tpu as pltpu


# ------------------------------- helpers ------------------------------------

def _bytes(shape, dtype):
    return math.prod(shape) * jnp.dtype(dtype).itemsize


def _vmem_limit(blocks):
    """Scoped-VMEM request sized from the per-grid-step block footprint."""
    need = sum(_bytes(s, d) for s, d in blocks)
    need = 2 * need + (8 << 20)        # double buffering + compiler headroom
    # Floor matches the v6e/v7x default; cap kept below physical VMEM.
    return int(min(max(need, 32 << 20), 96 << 20))


def _ln_rows(y, g, b, eps):
    mu = jnp.mean(y, axis=-1, keepdims=True)
    var = jnp.mean(jnp.square(y - mu), axis=-1, keepdims=True)
    return (y - mu) * jax.lax.rsqrt(var + eps) * g + b


# --------------------------- attention kernels -------------------------------

def _attn_core(xq, xf, mask, wq_ref, bq_ref, wkv_ref, bkv_ref, wo_ref, bo_ref,
               g_ref, b_ref, ctx_sc, *, nh, scale, eps,
               q_delta=None, v_delta=None):
    """xq: (tq,H) query tile (f32), xf: (S,H) full sequence tile (f32)."""
    H = xq.shape[-1]
    dh = H // nh
    xq_b = xq.astype(jnp.bfloat16)
    xf_b = xf.astype(jnp.bfloat16)

    # Fused projections: one (tq,H)@(H,H) for Q, one (S,H)@(H,2H) for K,V.
    q = jnp.dot(xq_b, wq_ref[...], preferred_element_type=jnp.float32) + bq_ref[...]
    kv = jnp.dot(xf_b, wkv_ref[...], preferred_element_type=jnp.float32) + bkv_ref[...]
    k, v = kv[:, :H], kv[:, H:]
    if q_delta is not None:
        q = q + q_delta
    if v_delta is not None:
        v = v + v_delta

    # TODO(synk): at real head counts (nh >= 12) replace this unrolled loop
    #             with a lax.fori_loop / head grid axis to bound live ranges.
    for h in range(nh):
        sl = slice(h * dh, (h + 1) * dh)
        qh = q[:, sl].astype(jnp.bfloat16)
        kh = k[:, sl].astype(jnp.bfloat16)
        vh = v[:, sl].astype(jnp.bfloat16)
        # QK^T via dot_general contracting last dims (no materialized transpose).
        s = jax.lax.dot_general(qh, kh, (((1,), (1,)), ((), ())),
                                preferred_element_type=jnp.float32)
        s = s * scale + mask
        s = s - jnp.max(s, axis=-1, keepdims=True)
        p = jnp.exp(s)
        p = p * pl.reciprocal(jnp.sum(p, axis=-1, keepdims=True), approx=True)
        ctx_sc[:, sl] = jnp.dot(p.astype(jnp.bfloat16), vh,
                                preferred_element_type=jnp.float32)

    # Single (tq,H)@(H,H) output projection over the concatenated heads.
    out = jnp.dot(ctx_sc[...].astype(jnp.bfloat16), wo_ref[...],
                  preferred_element_type=jnp.float32) + bo_ref[...]
    return _ln_rows(out + xq, g_ref[...], b_ref[...], eps)


def _attn_kernel(xq_ref, xf_ref, m_ref, wq_ref, bq_ref, wkv_ref, bkv_ref,
                 wo_ref, bo_ref, g_ref, b_ref, o_ref, ctx_sc,
                 *, nh, scale, eps):
    o_ref[0] = _attn_core(xq_ref[0], xf_ref[0], m_ref[0], wq_ref, bq_ref,
                          wkv_ref, bkv_ref, wo_ref, bo_ref, g_ref, b_ref,
                          ctx_sc, nh=nh, scale=scale, eps=eps)


def _attn_lora_kernel(xq_ref, xf_ref, m_ref, wq_ref, bq_ref, wkv_ref, bkv_ref,
                      wo_ref, bo_ref, g_ref, b_ref, qa_ref, qb_ref, va_ref,
                      vb_ref, o_ref, ctx_sc, *, nh, scale, eps):
    xq_b = xq_ref[0].astype(jnp.bfloat16)
    xf_b = xf_ref[0].astype(jnp.bfloat16)
    # LoRA low-rank path: (x@A)@B without materializing the HxH delta.
    # TODO(synk): no alpha/r LoRA scaling (reference scaling not specified).
    q_delta = jnp.dot(
        jnp.dot(xq_b, qa_ref[...], preferred_element_type=jnp.float32
                ).astype(jnp.bfloat16),
        qb_ref[...], preferred_element_type=jnp.float32)
    v_delta = jnp.dot(
        jnp.dot(xf_b, va_ref[...], preferred_element_type=jnp.float32
                ).astype(jnp.bfloat16),
        vb_ref[...], preferred_element_type=jnp.float32)
    o_ref[0] = _attn_core(xq_ref[0], xf_ref[0], m_ref[0], wq_ref, bq_ref,
                          wkv_ref, bkv_ref, wo_ref, bo_ref, g_ref, b_ref,
                          ctx_sc, nh=nh, scale=scale, eps=eps,
                          q_delta=q_delta, v_delta=v_delta)


def attention_block(x, add_mask, p, cfg, lora=None, tq=256):
    """Fused MHA block: QKV(+LoRA) + attention + O-proj + residual + LN."""
    B, S, H = x.shape
    nh = cfg["num_heads"]
    dh = H // nh
    scale = 1.0 / math.sqrt(dh)
    tq = min(tq, S)

    def const(shape):
        nd = len(shape)
        return pl.BlockSpec(shape, lambda b, qi, _n=nd: (0,) * _n)

    inputs = [x, x, add_mask, p["wq"], p["bq"], p["wkv"], p["bkv"],
              p["wo"], p["bo"], p["ln"]["g"], p["ln"]["b"]]
    specs = [pl.BlockSpec((1, tq, H), lambda b, qi: (b, qi, 0)),
             pl.BlockSpec((1, S, H), lambda b, qi: (b, 0, 0)),
             pl.BlockSpec((1, 1, S), lambda b, qi: (b, 0, 0)),
             const((H, H)), const((1, H)), const((H, 2 * H)), const((1, 2 * H)),
             const((H, H)), const((1, H)), const((1, H)), const((1, H))]
    blocks = [((1, tq, H), jnp.float32), ((1, S, H), jnp.float32),
              ((1, 1, S), jnp.float32), ((H, H), jnp.bfloat16),
              ((1, H), jnp.float32), ((H, 2 * H), jnp.bfloat16),
              ((1, 2 * H), jnp.float32), ((H, H), jnp.bfloat16),
              ((1, H), jnp.float32), ((1, H), jnp.float32),
              ((1, H), jnp.float32), ((1, tq, H), jnp.float32),
              ((tq, H), jnp.float32),                       # ctx scratch
              ((tq, S), jnp.float32), ((S, 2 * H), jnp.float32)]  # live temps

    if lora is None:
        kernel = partial(_attn_kernel, nh=nh, scale=scale, eps=cfg["eps"])
    else:
        r = lora["q_a"].shape[1]
        kernel = partial(_attn_lora_kernel, nh=nh, scale=scale, eps=cfg["eps"])
        inputs += [lora["q_a"], lora["q_b"], lora["v_a"], lora["v_b"]]
        specs += [const((H, r)), const((r, H)), const((H, r)), const((r, H))]
        blocks += [((H, r), jnp.bfloat16), ((r, H), jnp.bfloat16)] * 2

    return pl.pallas_call(
        kernel,
        out_shape=jax.ShapeDtypeStruct((B, S, H), jnp.float32),
        grid=(B, pl.cdiv(S, tq)),
        in_specs=specs,
        out_specs=pl.BlockSpec((1, tq, H), lambda b, qi: (b, qi, 0)),
        scratch_shapes=[pltpu.VMEM((tq, H), jnp.float32)],
        compiler_params=pltpu.CompilerParams(
            dimension_semantics=("parallel", "parallel"),
            vmem_limit_bytes=_vmem_limit(blocks)),
    )(*inputs)


# ------------------------------ FFN kernels ----------------------------------

def _ffn_ln_kernel(x_ref, w1_ref, b1_ref, w2_ref, b2_ref, g_ref, b_ref, o_ref,
                   *, eps):
    x = x_ref[...]
    xb = x.astype(jnp.bfloat16)
    h = jnp.dot(xb, w1_ref[...], preferred_element_type=jnp.float32) + b1_ref[...]
    h = jax.nn.gelu(h, approximate=True)          # tanh-approx "gelu_new"
    y = x + jnp.dot(h.astype(jnp.bfloat16), w2_ref[...],
                    preferred_element_type=jnp.float32) + b2_ref[...]
    o_ref[...] = _ln_rows(y, g_ref[...], b_ref[...], eps)


def ffn_res_ln(x, ffn, g, b, eps, tm=512):
    M, H = x.shape
    I = ffn["w1"].shape[1]
    tm = min(tm, M)
    blocks = [((tm, H), jnp.float32), ((H, I), jnp.bfloat16),
              ((1, I), jnp.float32), ((I, H), jnp.bfloat16),
              ((1, H), jnp.float32), ((1, H), jnp.float32),
              ((1, H), jnp.float32), ((tm, H), jnp.float32),
              ((tm, I), jnp.float32)]
    return pl.pallas_call(
        partial(_ffn_ln_kernel, eps=eps),
        out_shape=jax.ShapeDtypeStruct((M, H), jnp.float32),
        grid=(pl.cdiv(M, tm),),
        in_specs=[pl.BlockSpec((tm, H), lambda i: (i, 0)),
                  pl.BlockSpec((H, I), lambda i: (0, 0)),
                  pl.BlockSpec((1, I), lambda i: (0, 0)),
                  pl.BlockSpec((I, H), lambda i: (0, 0)),
                  pl.BlockSpec((1, H), lambda i: (0, 0)),
                  pl.BlockSpec((1, H), lambda i: (0, 0)),
                  pl.BlockSpec((1, H), lambda i: (0, 0))],
        out_specs=pl.BlockSpec((tm, H), lambda i: (i, 0)),
        compiler_params=pltpu.CompilerParams(
            dimension_semantics=("parallel",),
            vmem_limit_bytes=_vmem_limit(blocks)),
    )(x, ffn["w1"], ffn["b1"], ffn["w2"], ffn["b2"], g, b)


def _switch_ln_kernel(x_ref, wr_ref, br_ref, w1_ref, b1_ref, w2_ref, b2_ref,
                      g_ref, b_ref, o_ref, topp_sc, tope_sc, acc_sc,
                      *, n_experts, eps):
    e = pl.program_id(1)
    x = x_ref[...]                                    # (tm, H) f32
    xb = x.astype(jnp.bfloat16)

    @pl.when(e == 0)
    def _():
        # Router: projection + EXACT softmax (its prob scales the output).
        logits = jnp.dot(xb, wr_ref[...],
                         preferred_element_type=jnp.float32) + br_ref[...]
        logits = logits - jnp.max(logits, axis=-1, keepdims=True)
        ez = jnp.exp(logits)
        probs = ez / jnp.sum(ez, axis=-1, keepdims=True)
        top_p = jnp.max(probs, axis=-1, keepdims=True)
        eidx = jax.lax.broadcasted_iota(jnp.int32, probs.shape, 1)
        top_e = jnp.min(jnp.where(probs >= top_p, eidx, n_experts),
                        axis=-1, keepdims=True)       # first-max (torch.argmax)
        topp_sc[...] = top_p
        tope_sc[...] = top_e
        acc_sc[...] = jnp.zeros_like(acc_sc)

    # One expert's weights are streamed per grid step ("arbitrary" expert axis).
    h = jnp.dot(xb, w1_ref[0], preferred_element_type=jnp.float32) + b1_ref[0]
    h = jax.nn.gelu(h, approximate=True)
    ye = jnp.dot(h.astype(jnp.bfloat16), w2_ref[0],
                 preferred_element_type=jnp.float32) + b2_ref[0]
    sel = (tope_sc[...] == e).astype(jnp.float32)     # (tm, 1)
    acc_sc[...] += ye * sel

    @pl.when(e == n_experts - 1)
    def _():
        y = x + acc_sc[...] * topp_sc[...]
        o_ref[...] = _ln_rows(y, g_ref[...], b_ref[...], eps)


def switch_res_ln(x, ffn, g, b, cfg, tm=512):
    M, H = x.shape
    E, _, I = ffn["w1"].shape
    tm = min(tm, M)
    blocks = [((tm, H), jnp.float32), ((H, E), jnp.bfloat16),
              ((1, E), jnp.float32),
              ((1, H, I), jnp.bfloat16), ((1, 1, I), jnp.float32),
              ((1, I, H), jnp.bfloat16), ((1, 1, H), jnp.float32),
              ((1, H), jnp.float32), ((1, H), jnp.float32),
              ((tm, H), jnp.float32),                      # output block
              ((tm, H), jnp.float32), ((tm, 128), jnp.float32),
              ((tm, 128), jnp.int32),                      # scratch (padded)
              ((tm, I), jnp.float32)]                      # live intermediate
    return pl.pallas_call(
        partial(_switch_ln_kernel, n_experts=E, eps=cfg["eps"]),
        out_shape=jax.ShapeDtypeStruct((M, H), jnp.float32),
        grid=(pl.cdiv(M, tm), E),
        in_specs=[pl.BlockSpec((tm, H), lambda i, e: (i, 0)),
                  pl.BlockSpec((H, E), lambda i, e: (0, 0)),
                  pl.BlockSpec((1, E), lambda i, e: (0, 0)),
                  pl.BlockSpec((1, H, I), lambda i, e: (e, 0, 0)),
                  pl.BlockSpec((1, 1, I), lambda i, e: (e, 0, 0)),
                  pl.BlockSpec((1, I, H), lambda i, e: (e, 0, 0)),
                  pl.BlockSpec((1, 1, H), lambda i, e: (e, 0, 0)),
                  pl.BlockSpec((1, H), lambda i, e: (0, 0)),
                  pl.BlockSpec((1, H), lambda i, e: (0, 0))],
        out_specs=pl.BlockSpec((tm, H), lambda i, e: (i, 0)),
        scratch_shapes=[pltpu.VMEM((tm, 1), jnp.float32),
                        pltpu.VMEM((tm, 1), jnp.int32),
                        pltpu.VMEM((tm, H), jnp.float32)],
        compiler_params=pltpu.CompilerParams(
            dimension_semantics=("parallel", "arbitrary"),
            vmem_limit_bytes=_vmem_limit(blocks)),
    )(x, ffn["wr"], ffn["br"], ffn["w1"], ffn["b1"], ffn["w2"], ffn["b2"], g, b)


def _ln_kernel(x_ref, g_ref, b_ref, o_ref, *, eps):
    o_ref[...] = _ln_rows(x_ref[...], g_ref[...], b_ref[...], eps)


def layer_norm(x, g, b, eps, tm=512):
    M, H = x.shape
    tm = min(tm, M)
    blocks = [((tm, H), jnp.float32)] * 2 + [((1, H), jnp.float32)] * 2
    return pl.pallas_call(
        partial(_ln_kernel, eps=eps),
        out_shape=jax.ShapeDtypeStruct((M, H), jnp.float32),
        grid=(pl.cdiv(M, tm),),
        in_specs=[pl.BlockSpec((tm, H), lambda i: (i, 0)),
                  pl.BlockSpec((1, H), lambda i: (0, 0)),
                  pl.BlockSpec((1, H), lambda i: (0, 0))],
        out_specs=pl.BlockSpec((tm, H), lambda i: (i, 0)),
        compiler_params=pltpu.CompilerParams(
            dimension_semantics=("parallel",),
            vmem_limit_bytes=_vmem_limit(blocks)),
    )(x, g, b)


# ----------------------------- parameter init --------------------------------

def _ln(dim):
    return {"g": jnp.ones((1, dim), jnp.float32),
            "b": jnp.zeros((1, dim), jnp.float32)}


def _w(key, shape):
    # bf16 matmul weights at the pallas_call boundary; biases/LN stay f32.
    return (0.02 * jax.random.normal(key, shape, jnp.float32)).astype(jnp.bfloat16)


def init_attention(key, cfg):
    H = cfg["hidden"]
    ks = jax.random.split(key, 4)
    return {"wq": _w(ks[0], (H, H)),
            "wkv": jnp.concatenate([_w(ks[1], (H, H)), _w(ks[2], (H, H))], axis=1),
            "bq": jnp.zeros((1, H), jnp.float32),
            "bkv": jnp.zeros((1, 2 * H), jnp.float32),
            "wo": _w(ks[3], (H, H)),
            "bo": jnp.zeros((1, H), jnp.float32),
            "ln": _ln(H)}


def init_lora(key, cfg):
    # NOTE: the PyTorch module hardcodes lora_dim=128; toy config uses a
    # smaller rank (same math, smaller sizes).
    H, r = cfg["hidden"], cfg["lora_dim"]
    ks = jax.random.split(key, 4)
    return {"q_a": _w(ks[0], (H, r)), "q_b": _w(ks[1], (r, H)),
            "v_a": _w(ks[2], (H, r)), "v_b": _w(ks[3], (r, H))}


def init_ffn(key, cfg):
    H, I = cfg["hidden"], cfg["intermediate"]
    k1, k2 = jax.random.split(key)
    return {"w1": _w(k1, (H, I)), "b1": jnp.zeros((1, I), jnp.float32),
            "w2": _w(k2, (I, H)), "b2": jnp.zeros((1, H), jnp.float32)}


def init_switch_ffn(key, cfg, n_experts):
    H = cfg["hidden"]
    kr, ke = jax.random.split(key)
    experts = [init_ffn(k, cfg) for k in jax.random.split(ke, n_experts)]
    return {"wr": _w(kr, (H, n_experts)),
            "br": jnp.zeros((1, n_experts), jnp.float32),
            "w1": jnp.stack([e["w1"] for e in experts]),
            "b1": jnp.stack([e["b1"] for e in experts]),
            "w2": jnp.stack([e["w2"] for e in experts]),
            "b2": jnp.stack([e["b2"] for e in experts])}


def init_encoder_layer(key, cfg):
    k1, k2 = jax.random.split(key)
    return {"attention": init_attention(k1, cfg),
            "ffn": init_ffn(k2, cfg),
            "ln": _ln(cfg["hidden"])}


def init_expert_common(key, cfg):
    k1, k2 = jax.random.split(key)
    return {"attention": init_attention(k1, cfg),
            "ffn": init_switch_ffn(k2, cfg, cfg["n_switch_experts"]),
            "ln": _ln(cfg["hidden"])}


def init_expert_unique(key, cfg):
    k1, k2, k3 = jax.random.split(key, 3)
    return {"attention": init_attention(k1, cfg),
            "lora": init_lora(k2, cfg),
            "ffn": init_switch_ffn(k3, cfg, cfg["n_switch_experts"]),
            "ln": _ln(cfg["hidden"])}


def init_momo_layer(key, cfg):
    ks = jax.random.split(key, 1 + cfg["n_unique_experts"])
    return {"common": init_expert_common(ks[0], cfg),
            "unique": [init_expert_unique(k, cfg) for k in ks[1:]]}


def init_model(key, cfg):
    kw, kp, kl = jax.random.split(key, 3)
    emb = {"word": 0.02 * jax.random.normal(kw, (cfg["vocab"], cfg["hidden"]),
                                            jnp.float32),
           "pos": 0.02 * jax.random.normal(kp, (cfg["max_pos"], cfg["hidden"]),
                                           jnp.float32),
           "ln": _ln(cfg["hidden"])}
    n_layers, n_common = cfg["num_hidden_layers"], cfg["num_common_layers"]
    lks = jax.random.split(kl, n_layers)
    layers = [init_encoder_layer(lks[i], cfg) if i < n_common
              else init_momo_layer(lks[i], cfg) for i in range(n_layers)]
    return {"embeddings": emb, "layers": layers}


# ------------------------------ forward pass ---------------------------------

def encoder_layer_fwd(p, h, add_mask, cfg):
    att = attention_block(h, add_mask, p["attention"], cfg)
    B, S, H = att.shape
    out = ffn_res_ln(att.reshape(B * S, H), p["ffn"],
                     p["ln"]["g"], p["ln"]["b"], cfg["eps"])
    return out.reshape(B, S, H)


def expert_common_fwd(p, h, add_mask, cfg):
    att = attention_block(h, add_mask, p["attention"], cfg)
    B, S, H = att.shape
    out = switch_res_ln(att.reshape(B * S, H), p["ffn"],
                        p["ln"]["g"], p["ln"]["b"], cfg)
    return out.reshape(B, S, H)


def expert_unique_fwd(p, h, add_mask, cfg):
    att = attention_block(h, add_mask, p["attention"], cfg, lora=p["lora"])
    B, S, H = att.shape
    out = switch_res_ln(att.reshape(B * S, H), p["ffn"],
                        p["ln"]["g"], p["ln"]["b"], cfg)
    return out.reshape(B, S, H)


def momo_layer_fwd(p, h, add_mask, cluster_list, cfg):
    unique = jnp.zeros_like(h)
    for i, idx in enumerate(cluster_list):
        idx = jnp.asarray(idx)
        y = expert_unique_fwd(p["unique"][i], h[idx], add_mask[idx], cfg)
        unique = unique.at[idx].set(y)
    common = expert_common_fwd(p["common"], h, add_mask, cfg)
    return unique + common


def embeddings_fwd(p, input_ids, cfg):
    B, S = input_ids.shape
    H = cfg["hidden"]
    we = p["word"][input_ids]                      # gather stays in JAX glue
    pe = p["pos"][:S][None, :, :]
    x = (we + pe).reshape(B * S, H)
    x = layer_norm(x, p["ln"]["g"], p["ln"]["b"], cfg["eps"])
    return x.reshape(B, S, H)


def model_fwd(params, input_ids, attention_mask, cluster_list, cfg):
    # BERT additive attention mask: (B, 1, S)
    add_mask = (1.0 - attention_mask.astype(jnp.float32))[:, None, :] * -10000.0
    h = embeddings_fwd(params["embeddings"], input_ids, cfg)
    for lp in params["layers"]:
        if "common" in lp:
            h = momo_layer_fwd(lp, h, add_mask, cluster_list, cfg)
        else:
            h = encoder_layer_fwd(lp, h, add_mask, cfg)
    return h


# ---------------------------------- main -------------------------------------

if __name__ == "__main__":
    cfg = dict(hidden=32, num_heads=4, intermediate=64, vocab=64, max_pos=16,
               eps=1e-12, num_hidden_layers=2, num_common_layers=1,
               n_switch_experts=2, n_unique_experts=2, lora_dim=8)

    root = jax.random.PRNGKey(0)
    k_params, k_ids = jax.random.split(root)
    params = init_model(k_params, cfg)

    B, S = 2, 8
    input_ids = jax.random.randint(k_ids, (B, S), 0, cfg["vocab"], dtype=jnp.int32)
    attention_mask = jnp.ones((B, S), jnp.float32)
    cluster_list = [[0], [1]]   # batch element 0 -> unique expert 0, 1 -> expert 1

    fwd = jax.jit(lambda prm, ids, msk: model_fwd(prm, ids, msk, cluster_list, cfg))
    out = jax.block_until_ready(fwd(params, input_ids, attention_mask))

    assert out.shape == (B, S, cfg["hidden"])
    assert bool(jnp.all(jnp.isfinite(out)))
    print("KERNEL_OK")
</pallas_src>

<mosaic_0001>
module attributes {stable_mosaic.version = 11 : i64} {
  func.func @_ln_kernel(%arg0: i32, %arg1: memref<16x32xf32, #tpu.memory_space<vmem>>, %arg2: memref<1x32xf32, #tpu.memory_space<vmem>>, %arg3: memref<1x32xf32, #tpu.memory_space<vmem>>, %arg4: memref<16x32xf32, #tpu.memory_space<vmem>>) attributes {dimension_semantics = [#tpu.dimension_semantics<parallel>], iteration_bounds = array<i64: 1>, scalar_prefetch = 0 : i64, scratch_operands = 0 : i64, tpu.core_type = #tpu.core_type<tc>, window_params = [{transform_indices = @transform_0, window_bounds = array<i64: 16, 32>}, {pipeline_mode = #tpu.pipeline_mode<synchronous>, transform_indices = @transform_1, window_bounds = array<i64: 1, 32>}, {pipeline_mode = #tpu.pipeline_mode<synchronous>, transform_indices = @transform_2, window_bounds = array<i64: 1, 32>}, {transform_indices = @transform_3, window_bounds = array<i64: 16, 32>}]} {
    %c0 = arith.constant 0 : index
    %c0_0 = arith.constant 0 : index
    %0 = vector.load %arg1[%c0, %c0_0] : memref<16x32xf32, #tpu.memory_space<vmem>>, vector<16x32xf32>
    %c0_1 = arith.constant 0 : index
    %c0_2 = arith.constant 0 : index
    %1 = vector.load %arg2[%c0_1, %c0_2] : memref<1x32xf32, #tpu.memory_space<vmem>>, vector<1x32xf32>
    %c0_3 = arith.constant 0 : index
    %c0_4 = arith.constant 0 : index
    %2 = vector.load %arg3[%c0_3, %c0_4] : memref<1x32xf32, #tpu.memory_space<vmem>>, vector<1x32xf32>
    %cst = arith.constant dense<0.000000e+00> : vector<16xf32>
    %3 = vector.multi_reduction <add>, %0, %cst [1] : vector<16x32xf32> to vector<16xf32>
    %4 = vector.shape_cast %3 : vector<16xf32> to vector<16x1xf32>
    %cst_5 = arith.constant 3.200000e+01 : f32
    %5 = vector.broadcast %cst_5 : f32 to vector<16x1xf32>
    %6 = arith.divf %4, %5 : vector<16x1xf32>
    %7 = vector.broadcast %6 : vector<16x1xf32> to vector<16x32xf32>
    %8 = arith.subf %0, %7 : vector<16x32xf32>
    %9 = arith.mulf %8, %8 : vector<16x32xf32>
    %cst_6 = arith.constant dense<0.000000e+00> : vector<16xf32>
    %10 = vector.multi_reduction <add>, %9, %cst_6 [1] : vector<16x32xf32> to vector<16xf32>
    %11 = vector.shape_cast %10 : vector<16xf32> to vector<16x1xf32>
    %cst_7 = arith.constant 3.200000e+01 : f32
    %12 = vector.broadcast %cst_7 : f32 to vector<16x1xf32>
    %13 = arith.divf %11, %12 : vector<16x1xf32>
    %14 = vector.broadcast %6 : vector<16x1xf32> to vector<16x32xf32>
    %15 = arith.subf %0, %14 : vector<16x32xf32>
    %cst_8 = arith.constant 9.99999996E-13 : f32
    %16 = vector.broadcast %cst_8 : f32 to vector<16x1xf32>
    %17 = arith.addf %13, %16 : vector<16x1xf32>
    %18 = math.rsqrt %17 : vector<16x1xf32>
    %19 = vector.broadcast %18 : vector<16x1xf32> to vector<16x32xf32>
    %20 = arith.mulf %15, %19 : vector<16x32xf32>
    %21 = vector.broadcast %1 : vector<1x32xf32> to vector<16x32xf32>
    %22 = arith.mulf %20, %21 : vector<16x32xf32>
    %23 = vector.broadcast %2 : vector<1x32xf32> to vector<16x32xf32>
    %24 = arith.addf %22, %23 : vector<16x32xf32>
    %c0_9 = arith.constant 0 : index
    %c0_10 = arith.constant 0 : index
    %25 = vector.load %arg4[%c0_9, %c0_10] : memref<16x32xf32, #tpu.memory_space<vmem>>, vector<16x32xf32>
    tpu.vector_store %arg4[%c0_9, %c0_10], %24 {strides = array<i32>} : memref<16x32xf32, #tpu.memory_space<vmem>>, vector<16x32xf32>,
    return
  }
  func.func @transform_0(%arg0: i32) -> (i32, i32) {
    %c0_i32 = arith.constant 0 : i32
    %c0_i32_0 = arith.constant 0 : i32
    return %arg0, %c0_i32 : i32, i32
  }
  func.func @transform_1(%arg0: i32) -> (i32, i32) {
    %c0_i32 = arith.constant 0 : i32
    %c0_i32_0 = arith.constant 0 : i32
    %c0_i32_1 = arith.constant 0 : i32
    return %c0_i32, %c0_i32_0 : i32, i32
  }
  func.func @transform_2(%arg0: i32) -> (i32, i32) {
    %c0_i32 = arith.constant 0 : i32
    %c0_i32_0 = arith.constant 0 : i32
    %c0_i32_1 = arith.constant 0 : i32
    return %c0_i32, %c0_i32_0 : i32, i32
  }
  func.func @transform_3(%arg0: i32) -> (i32, i32) {
    %c0_i32 = arith.constant 0 : i32
    %c0_i32_0 = arith.constant 0 : i32
    return %arg0, %c0_i32 : i32, i32
  }
}

module attributes {stable_mosaic.version = 11 : i64} {
  func.func @_attn_kernel(%arg0: i32, %arg1: i32, %arg2: memref<1x8x32xf32, #tpu.memory_space<vmem>>, %arg3: memref<1x8x32xf32, #tpu.memory_space<vmem>>, %arg4: memref<1x1x8xf32, #tpu.memory_space<vmem>>, %arg5: memref<32x32xbf16, #tpu.memory_space<vmem>>, %arg6: memref<1x32xf32, #tpu.memory_space<vmem>>, %arg7: memref<32x64xbf16, #tpu.memory_space<vmem>>, %arg8: memref<1x64xf32, #tpu.memory_space<vmem>>, %arg9: memref<32x32xbf16, #tpu.memory_space<vmem>>, %arg10: memref<1x32xf32, #tpu.memory_space<vmem>>, %arg11: memref<1x32xf32, #tpu.memory_space<vmem>>, %arg12: memref<1x32xf32, #tpu.memory_space<vmem>>, %arg13: memref<1x8x32xf32, #tpu.memory_space<vmem>>, %arg14: memref<8x32xf32, #tpu.memory_space<vmem>>) attributes {dimension_semantics = [#tpu.dimension_semantics<parallel>, #tpu.dimension_semantics<parallel>], iteration_bounds = array<i64: 2, 1>, scalar_prefetch = 0 : i64, scratch_operands = 1 : i64, tpu.core_type = #tpu.core_type<tc>, window_params = [{transform_indices = @transform_0, window_bounds = array<i64: 1, 8, 32>}, {transform_indices = @transform_1, window_bounds = array<i64: 1, 8, 32>}, {transform_indices = @transform_2, window_bounds = array<i64: 1, 1, 8>}, {pipeline_mode = #tpu.pipeline_mode<synchronous>, transform_indices = @transform_3, window_bounds = array<i64: 32, 32>}, {pipeline_mode = #tpu.pipeline_mode<synchronous>, transform_indices = @transform_4, window_bounds = array<i64: 1, 32>}, {pipeline_mode = #tpu.pipeline_mode<synchronous>, transform_indices = @transform_5, window_bounds = array<i64: 32, 64>}, {pipeline_mode = #tpu.pipeline_mode<synchronous>, transform_indices = @transform_6, window_bounds = array<i64: 1, 64>}, {pipeline_mode = #tpu.pipeline_mode<synchronous>, transform_indices = @transform_7, window_bounds = array<i64: 32, 32>}, {pipeline_mode = #tpu.pipeline_mode<synchronous>, transform_indices = @transform_8, window_bounds = array<i64: 1, 32>}, {pipeline_mode = #tpu.pipeline_mode<synchronous>, transform_indices = @transform_9, window_bounds = array<i64: 1, 32>}, {pipeline_mode = #tpu.pipeline_mode<synchronous>, transform_indices = @transform_10, window_bounds = array<i64: 1, 32>}, {transform_indices = @transform_11, window_bounds = array<i64: 1, 8, 32>}]} {
    %c0 = arith.constant 0 : index
    %c0_0 = arith.constant 0 : index
    %c0_1 = arith.constant 0 : index
    %0 = vector.load %arg2[%c0, %c0_0, %c0_1] : memref<1x8x32xf32, #tpu.memory_space<vmem>>, vector<1x8x32xf32>
    %1 = vector.shape_cast %0 : vector<1x8x32xf32> to vector<8x32xf32>
    %c0_2 = arith.constant 0 : index
    %c0_3 = arith.constant 0 : index
    %c0_4 = arith.constant 0 : index
    %2 = vector.load %arg3[%c0_2, %c0_3, %c0_4] : memref<1x8x32xf32, #tpu.memory_space<vmem>>, vector<1x8x32xf32>
    %3 = vector.shape_cast %2 : vector<1x8x32xf32> to vector<8x32xf32>
    %c0_5 = arith.constant 0 : index
    %c0_6 = arith.constant 0 : index
    %c0_7 = arith.constant 0 : index
    %4 = vector.load %arg4[%c0_5, %c0_6, %c0_7] : memref<1x1x8xf32, #tpu.memory_space<vmem>>, vector<1x1x8xf32>
    %5 = vector.shape_cast %4 : vector<1x1x8xf32> to vector<1x8xf32>
    %6 = arith.truncf %1 : vector<8x32xf32> to vector<8x32xbf16>
    %7 = arith.truncf %3 : vector<8x32xf32> to vector<8x32xbf16>
    %c0_8 = arith.constant 0 : index
    %c0_9 = arith.constant 0 : index
    %8 = vector.load %arg5[%c0_8, %c0_9] : memref<32x32xbf16, #tpu.memory_space<vmem>>, vector<32x32xbf16>
    %cst = arith.constant dense<0.000000e+00> : vector<8x32xf32>
    %9 = tpu.matmul %6, %8, %cst {dimension_numbers = #tpu.dot_dimension_numbers<[1], [0], [0], [1], [0, 0, 1, 1], [], []>} : vector<8x32xbf16>, vector<32x32xbf16>, vector<8x32xf32> -> vector<8x32xf32>
    %c0_10 = arith.constant 0 : index
    %c0_11 = arith.constant 0 : index
    %10 = vector.load %arg6[%c0_10, %c0_11] : memref<1x32xf32, #tpu.memory_space<vmem>>, vector<1x32xf32>
    %11 = vector.broadcast %10 : vector<1x32xf32> to vector<8x32xf32>
    %12 = arith.addf %9, %11 : vector<8x32xf32>
    %c0_12 = arith.constant 0 : index
    %c0_13 = arith.constant 0 : index
    %13 = vector.load %arg7[%c0_12, %c0_13] : memref<32x64xbf16, #tpu.memory_space<vmem>>, vector<32x64xbf16>
    %cst_14 = arith.constant dense<0.000000e+00> : vector<8x64xf32>
    %14 = tpu.matmul %7, %13, %cst_14 {dimension_numbers = #tpu.dot_dimension_numbers<[1], [0], [0], [1], [0, 0, 1, 1], [], []>} : vector<8x32xbf16>, vector<32x64xbf16>, vector<8x64xf32> -> vector<8x64xf32>
    %c0_15 = arith.constant 0 : index
    %c0_16 = arith.constant 0 : index
    %15 = vector.load %arg8[%c0_15, %c0_16] : memref<1x64xf32, #tpu.memory_space<vmem>>, vector<1x64xf32>
    %16 = vector.broadcast %15 : vector<1x64xf32> to vector<8x64xf32>
    %17 = arith.addf %14, %16 : vector<8x64xf32>
    %18 = vector.extract_strided_slice %17 {offsets = [0, 0], sizes = [8, 32], strides = [1, 1]} : vector<8x64xf32> to vector<8x32xf32>
    %19 = vector.extract_strided_slice %17 {offsets = [0, 32], sizes = [8, 32], strides = [1, 1]} : vector<8x64xf32> to vector<8x32xf32>
    %20 = vector.extract_strided_slice %12 {offsets = [0, 0], sizes = [8, 8], strides = [1, 1]} : vector<8x32xf32> to vector<8x8xf32>
    %21 = arith.truncf %20 : vector<8x8xf32> to vector<8x8xbf16>
    %22 = vector.extract_strided_slice %18 {offsets = [0, 0], sizes = [8, 8], strides = [1, 1]} : vector<8x32xf32> to vector<8x8xf32>
    %23 = arith.truncf %22 : vector<8x8xf32> to vector<8x8xbf16>
    %24 = vector.extract_strided_slice %19 {offsets = [0, 0], sizes = [8, 8], strides = [1, 1]} : vector<8x32xf32> to vector<8x8xf32>
    %25 = arith.truncf %24 : vector<8x8xf32> to vector<8x8xbf16>
    %cst_17 = arith.constant dense<0.000000e+00> : vector<8x8xf32>
    %26 = tpu.matmul %21, %23, %cst_17 {dimension_numbers = #tpu.dot_dimension_numbers<[1], [1], [0], [0], [0, 0, 1, 0], [], []>} : vector<8x8xbf16>, vector<8x8xbf16>, vector<8x8xf32> -> vector<8x8xf32>
    %cst_18 = arith.constant 0.353553385 : f32
    %27 = vector.broadcast %cst_18 : f32 to vector<8x8xf32>
    %28 = arith.mulf %26, %27 : vector<8x8xf32>
    %29 = vector.broadcast %5 : vector<1x8xf32> to vector<8x8xf32>
    %30 = arith.addf %28, %29 : vector<8x8xf32>
    %cst_19 = arith.constant dense<0xFF800000> : vector<8xf32>
    %31 = vector.multi_reduction <maximumf>, %30, %cst_19 [1] : vector<8x8xf32> to vector<8xf32>
    %32 = vector.shape_cast %31 : vector<8xf32> to vector<8x1xf32>
    %33 = vector.broadcast %32 : vector<8x1xf32> to vector<8x8xf32>
    %34 = arith.subf %30, %33 : vector<8x8xf32>
    %35 = math.exp %34 : vector<8x8xf32>
    %cst_20 = arith.constant dense<0.000000e+00> : vector<8xf32>
    %36 = vector.multi_reduction <add>, %35, %cst_20 [1] : vector<8x8xf32> to vector<8xf32>
    %37 = vector.shape_cast %36 : vector<8xf32> to vector<8x1xf32>
    %38 = tpu.reciprocal %37 {approx = true} : vector<8x1xf32> -> vector<8x1xf32>
    %39 = vector.broadcast %38 : vector<8x1xf32> to vector<8x8xf32>
    %40 = arith.mulf %35, %39 : vector<8x8xf32>
    %41 = arith.truncf %40 : vector<8x8xf32> to vector<8x8xbf16>
    %cst_21 = arith.constant dense<0.000000e+00> : vector<8x8xf32>
    %42 = tpu.matmul %41, %25, %cst_21 {dimension_numbers = #tpu.dot_dimension_numbers<[1], [0], [0], [1], [0, 0, 1, 1], [], []>} : vector<8x8xbf16>, vector<8x8xbf16>, vector<8x8xf32> -> vector<8x8xf32>
    %c0_22 = arith.constant 0 : index
    %c0_23 = arith.constant 0 : index
    %43 = vector.load %arg14[%c0_22, %c0_23] : memref<8x32xf32, #tpu.memory_space<vmem>>, vector<8x8xf32>
    tpu.vector_store %arg14[%c0_22, %c0_23], %42 {strides = array<i32>} : memref<8x32xf32, #tpu.memory_space<vmem>>, vector<8x8xf32>,
    %44 = vector.extract_strided_slice %12 {offsets = [0, 8], sizes = [8, 8], strides = [1, 1]} : vector<8x32xf32> to vector<8x8xf32>
    %45 = arith.truncf %44 : vector<8x8xf32> to vector<8x8xbf16>
    %46 = vector.extract_strided_slice %18 {offsets = [0, 8], sizes = [8, 8], strides = [1, 1]} : vector<8x32xf32> to vector<8x8xf32>
    %47 = arith.truncf %46 : vector<8x8xf32> to vector<8x8xbf16>
    %48 = vector.extract_strided_slice %19 {offsets = [0, 8], sizes = [8, 8], strides = [1, 1]} : vector<8x32xf32> to vector<8x8xf32>
    %49 = arith.truncf %48 : vector<8x8xf32> to vector<8x8xbf16>
    %cst_24 = arith.constant dense<0.000000e+00> : vector<8x8xf32>
    %50 = tpu.matmul %45, %47, %cst_24 {dimension_numbers = #tpu.dot_dimension_numbers<[1], [1], [0], [0], [0, 0, 1, 0], [], []>} : vector<8x8xbf16>, vector<8x8xbf16>, vector<8x8xf32> -> vector<8x8xf32>
    %cst_25 = arith.constant 0.353553385 : f32
    %51 = vector.broadcast %cst_25 : f32 to vector<8x8xf32>
    %52 = arith.mulf %50, %51 : vector<8x8xf32>
    %53 = vector.broadcast %5 : vector<1x8xf32> to vector<8x8xf32>
    %54 = arith.addf %52, %53 : vector<8x8xf32>
    %cst_26 = arith.constant dense<0xFF800000> : vector<8xf32>
    %55 = vector.multi_reduction <maximumf>, %54, %cst_26 [1] : vector<8x8xf32> to vector<8xf32>
    %56 = vector.shape_cast %55 : vector<8xf32> to vector<8x1xf32>
    %57 = vector.broadcast %56 : vector<8x1xf32> to vector<8x8xf32>
    %58 = arith.subf %54, %57 : vector<8x8xf32>
    %59 = math.exp %58 : vector<8x8xf32>
    %cst_27 = arith.constant dense<0.000000e+00> : vector<8xf32>
    %60 = vector.multi_reduction <add>, %59, %cst_27 [1] : vector<8x8xf32> to vector<8xf32>
    %61 = vector.shape_cast %60 : vector<8xf32> to vector<8x1xf32>
    %62 = tpu.reciprocal %61 {approx = true} : vector<8x1xf32> -> vector<8x1xf32>
    %63 = vector.broadcast %62 : vector<8x1xf32> to vector<8x8xf32>
    %64 = arith.mulf %59, %63 : vector<8x8xf32>
    %65 = arith.truncf %64 : vector<8x8xf32> to vector<8x8xbf16>
    %cst_28 = arith.constant dense<0.000000e+00> : vector<8x8xf32>
    %66 = tpu.matmul %65, %49, %cst_28 {dimension_numbers = #tpu.dot_dimension_numbers<[1], [0], [0], [1], [0, 0, 1, 1], [], []>} : vector<8x8xbf16>, vector<8x8xbf16>, vector<8x8xf32> -> vector<8x8xf32>
    %c0_29 = arith.constant 0 : index
    %c8 = arith.constant 8 : index
    %67 = vector.load %arg14[%c0_29, %c8] : memref<8x32xf32, #tpu.memory_space<vmem>>, vector<8x8xf32>
    tpu.vector_store %arg14[%c0_29, %c8], %66 {strides = array<i32>} : memref<8x32xf32, #tpu.memory_space<vmem>>, vector<8x8xf32>,
    %68 = vector.extract_strided_slice %12 {offsets = [0, 16], sizes = [8, 8], strides = [1, 1]} : vector<8x32xf32> to vector<8x8xf32>
    %69 = arith.truncf %68 : vector<8x8xf32> to vector<8x8xbf16>
    %70 = vector.extract_strided_slice %18 {offsets = [0, 16], sizes = [8, 8], strides = [1, 1]} : vector<8x32xf32> to vector<8x8xf32>
    %71 = arith.truncf %70 : vector<8x8xf32> to vector<8x8xbf16>
    %72 = vector.extract_strided_slice %19 {offsets = [0, 16], sizes = [8, 8], strides = [1, 1]} : vector<8x32xf32> to vector<8x8xf32>
    %73 = arith.truncf %72 : vector<8x8xf32> to vector<8x8xbf16>
    %cst_30 = arith.constant dense<0.000000e+00> : vector<8x8xf32>
    %74 = tpu.matmul %69, %71, %cst_30 {dimension_numbers = #tpu.dot_dimension_numbers<[1], [1], [0], [0], [0, 0, 1, 0], [], []>} : vector<8x8xbf16>, vector<8x8xbf16>, vector<8x8xf32> -> vector<8x8xf32>
    %cst_31 = arith.constant 0.353553385 : f32
    %75 = vector.broadcast %cst_31 : f32 to vector<8x8xf32>
    %76 = arith.mulf %74, %75 : vector<8x8xf32>
    %77 = vector.broadcast %5 : vector<1x8xf32> to vector<8x8xf32>
    %78 = arith.addf %76, %77 : vector<8x8xf32>
    %cst_32 = arith.constant dense<0xFF800000> : vector<8xf32>
    %79 = vector.multi_reduction <maximumf>, %78, %cst_32 [1] : vector<8x8xf32> to vector<8xf32>
    %80 = vector.shape_cast %79 : vector<8xf32> to vector<8x1xf32>
    %81 = vector.broadcast %80 : vector<8x1xf32> to vector<8x8xf32>
    %82 = arith.subf %78, %81 : vector<8x8xf32>
    %83 = math.exp %82 : vector<8x8xf32>
    %cst_33 = arith.constant dense<0.000000e+00> : vector<8xf32>
    %84 = vector.multi_reduction <add>, %83, %cst_33 [1] : vector<8x8xf32> to vector<8xf32>
    %85 = vector.shape_cast %84 : vector<8xf32> to vector<8x1xf32>
    %86 = tpu.reciprocal %85 {approx = true} : vector<8x1xf32> -> vector<8x1xf32>
    %87 = vector.broadcast %86 : vector<8x1xf32> to vector<8x8xf32>
    %88 = arith.mulf %83, %87 : vector<8x8xf32>
    %89 = arith.truncf %88 : vector<8x8xf32> to vector<8x8xbf16>
    %cst_34 = arith.constant dense<0.000000e+00> : vector<8x8xf32>
    %90 = tpu.matmul %89, %73, %cst_34 {dimension_numbers = #tpu.dot_dimension_numbers<[1], [0], [0], [1], [0, 0, 1, 1], [], []>} : vector<8x8xbf16>, vector<8x8xbf16>, vector<8x8xf32> -> vector<8x8xf32>
    %c0_35 = arith.constant 0 : index
    %c16 = arith.constant 16 : index
    %91 = vector.load %arg14[%c0_35, %c16] : memref<8x32xf32, #tpu.memory_space<vmem>>, vector<8x8xf32>
    tpu.vector_store %arg14[%c0_35, %c16], %90 {strides = array<i32>} : memref<8x32xf32, #tpu.memory_space<vmem>>, vector<8x8xf32>,
    %92 = vector.extract_strided_slice %12 {offsets = [0, 24], sizes = [8, 8], strides = [1, 1]} : vector<8x32xf32> to vector<8x8xf32>
    %93 = arith.truncf %92 : vector<8x8xf32> to vector<8x8xbf16>
    %94 = vector.extract_strided_slice %18 {offsets = [0, 24], sizes = [8, 8], strides = [1, 1]} : vector<8x32xf32> to vector<8x8xf32>
    %95 = arith.truncf %94 : vector<8x8xf32> to vector<8x8xbf16>
    %96 = vector.extract_strided_slice %19 {offsets = [0, 24], sizes = [8, 8], strides = [1, 1]} : vector<8x32xf32> to vector<8x8xf32>
    %97 = arith.truncf %96 : vector<8x8xf32> to vector<8x8xbf16>
    %cst_36 = arith.constant dense<0.000000e+00> : vector<8x8xf32>
    %98 = tpu.matmul %93, %95, %cst_36 {dimension_numbers = #tpu.dot_dimension_numbers<[1], [1], [0], [0], [0, 0, 1, 0], [], []>} : vector<8x8xbf16>, vector<8x8xbf16>, vector<8x8xf32> -> vector<8x8xf32>
    %cst_37 = arith.constant 0.353553385 : f32
    %99 = vector.broadcast %cst_37 : f32 to vector<8x8xf32>
    %100 = arith.mulf %98, %99 : vector<8x8xf32>
    %101 = vector.broadcast %5 : vector<1x8xf32> to vector<8x8xf32>
    %102 = arith.addf %100, %101 : vector<8x8xf32>
    %cst_38 = arith.constant dense<0xFF800000> : vector<8xf32>
    %103 = vector.multi_reduction <maximumf>, %102, %cst_38 [1] : vector<8x8xf32> to vector<8xf32>
    %104 = vector.shape_cast %103 : vector<8xf32> to vector<8x1xf32>
    %105 = vector.broadcast %104 : vector<8x1xf32> to vector<8x8xf32>
    %106 = arith.subf %102, %105 : vector<8x8xf32>
    %107 = math.exp %106 : vector<8x8xf32>
    %cst_39 = arith.constant dense<0.000000e+00> : vector<8xf32>
    %108 = vector.multi_reduction <add>, %107, %cst_39 [1] : vector<8x8xf32> to vector<8xf32>
    %109 = vector.shape_cast %108 : vector<8xf32> to vector<8x1xf32>
    %110 = tpu.reciprocal %109 {approx = true} : vector<8x1xf32> -> vector<8x1xf32>
    %111 = vector.broadcast %110 : vector<8x1xf32> to vector<8x8xf32>
    %112 = arith.mulf %107, %111 : vector<8x8xf32>
    %113 = arith.truncf %112 : vector<8x8xf32> to vector<8x8xbf16>
    %cst_40 = arith.constant dense<0.000000e+00> : vector<8x8xf32>
    %114 = tpu.matmul %113, %97, %cst_40 {dimension_numbers = #tpu.dot_dimension_numbers<[1], [0], [0], [1], [0, 0, 1, 1], [], []>} : vector<8x8xbf16>, vector<8x8xbf16>, vector<8x8xf32> -> vector<8x8xf32>
    %c0_41 = arith.constant 0 : index
    %c24 = arith.constant 24 : index
    %115 = vector.load %arg14[%c0_41, %c24] : memref<8x32xf32, #tpu.memory_space<vmem>>, vector<8x8xf32>
    tpu.vector_store %arg14[%c0_41, %c24], %114 {strides = array<i32>} : memref<8x32xf32, #tpu.memory_space<vmem>>, vector<8x8xf32>,
    %c0_42 = arith.constant 0 : index
    %c0_43 = arith.constant 0 : index
    %116 = vector.load %arg14[%c0_42, %c0_43] : memref<8x32xf32, #tpu.memory_space<vmem>>, vector<8x32xf32>
    %117 = arith.truncf %116 : vector<8x32xf32> to vector<8x32xbf16>
    %c0_44 = arith.constant 0 : index
    %c0_45 = arith.constant 0 : index
    %118 = vector.load %arg9[%c0_44, %c0_45] : memref<32x32xbf16, #tpu.memory_space<vmem>>, vector<32x32xbf16>
    %cst_46 = arith.constant dense<0.000000e+00> : vector<8x32xf32>
    %119 = tpu.matmul %117, %118, %cst_46 {dimension_numbers = #tpu.dot_dimension_numbers<[1], [0], [0], [1], [0, 0, 1, 1], [], []>} : vector<8x32xbf16>, vector<32x32xbf16>, vector<8x32xf32> -> vector<8x32xf32>
    %c0_47 = arith.constant 0 : index
    %c0_48 = arith.constant 0 : index
    %120 = vector.load %arg10[%c0_47, %c0_48] : memref<1x32xf32, #tpu.memory_space<vmem>>, vector<1x32xf32>
    %121 = vector.broadcast %120 : vector<1x32xf32> to vector<8x32xf32>
    %122 = arith.addf %119, %121 : vector<8x32xf32>
    %123 = arith.addf %122, %1 : vector<8x32xf32>
    %c0_49 = arith.constant 0 : index
    %c0_50 = arith.constant 0 : index
    %124 = vector.load %arg11[%c0_49, %c0_50] : memref<1x32xf32, #tpu.memory_space<vmem>>, vector<1x32xf32>
    %c0_51 = arith.constant 0 : index
    %c0_52 = arith.constant 0 : index
    %125 = vector.load %arg12[%c0_51, %c0_52] : memref<1x32xf32, #tpu.memory_space<vmem>>, vector<1x32xf32>
    %cst_53 = arith.constant dense<0.000000e+00> : vector<8xf32>
    %126 = vector.multi_reduction <add>, %123, %cst_53 [1] : vector<8x32xf32> to vector<8xf32>
    %127 = vector.shape_cast %126 : vector<8xf32> to vector<8x1xf32>
    %cst_54 = arith.constant 3.200000e+01 : f32
    %128 = vector.broadcast %cst_54 : f32 to vector<8x1xf32>
    %129 = arith.divf %127, %128 : vector<8x1xf32>
    %130 = vector.broadcast %129 : vector<8x1xf32> to vector<8x32xf32>
    %131 = arith.subf %123, %130 : vector<8x32xf32>
    %132 = arith.mulf %131, %131 : vector<8x32xf32>
    %cst_55 = arith.constant dense<0.000000e+00> : vector<8xf32>
    %133 = vector.multi_reduction <add>, %132, %cst_55 [1] : vector<8x32xf32> to vector<8xf32>
    %134 = vector.shape_cast %133 : vector<8xf32> to vector<8x1xf32>
    %cst_56 = arith.constant 3.200000e+01 : f32
    %135 = vector.broadcast %cst_56 : f32 to vector<8x1xf32>
    %136 = arith.divf %134, %135 : vector<8x1xf32>
    %137 = vector.broadcast %129 : vector<8x1xf32> to vector<8x32xf32>
    %138 = arith.subf %123, %137 : vector<8x32xf32>
    %cst_57 = arith.constant 9.99999996E-13 : f32
    %139 = vector.broadcast %cst_57 : f32 to vector<8x1xf32>
    %140 = arith.addf %136, %139 : vector<8x1xf32>
    %141 = math.rsqrt %140 : vector<8x1xf32>
    %142 = vector.broadcast %141 : vector<8x1xf32> to vector<8x32xf32>
    %143 = arith.mulf %138, %142 : vector<8x32xf32>
    %144 = vector.broadcast %124 : vector<1x32xf32> to vector<8x32xf32>
    %145 = arith.mulf %143, %144 : vector<8x32xf32>
    %146 = vector.broadcast %125 : vector<1x32xf32> to vector<8x32xf32>
    %147 = arith.addf %145, %146 : vector<8x32xf32>
    %c0_58 = arith.constant 0 : index
    %c0_59 = arith.constant 0 : index
    %c0_60 = arith.constant 0 : index
    %148 = vector.load %arg13[%c0_58, %c0_59, %c0_60] : memref<1x8x32xf32, #tpu.memory_space<vmem>>, vector<1x8x32xf32>
    %149 = vector.shape_cast %148 : vector<1x8x32xf32> to vector<8x32xf32>
    %150 = vector.shape_cast %147 : vector<8x32xf32> to vector<1x8x32xf32>
    tpu.vector_store %arg13[%c0_58, %c0_59, %c0_60], %150 {strides = array<i32>} : memref<1x8x32xf32, #tpu.memory_space<vmem>>, vector<1x8x32xf32>,
    return
  }
  func.func @transform_0(%arg0: i32, %arg1: i32) -> (i32, i32, i32) {
    %c0_i32 = arith.constant 0 : i32
    %c0_i32_0 = arith.constant 0 : i32
    return %arg0, %arg1, %c0_i32 : i32, i32, i32
  }
  func.func @transform_1(%arg0: i32, %arg1: i32) -> (i32, i32, i32) {
    %c0_i32 = arith.constant 0 : i32
    %c0_i32_0 = arith.constant 0 : i32
    %c0_i32_1 = arith.constant 0 : i32
    return %arg0, %c0_i32, %c0_i32_0 : i32, i32, i32
  }
  func.func @transform_2(%arg0: i32, %arg1: i32) -> (i32, i32, i32) {
    %c0_i32 = arith.constant 0 : i32
    %c0_i32_0 = arith.constant 0 : i32
    %c0_i32_1 = arith.constant 0 : i32
    return %arg0, %c0_i32, %c0_i32_0 : i32, i32, i32
  }
  func.func @transform_3(%arg0: i32, %arg1: i32) -> (i32, i32) {
    %c0_i32 = arith.constant 0 : i32
    %c0_i32_0 = arith.constant 0 : i32
    %c0_i32_1 = arith.constant 0 : i32
    return %c0_i32, %c0_i32_0 : i32, i32
  }
  func.func @transform_4(%arg0: i32, %arg1: i32) -> (i32, i32) {
    %c0_i32 = arith.constant 0 : i32
    %c0_i32_0 = arith.constant 0 : i32
    %c0_i32_1 = arith.constant 0 : i32
    return %c0_i32, %c0_i32_0 : i32, i32
  }
  func.func @transform_5(%arg0: i32, %arg1: i32) -> (i32, i32) {
    %c0_i32 = arith.constant 0 : i32
    %c0_i32_0 = arith.constant 0 : i32
    %c0_i32_1 = arith.constant 0 : i32
    return %c0_i32, %c0_i32_0 : i32, i32
  }
  func.func @transform_6(%arg0: i32, %arg1: i32) -> (i32, i32) {
    %c0_i32 = arith.constant 0 : i32
    %c0_i32_0 = arith.constant 0 : i32
    %c0_i32_1 = arith.constant 0 : i32
    return %c0_i32, %c0_i32_0 : i32, i32
  }
  func.func @transform_7(%arg0: i32, %arg1: i32) -> (i32, i32) {
    %c0_i32 = arith.constant 0 : i32
    %c0_i32_0 = arith.constant 0 : i32
    %c0_i32_1 = arith.constant 0 : i32
    return %c0_i32, %c0_i32_0 : i32, i32
  }
  func.func @transform_8(%arg0: i32, %arg1: i32) -> (i32, i32) {
    %c0_i32 = arith.constant 0 : i32
    %c0_i32_0 = arith.constant 0 : i32
    %c0_i32_1 = arith.constant 0 : i32
    return %c0_i32, %c0_i32_0 : i32, i32
  }
  func.func @transform_9(%arg0: i32, %arg1: i32) -> (i32, i32) {
    %c0_i32 = arith.constant 0 : i32
    %c0_i32_0 = arith.constant 0 : i32
    %c0_i32_1 = arith.constant 0 : i32
    return %c0_i32, %c0_i32_0 : i32, i32
  }
  func.func @transform_10(%arg0: i32, %arg1: i32) -> (i32, i32) {
    %c0_i32 = arith.constant 0 : i32
    %c0_i32_0 = arith.constant 0 : i32
    %c0_i32_1 = arith.constant 0 : i32
    return %c0_i32, %c0_i32_0 : i32, i32
  }
  func.func @transform_11(%arg0: i32, %arg1: i32) -> (i32, i32, i32) {
    %c0_i32 = arith.constant 0 : i32
    %c0_i32_0 = arith.constant 0 : i32
    return %arg0, %arg1, %c0_i32 : i32, i32, i32
  }
}

module attributes {stable_mosaic.version = 11 : i64} {
  func.func @_ffn_ln_kernel(%arg0: i32, %arg1: memref<16x32xf32, #tpu.memory_space<vmem>>, %arg2: memref<32x64xbf16, #tpu.memory_space<vmem>>, %arg3: memref<1x64xf32, #tpu.memory_space<vmem>>, %arg4: memref<64x32xbf16, #tpu.memory_space<vmem>>, %arg5: memref<1x32xf32, #tpu.memory_space<vmem>>, %arg6: memref<1x32xf32, #tpu.memory_space<vmem>>, %arg7: memref<1x32xf32, #tpu.memory_space<vmem>>, %arg8: memref<16x32xf32, #tpu.memory_space<vmem>>) attributes {dimension_semantics = [#tpu.dimension_semantics<parallel>], iteration_bounds = array<i64: 1>, scalar_prefetch = 0 : i64, scratch_operands = 0 : i64, tpu.core_type = #tpu.core_type<tc>, window_params = [{transform_indices = @transform_0, window_bounds = array<i64: 16, 32>}, {pipeline_mode = #tpu.pipeline_mode<synchronous>, transform_indices = @transform_1, window_bounds = array<i64: 32, 64>}, {pipeline_mode = #tpu.pipeline_mode<synchronous>, transform_indices = @transform_2, window_bounds = array<i64: 1, 64>}, {pipeline_mode = #tpu.pipeline_mode<synchronous>, transform_indices = @transform_3, window_bounds = array<i64: 64, 32>}, {pipeline_mode = #tpu.pipeline_mode<synchronous>, transform_indices = @transform_4, window_bounds = array<i64: 1, 32>}, {pipeline_mode = #tpu.pipeline_mode<synchronous>, transform_indices = @transform_5, window_bounds = array<i64: 1, 32>}, {pipeline_mode = #tpu.pipeline_mode<synchronous>, transform_indices = @transform_6, window_bounds = array<i64: 1, 32>}, {transform_indices = @transform_7, window_bounds = array<i64: 16, 32>}]} {
    %c0 = arith.constant 0 : index
    %c0_0 = arith.constant 0 : index
    %0 = vector.load %arg1[%c0, %c0_0] : memref<16x32xf32, #tpu.memory_space<vmem>>, vector<16x32xf32>
    %1 = arith.truncf %0 : vector<16x32xf32> to vector<16x32xbf16>
    %c0_1 = arith.constant 0 : index
    %c0_2 = arith.constant 0 : index
    %2 = vector.load %arg2[%c0_1, %c0_2] : memref<32x64xbf16, #tpu.memory_space<vmem>>, vector<32x64xbf16>
    %cst = arith.constant dense<0.000000e+00> : vector<16x64xf32>
    %3 = tpu.matmul %1, %2, %cst {dimension_numbers = #tpu.dot_dimension_numbers<[1], [0], [0], [1], [0, 0, 1, 1], [], []>} : vector<16x32xbf16>, vector<32x64xbf16>, vector<16x64xf32> -> vector<16x64xf32>
    %c0_3 = arith.constant 0 : index
    %c0_4 = arith.constant 0 : index
    %4 = vector.load %arg3[%c0_3, %c0_4] : memref<1x64xf32, #tpu.memory_space<vmem>>, vector<1x64xf32>
    %5 = vector.broadcast %4 : vector<1x64xf32> to vector<16x64xf32>
    %6 = arith.addf %3, %5 : vector<16x64xf32>
    %7 = arith.mulf %6, %6 : vector<16x64xf32>
    %8 = arith.mulf %6, %7 : vector<16x64xf32>
    %cst_5 = arith.constant 4.471500e-02 : f32
    %9 = vector.broadcast %cst_5 : f32 to vector<16x64xf32>
    %10 = arith.mulf %9, %8 : vector<16x64xf32>
    %11 = arith.addf %6, %10 : vector<16x64xf32>
    %cst_6 = arith.constant 0.797884583 : f32
    %12 = vector.broadcast %cst_6 : f32 to vector<16x64xf32>
    %13 = arith.mulf %12, %11 : vector<16x64xf32>
    %14 = math.tanh %13 : vector<16x64xf32>
    %cst_7 = arith.constant 1.000000e+00 : f32
    %15 = vector.broadcast %cst_7 : f32 to vector<16x64xf32>
    %16 = arith.addf %15, %14 : vector<16x64xf32>
    %cst_8 = arith.constant 5.000000e-01 : f32
    %17 = vector.broadcast %cst_8 : f32 to vector<16x64xf32>
    %18 = arith.mulf %17, %16 : vector<16x64xf32>
    %19 = arith.mulf %6, %18 : vector<16x64xf32>
    %20 = arith.truncf %19 : vector<16x64xf32> to vector<16x64xbf16>
    %c0_9 = arith.constant 0 : index
    %c0_10 = arith.constant 0 : index
    %21 = vector.load %arg4[%c0_9, %c0_10] : memref<64x32xbf16, #tpu.memory_space<vmem>>, vector<64x32xbf16>
    %cst_11 = arith.constant dense<0.000000e+00> : vector<16x32xf32>
    %22 = tpu.matmul %20, %21, %cst_11 {dimension_numbers = #tpu.dot_dimension_numbers<[1], [0], [0], [1], [0, 0, 1, 1], [], []>} : vector<16x64xbf16>, vector<64x32xbf16>, vector<16x32xf32> -> vector<16x32xf32>
    %23 = arith.addf %0, %22 : vector<16x32xf32>
    %c0_12 = arith.constant 0 : index
    %c0_13 = arith.constant 0 : index
    %24 = vector.load %arg5[%c0_12, %c0_13] : memref<1x32xf32, #tpu.memory_space<vmem>>, vector<1x32xf32>
    %25 = vector.broadcast %24 : vector<1x32xf32> to vector<16x32xf32>
    %26 = arith.addf %23, %25 : vector<16x32xf32>
    %c0_14 = arith.constant 0 : index
    %c0_15 = arith.constant 0 : index
    %27 = vector.load %arg6[%c0_14, %c0_15] : memref<1x32xf32, #tpu.memory_space<vmem>>, vector<1x32xf32>
    %c0_16 = arith.constant 0 : index
    %c0_17 = arith.constant 0 : index
    %28 = vector.load %arg7[%c0_16, %c0_17] : memref<1x32xf32, #tpu.memory_space<vmem>>, vector<1x32xf32>
    %cst_18 = arith.constant dense<0.000000e+00> : vector<16xf32>
    %29 = vector.multi_reduction <add>, %26, %cst_18 [1] : vector<16x32xf32> to vector<16xf32>
    %30 = vector.shape_cast %29 : vector<16xf32> to vector<16x1xf32>
    %cst_19 = arith.constant 3.200000e+01 : f32
    %31 = vector.broadcast %cst_19 : f32 to vector<16x1xf32>
    %32 = arith.divf %30, %31 : vector<16x1xf32>
    %33 = vector.broadcast %32 : vector<16x1xf32> to vector<16x32xf32>
    %34 = arith.subf %26, %33 : vector<16x32xf32>
    %35 = arith.mulf %34, %34 : vector<16x32xf32>
    %cst_20 = arith.constant dense<0.000000e+00> : vector<16xf32>
    %36 = vector.multi_reduction <add>, %35, %cst_20 [1] : vector<16x32xf32> to vector<16xf32>
    %37 = vector.shape_cast %36 : vector<16xf32> to vector<16x1xf32>
    %cst_21 = arith.constant 3.200000e+01 : f32
    %38 = vector.broadcast %cst_21 : f32 to vector<16x1xf32>
    %39 = arith.divf %37, %38 : vector<16x1xf32>
    %40 = vector.broadcast %32 : vector<16x1xf32> to vector<16x32xf32>
    %41 = arith.subf %26, %40 : vector<16x32xf32>
    %cst_22 = arith.constant 9.99999996E-13 : f32
    %42 = vector.broadcast %cst_22 : f32 to vector<16x1xf32>
    %43 = arith.addf %39, %42 : vector<16x1xf32>
    %44 = math.rsqrt %43 : vector<16x1xf32>
    %45 = vector.broadcast %44 : vector<16x1xf32> to vector<16x32xf32>
    %46 = arith.mulf %41, %45 : vector<16x32xf32>
    %47 = vector.broadcast %27 : vector<1x32xf32> to vector<16x32xf32>
    %48 = arith.mulf %46, %47 : vector<16x32xf32>
    %49 = vector.broadcast %28 : vector<1x32xf32> to vector<16x32xf32>
    %50 = arith.addf %48, %49 : vector<16x32xf32>
    %c0_23 = arith.constant 0 : index
    %c0_24 = arith.constant 0 : index
    %51 = vector.load %arg8[%c0_23, %c0_24] : memref<16x32xf32, #tpu.memory_space<vmem>>, vector<16x32xf32>
    tpu.vector_store %arg8[%c0_23, %c0_24], %50 {strides = array<i32>} : memref<16x32xf32, #tpu.memory_space<vmem>>, vector<16x32xf32>,
    return
  }
  func.func @transform_0(%arg0: i32) -> (i32, i32) {
    %c0_i32 = arith.constant 0 : i32
    %c0_i32_0 = arith.constant 0 : i32
    return %arg0, %c0_i32 : i32, i32
  }
  func.func @transform_1(%arg0: i32) -> (i32, i32) {
    %c0_i32 = arith.constant 0 : i32
    %c0_i32_0 = arith.constant 0 : i32
    %c0_i32_1 = arith.constant 0 : i32
    return %c0_i32, %c0_i32_0 : i32, i32
  }
  func.func @transform_2(%arg0: i32) -> (i32, i32) {
    %c0_i32 = arith.constant 0 : i32
    %c0_i32_0 = arith.constant 0 : i32
    %c0_i32_1 = arith.constant 0 : i32
    return %c0_i32, %c0_i32_0 : i32, i32
  }
  func.func @transform_3(%arg0: i32) -> (i32, i32) {
    %c0_i32 = arith.constant 0 : i32
    %c0_i32_0 = arith.constant 0 : i32
    %c0_i32_1 = arith.constant 0 : i32
    return %c0_i32, %c0_i32_0 : i32, i32
  }
  func.func @transform_4(%arg0: i32) -> (i32, i32) {
    %c0_i32 = arith.constant 0 : i32
    %c0_i32_0 = arith.constant 0 : i32
    %c0_i32_1 = arith.constant 0 : i32
    return %c0_i32, %c0_i32_0 : i32, i32
  }
  func.func @transform_5(%arg0: i32) -> (i32, i32) {
    %c0_i32 = arith.constant 0 : i32
    %c0_i32_0 = arith.constant 0 : i32
    %c0_i32_1 = arith.constant 0 : i32
    return %c0_i32, %c0_i32_0 : i32, i32
  }
  func.func @transform_6(%arg0: i32) -> (i32, i32) {
    %c0_i32 = arith.constant 0 : i32
    %c0_i32_0 = arith.constant 0 : i32
    %c0_i32_1 = arith.constant 0 : i32
    return %c0_i32, %c0_i32_0 : i32, i32
  }
  func.func @transform_7(%arg0: i32) -> (i32, i32) {
    %c0_i32 = arith.constant 0 : i32
    %c0_i32_0 = arith.constant 0 : i32
    return %arg0, %c0_i32 : i32, i32
  }
}

module attributes {stable_mosaic.version = 11 : i64} {
  func.func @_attn_lora_kernel(%arg0: i32, %arg1: i32, %arg2: memref<1x8x32xf32, #tpu.memory_space<vmem>>, %arg3: memref<1x8x32xf32, #tpu.memory_space<vmem>>, %arg4: memref<1x1x8xf32, #tpu.memory_space<vmem>>, %arg5: memref<32x32xbf16, #tpu.memory_space<vmem>>, %arg6: memref<1x32xf32, #tpu.memory_space<vmem>>, %arg7: memref<32x64xbf16, #tpu.memory_space<vmem>>, %arg8: memref<1x64xf32, #tpu.memory_space<vmem>>, %arg9: memref<32x32xbf16, #tpu.memory_space<vmem>>, %arg10: memref<1x32xf32, #tpu.memory_space<vmem>>, %arg11: memref<1x32xf32, #tpu.memory_space<vmem>>, %arg12: memref<1x32xf32, #tpu.memory_space<vmem>>, %arg13: memref<32x8xbf16, #tpu.memory_space<vmem>>, %arg14: memref<8x32xbf16, #tpu.memory_space<vmem>>, %arg15: memref<32x8xbf16, #tpu.memory_space<vmem>>, %arg16: memref<8x32xbf16, #tpu.memory_space<vmem>>, %arg17: memref<1x8x32xf32, #tpu.memory_space<vmem>>, %arg18: memref<8x32xf32, #tpu.memory_space<vmem>>) attributes {dimension_semantics = [#tpu.dimension_semantics<parallel>, #tpu.dimension_semantics<parallel>], iteration_bounds = array<i64: 1, 1>, scalar_prefetch = 0 : i64, scratch_operands = 1 : i64, tpu.core_type = #tpu.core_type<tc>, window_params = [{transform_indices = @transform_0, window_bounds = array<i64: 1, 8, 32>}, {transform_indices = @transform_1, window_bounds = array<i64: 1, 8, 32>}, {transform_indices = @transform_2, window_bounds = array<i64: 1, 1, 8>}, {pipeline_mode = #tpu.pipeline_mode<synchronous>, transform_indices = @transform_3, window_bounds = array<i64: 32, 32>}, {pipeline_mode = #tpu.pipeline_mode<synchronous>, transform_indices = @transform_4, window_bounds = array<i64: 1, 32>}, {pipeline_mode = #tpu.pipeline_mode<synchronous>, transform_indices = @transform_5, window_bounds = array<i64: 32, 64>}, {pipeline_mode = #tpu.pipeline_mode<synchronous>, transform_indices = @transform_6, window_bounds = array<i64: 1, 64>}, {pipeline_mode = #tpu.pipeline_mode<synchronous>, transform_indices = @transform_7, window_bounds = array<i64: 32, 32>}, {pipeline_mode = #tpu.pipeline_mode<synchronous>, transform_indices = @transform_8, window_bounds = array<i64: 1, 32>}, {pipeline_mode = #tpu.pipeline_mode<synchronous>, transform_indices = @transform_9, window_bounds = array<i64: 1, 32>}, {pipeline_mode = #tpu.pipeline_mode<synchronous>, transform_indices = @transform_10, window_bounds = array<i64: 1, 32>}, {pipeline_mode = #tpu.pipeline_mode<synchronous>, transform_indices = @transform_11, window_bounds = array<i64: 32, 8>}, {pipeline_mode = #tpu.pipeline_mode<synchronous>, transform_indices = @transform_12, window_bounds = array<i64: 8, 32>}, {pipeline_mode = #tpu.pipeline_mode<synchronous>, transform_indices = @transform_13, window_bounds = array<i64: 32, 8>}, {pipeline_mode = #tpu.pipeline_mode<synchronous>, transform_indices = @transform_14, window_bounds = array<i64: 8, 32>}, {transform_indices = @transform_15, window_bounds = array<i64: 1, 8, 32>}]} {
    %c0 = arith.constant 0 : index
    %c0_0 = arith.constant 0 : index
    %c0_1 = arith.constant 0 : index
    %0 = vector.load %arg2[%c0, %c0_0, %c0_1] : memref<1x8x32xf32, #tpu.memory_space<vmem>>, vector<1x8x32xf32>
    %1 = vector.shape_cast %0 : vector<1x8x32xf32> to vector<8x32xf32>
    %2 = arith.truncf %1 : vector<8x32xf32> to vector<8x32xbf16>
    %c0_2 = arith.constant 0 : index
    %c0_3 = arith.constant 0 : index
    %c0_4 = arith.constant 0 : index
    %3 = vector.load %arg3[%c0_2, %c0_3, %c0_4] : memref<1x8x32xf32, #tpu.memory_space<vmem>>, vector<1x8x32xf32>
    %4 = vector.shape_cast %3 : vector<1x8x32xf32> to vector<8x32xf32>
    %5 = arith.truncf %4 : vector<8x32xf32> to vector<8x32xbf16>
    %c0_5 = arith.constant 0 : index
    %c0_6 = arith.constant 0 : index
    %6 = vector.load %arg13[%c0_5, %c0_6] : memref<32x8xbf16, #tpu.memory_space<vmem>>, vector<32x8xbf16>
    %cst = arith.constant dense<0.000000e+00> : vector<8x8xf32>
    %7 = tpu.matmul %2, %6, %cst {dimension_numbers = #tpu.dot_dimension_numbers<[1], [0], [0], [1], [0, 0, 1, 1], [], []>} : vector<8x32xbf16>, vector<32x8xbf16>, vector<8x8xf32> -> vector<8x8xf32>
    %8 = arith.truncf %7 : vector<8x8xf32> to vector<8x8xbf16>
    %c0_7 = arith.constant 0 : index
    %c0_8 = arith.constant 0 : index
    %9 = vector.load %arg14[%c0_7, %c0_8] : memref<8x32xbf16, #tpu.memory_space<vmem>>, vector<8x32xbf16>
    %cst_9 = arith.constant dense<0.000000e+00> : vector<8x32xf32>
    %10 = tpu.matmul %8, %9, %cst_9 {dimension_numbers = #tpu.dot_dimension_numbers<[1], [0], [0], [1], [0, 0, 1, 1], [], []>} : vector<8x8xbf16>, vector<8x32xbf16>, vector<8x32xf32> -> vector<8x32xf32>
    %c0_10 = arith.constant 0 : index
    %c0_11 = arith.constant 0 : index
    %11 = vector.load %arg15[%c0_10, %c0_11] : memref<32x8xbf16, #tpu.memory_space<vmem>>, vector<32x8xbf16>
    %cst_12 = arith.constant dense<0.000000e+00> : vector<8x8xf32>
    %12 = tpu.matmul %5, %11, %cst_12 {dimension_numbers = #tpu.dot_dimension_numbers<[1], [0], [0], [1], [0, 0, 1, 1], [], []>} : vector<8x32xbf16>, vector<32x8xbf16>, vector<8x8xf32> -> vector<8x8xf32>
    %13 = arith.truncf %12 : vector<8x8xf32> to vector<8x8xbf16>
    %c0_13 = arith.constant 0 : index
    %c0_14 = arith.constant 0 : index
    %14 = vector.load %arg16[%c0_13, %c0_14] : memref<8x32xbf16, #tpu.memory_space<vmem>>, vector<8x32xbf16>
    %cst_15 = arith.constant dense<0.000000e+00> : vector<8x32xf32>
    %15 = tpu.matmul %13, %14, %cst_15 {dimension_numbers = #tpu.dot_dimension_numbers<[1], [0], [0], [1], [0, 0, 1, 1], [], []>} : vector<8x8xbf16>, vector<8x32xbf16>, vector<8x32xf32> -> vector<8x32xf32>
    %c0_16 = arith.constant 0 : index
    %c0_17 = arith.constant 0 : index
    %c0_18 = arith.constant 0 : index
    %16 = vector.load %arg2[%c0_16, %c0_17, %c0_18] : memref<1x8x32xf32, #tpu.memory_space<vmem>>, vector<1x8x32xf32>
    %17 = vector.shape_cast %16 : vector<1x8x32xf32> to vector<8x32xf32>
    %c0_19 = arith.constant 0 : index
    %c0_20 = arith.constant 0 : index
    %c0_21 = arith.constant 0 : index
    %18 = vector.load %arg3[%c0_19, %c0_20, %c0_21] : memref<1x8x32xf32, #tpu.memory_space<vmem>>, vector<1x8x32xf32>
    %19 = vector.shape_cast %18 : vector<1x8x32xf32> to vector<8x32xf32>
    %c0_22 = arith.constant 0 : index
    %c0_23 = arith.constant 0 : index
    %c0_24 = arith.constant 0 : index
    %20 = vector.load %arg4[%c0_22, %c0_23, %c0_24] : memref<1x1x8xf32, #tpu.memory_space<vmem>>, vector<1x1x8xf32>
    %21 = vector.shape_cast %20 : vector<1x1x8xf32> to vector<1x8xf32>
    %22 = arith.truncf %17 : vector<8x32xf32> to vector<8x32xbf16>
    %23 = arith.truncf %19 : vector<8x32xf32> to vector<8x32xbf16>
    %c0_25 = arith.constant 0 : index
    %c0_26 = arith.constant 0 : index
    %24 = vector.load %arg5[%c0_25, %c0_26] : memref<32x32xbf16, #tpu.memory_space<vmem>>, vector<32x32xbf16>
    %cst_27 = arith.constant dense<0.000000e+00> : vector<8x32xf32>
    %25 = tpu.matmul %22, %24, %cst_27 {dimension_numbers = #tpu.dot_dimension_numbers<[1], [0], [0], [1], [0, 0, 1, 1], [], []>} : vector<8x32xbf16>, vector<32x32xbf16>, vector<8x32xf32> -> vector<8x32xf32>
    %c0_28 = arith.constant 0 : index
    %c0_29 = arith.constant 0 : index
    %26 = vector.load %arg6[%c0_28, %c0_29] : memref<1x32xf32, #tpu.memory_space<vmem>>, vector<1x32xf32>
    %27 = vector.broadcast %26 : vector<1x32xf32> to vector<8x32xf32>
    %28 = arith.addf %25, %27 : vector<8x32xf32>
    %c0_30 = arith.constant 0 : index
    %c0_31 = arith.constant 0 : index
    %29 = vector.load %arg7[%c0_30, %c0_31] : memref<32x64xbf16, #tpu.memory_space<vmem>>, vector<32x64xbf16>
    %cst_32 = arith.constant dense<0.000000e+00> : vector<8x64xf32>
    %30 = tpu.matmul %23, %29, %cst_32 {dimension_numbers = #tpu.dot_dimension_numbers<[1], [0], [0], [1], [0, 0, 1, 1], [], []>} : vector<8x32xbf16>, vector<32x64xbf16>, vector<8x64xf32> -> vector<8x64xf32>
    %c0_33 = arith.constant 0 : index
    %c0_34 = arith.constant 0 : index
    %31 = vector.load %arg8[%c0_33, %c0_34] : memref<1x64xf32, #tpu.memory_space<vmem>>, vector<1x64xf32>
    %32 = vector.broadcast %31 : vector<1x64xf32> to vector<8x64xf32>
    %33 = arith.addf %30, %32 : vector<8x64xf32>
    %34 = vector.extract_strided_slice %33 {offsets = [0, 0], sizes = [8, 32], strides = [1, 1]} : vector<8x64xf32> to vector<8x32xf32>
    %35 = vector.extract_strided_slice %33 {offsets = [0, 32], sizes = [8, 32], strides = [1, 1]} : vector<8x64xf32> to vector<8x32xf32>
    %36 = arith.addf %28, %10 : vector<8x32xf32>
    %37 = arith.addf %35, %15 : vector<8x32xf32>
    %38 = vector.extract_strided_slice %36 {offsets = [0, 0], sizes = [8, 8], strides = [1, 1]} : vector<8x32xf32> to vector<8x8xf32>
    %39 = arith.truncf %38 : vector<8x8xf32> to vector<8x8xbf16>
    %40 = vector.extract_strided_slice %34 {offsets = [0, 0], sizes = [8, 8], strides = [1, 1]} : vector<8x32xf32> to vector<8x8xf32>
    %41 = arith.truncf %40 : vector<8x8xf32> to vector<8x8xbf16>
    %42 = vector.extract_strided_slice %37 {offsets = [0, 0], sizes = [8, 8], strides = [1, 1]} : vector<8x32xf32> to vector<8x8xf32>
    %43 = arith.truncf %42 : vector<8x8xf32> to vector<8x8xbf16>
    %cst_35 = arith.constant dense<0.000000e+00> : vector<8x8xf32>
    %44 = tpu.matmul %39, %41, %cst_35 {dimension_numbers = #tpu.dot_dimension_numbers<[1], [1], [0], [0], [0, 0, 1, 0], [], []>} : vector<8x8xbf16>, vector<8x8xbf16>, vector<8x8xf32> -> vector<8x8xf32>
    %cst_36 = arith.constant 0.353553385 : f32
    %45 = vector.broadcast %cst_36 : f32 to vector<8x8xf32>
    %46 = arith.mulf %44, %45 : vector<8x8xf32>
    %47 = vector.broadcast %21 : vector<1x8xf32> to vector<8x8xf32>
    %48 = arith.addf %46, %47 : vector<8x8xf32>
    %cst_37 = arith.constant dense<0xFF800000> : vector<8xf32>
    %49 = vector.multi_reduction <maximumf>, %48, %cst_37 [1] : vector<8x8xf32> to vector<8xf32>
    %50 = vector.shape_cast %49 : vector<8xf32> to vector<8x1xf32>
    %51 = vector.broadcast %50 : vector<8x1xf32> to vector<8x8xf32>
    %52 = arith.subf %48, %51 : vector<8x8xf32>
    %53 = math.exp %52 : vector<8x8xf32>
    %cst_38 = arith.constant dense<0.000000e+00> : vector<8xf32>
    %54 = vector.multi_reduction <add>, %53, %cst_38 [1] : vector<8x8xf32> to vector<8xf32>
    %55 = vector.shape_cast %54 : vector<8xf32> to vector<8x1xf32>
    %56 = tpu.reciprocal %55 {approx = true} : vector<8x1xf32> -> vector<8x1xf32>
    %57 = vector.broadcast %56 : vector<8x1xf32> to vector<8x8xf32>
    %58 = arith.mulf %53, %57 : vector<8x8xf32>
    %59 = arith.truncf %58 : vector<8x8xf32> to vector<8x8xbf16>
    %cst_39 = arith.constant dense<0.000000e+00> : vector<8x8xf32>
    %60 = tpu.matmul %59, %43, %cst_39 {dimension_numbers = #tpu.dot_dimension_numbers<[1], [0], [0], [1], [0, 0, 1, 1], [], []>} : vector<8x8xbf16>, vector<8x8xbf16>, vector<8x8xf32> -> vector<8x8xf32>
    %c0_40 = arith.constant 0 : index
    %c0_41 = arith.constant 0 : index
    %61 = vector.load %arg18[%c0_40, %c0_41] : memref<8x32xf32, #tpu.memory_space<vmem>>, vector<8x8xf32>
    tpu.vector_store %arg18[%c0_40, %c0_41], %60 {strides = array<i32>} : memref<8x32xf32, #tpu.memory_space<vmem>>, vector<8x8xf32>,
    %62 = vector.extract_strided_slice %36 {offsets = [0, 8], sizes = [8, 8], strides = [1, 1]} : vector<8x32xf32> to vector<8x8xf32>
    %63 = arith.truncf %62 : vector<8x8xf32> to vector<8x8xbf16>
    %64 = vector.extract_strided_slice %34 {offsets = [0, 8], sizes = [8, 8], strides = [1, 1]} : vector<8x32xf32> to vector<8x8xf32>
    %65 = arith.truncf %64 : vector<8x8xf32> to vector<8x8xbf16>
    %66 = vector.extract_strided_slice %37 {offsets = [0, 8], sizes = [8, 8], strides = [1, 1]} : vector<8x32xf32> to vector<8x8xf32>
    %67 = arith.truncf %66 : vector<8x8xf32> to vector<8x8xbf16>
    %cst_42 = arith.constant dense<0.000000e+00> : vector<8x8xf32>
    %68 = tpu.matmul %63, %65, %cst_42 {dimension_numbers = #tpu.dot_dimension_numbers<[1], [1], [0], [0], [0, 0, 1, 0], [], []>} : vector<8x8xbf16>, vector<8x8xbf16>, vector<8x8xf32> -> vector<8x8xf32>
    %cst_43 = arith.constant 0.353553385 : f32
    %69 = vector.broadcast %cst_43 : f32 to vector<8x8xf32>
    %70 = arith.mulf %68, %69 : vector<8x8xf32>
    %71 = vector.broadcast %21 : vector<1x8xf32> to vector<8x8xf32>
    %72 = arith.addf %70, %71 : vector<8x8xf32>
    %cst_44 = arith.constant dense<0xFF800000> : vector<8xf32>
    %73 = vector.multi_reduction <maximumf>, %72, %cst_44 [1] : vector<8x8xf32> to vector<8xf32>
    %74 = vector.shape_cast %73 : vector<8xf32> to vector<8x1xf32>
    %75 = vector.broadcast %74 : vector<8x1xf32> to vector<8x8xf32>
    %76 = arith.subf %72, %75 : vector<8x8xf32>
    %77 = math.exp %76 : vector<8x8xf32>
    %cst_45 = arith.constant dense<0.000000e+00> : vector<8xf32>
    %78 = vector.multi_reduction <add>, %77, %cst_45 [1] : vector<8x8xf32> to vector<8xf32>
    %79 = vector.shape_cast %78 : vector<8xf32> to vector<8x1xf32>
    %80 = tpu.reciprocal %79 {approx = true} : vector<8x1xf32> -> vector<8x1xf32>
    %81 = vector.broadcast %80 : vector<8x1xf32> to vector<8x8xf32>
    %82 = arith.mulf %77, %81 : vector<8x8xf32>
    %83 = arith.truncf %82 : vector<8x8xf32> to vector<8x8xbf16>
    %cst_46 = arith.constant dense<0.000000e+00> : vector<8x8xf32>
    %84 = tpu.matmul %83, %67, %cst_46 {dimension_numbers = #tpu.dot_dimension_numbers<[1], [0], [0], [1], [0, 0, 1, 1], [], []>} : vector<8x8xbf16>, vector<8x8xbf16>, vector<8x8xf32> -> vector<8x8xf32>
    %c0_47 = arith.constant 0 : index
    %c8 = arith.constant 8 : index
    %85 = vector.load %arg18[%c0_47, %c8] : memref<8x32xf32, #tpu.memory_space<vmem>>, vector<8x8xf32>
    tpu.vector_store %arg18[%c0_47, %c8], %84 {strides = array<i32>} : memref<8x32xf32, #tpu.memory_space<vmem>>, vector<8x8xf32>,
    %86 = vector.extract_strided_slice %36 {offsets = [0, 16], sizes = [8, 8], strides = [1, 1]} : vector<8x32xf32> to vector<8x8xf32>
    %87 = arith.truncf %86 : vector<8x8xf32> to vector<8x8xbf16>
    %88 = vector.extract_strided_slice %34 {offsets = [0, 16], sizes = [8, 8], strides = [1, 1]} : vector<8x32xf32> to vector<8x8xf32>
    %89 = arith.truncf %88 : vector<8x8xf32> to vector<8x8xbf16>
    %90 = vector.extract_strided_slice %37 {offsets = [0, 16], sizes = [8, 8], strides = [1, 1]} : vector<8x32xf32> to vector<8x8xf32>
    %91 = arith.truncf %90 : vector<8x8xf32> to vector<8x8xbf16>
    %cst_48 = arith.constant dense<0.000000e+00> : vector<8x8xf32>
    %92 = tpu.matmul %87, %89, %cst_48 {dimension_numbers = #tpu.dot_dimension_numbers<[1], [1], [0], [0], [0, 0, 1, 0], [], []>} : vector<8x8xbf16>, vector<8x8xbf16>, vector<8x8xf32> -> vector<8x8xf32>
    %cst_49 = arith.constant 0.353553385 : f32
    %93 = vector.broadcast %cst_49 : f32 to vector<8x8xf32>
    %94 = arith.mulf %92, %93 : vector<8x8xf32>
    %95 = vector.broadcast %21 : vector<1x8xf32> to vector<8x8xf32>
    %96 = arith.addf %94, %95 : vector<8x8xf32>
    %cst_50 = arith.constant dense<0xFF800000> : vector<8xf32>
    %97 = vector.multi_reduction <maximumf>, %96, %cst_50 [1] : vector<8x8xf32> to vector<8xf32>
    %98 = vector.shape_cast %97 : vector<8xf32> to vector<8x1xf32>
    %99 = vector.broadcast %98 : vector<8x1xf32> to vector<8x8xf32>
    %100 = arith.subf %96, %99 : vector<8x8xf32>
    %101 = math.exp %100 : vector<8x8xf32>
    %cst_51 = arith.constant dense<0.000000e+00> : vector<8xf32>
    %102 = vector.multi_reduction <add>, %101, %cst_51 [1] : vector<8x8xf32> to vector<8xf32>
    %103 = vector.shape_cast %102 : vector<8xf32> to vector<8x1xf32>
    %104 = tpu.reciprocal %103 {approx = true} : vector<8x1xf32> -> vector<8x1xf32>
    %105 = vector.broadcast %104 : vector<8x1xf32> to vector<8x8xf32>
    %106 = arith.mulf %101, %105 : vector<8x8xf32>
    %107 = arith.truncf %106 : vector<8x8xf32> to vector<8x8xbf16>
    %cst_52 = arith.constant dense<0.000000e+00> : vector<8x8xf32>
    %108 = tpu.matmul %107, %91, %cst_52 {dimension_numbers = #tpu.dot_dimension_numbers<[1], [0], [0], [1], [0, 0, 1, 1], [], []>} : vector<8x8xbf16>, vector<8x8xbf16>, vector<8x8xf32> -> vector<8x8xf32>
    %c0_53 = arith.constant 0 : index
    %c16 = arith.constant 16 : index
    %109 = vector.load %arg18[%c0_53, %c16] : memref<8x32xf32, #tpu.memory_space<vmem>>, vector<8x8xf32>
    tpu.vector_store %arg18[%c0_53, %c16], %108 {strides = array<i32>} : memref<8x32xf32, #tpu.memory_space<vmem>>, vector<8x8xf32>,
    %110 = vector.extract_strided_slice %36 {offsets = [0, 24], sizes = [8, 8], strides = [1, 1]} : vector<8x32xf32> to vector<8x8xf32>
    %111 = arith.truncf %110 : vector<8x8xf32> to vector<8x8xbf16>
    %112 = vector.extract_strided_slice %34 {offsets = [0, 24], sizes = [8, 8], strides = [1, 1]} : vector<8x32xf32> to vector<8x8xf32>
    %113 = arith.truncf %112 : vector<8x8xf32> to vector<8x8xbf16>
    %114 = vector.extract_strided_slice %37 {offsets = [0, 24], sizes = [8, 8], strides = [1, 1]} : vector<8x32xf32> to vector<8x8xf32>
    %115 = arith.truncf %114 : vector<8x8xf32> to vector<8x8xbf16>
    %cst_54 = arith.constant dense<0.000000e+00> : vector<8x8xf32>
    %116 = tpu.matmul %111, %113, %cst_54 {dimension_numbers = #tpu.dot_dimension_numbers<[1], [1], [0], [0], [0, 0, 1, 0], [], []>} : vector<8x8xbf16>, vector<8x8xbf16>, vector<8x8xf32> -> vector<8x8xf32>
    %cst_55 = arith.constant 0.353553385 : f32
    %117 = vector.broadcast %cst_55 : f32 to vector<8x8xf32>
    %118 = arith.mulf %116, %117 : vector<8x8xf32>
    %119 = vector.broadcast %21 : vector<1x8xf32> to vector<8x8xf32>
    %120 = arith.addf %118, %119 : vector<8x8xf32>
    %cst_56 = arith.constant dense<0xFF800000> : vector<8xf32>
    %121 = vector.multi_reduction <maximumf>, %120, %cst_56 [1] : vector<8x8xf32> to vector<8xf32>
    %122 = vector.shape_cast %121 : vector<8xf32> to vector<8x1xf32>
    %123 = vector.broadcast %122 : vector<8x1xf32> to vector<8x8xf32>
    %124 = arith.subf %120, %123 : vector<8x8xf32>
    %125 = math.exp %124 : vector<8x8xf32>
    %cst_57 = arith.constant dense<0.000000e+00> : vector<8xf32>
    %126 = vector.multi_reduction <add>, %125, %cst_57 [1] : vector<8x8xf32> to vector<8xf32>
    %127 = vector.shape_cast %126 : vector<8xf32> to vector<8x1xf32>
    %128 = tpu.reciprocal %127 {approx = true} : vector<8x1xf32> -> vector<8x1xf32>
    %129 = vector.broadcast %128 : vector<8x1xf32> to vector<8x8xf32>
    %130 = arith.mulf %125, %129 : vector<8x8xf32>
    %131 = arith.truncf %130 : vector<8x8xf32> to vector<8x8xbf16>
    %cst_58 = arith.constant dense<0.000000e+00> : vector<8x8xf32>
    %132 = tpu.matmul %131, %115, %cst_58 {dimension_numbers = #tpu.dot_dimension_numbers<[1], [0], [0], [1], [0, 0, 1, 1], [], []>} : vector<8x8xbf16>, vector<8x8xbf16>, vector<8x8xf32> -> vector<8x8xf32>
    %c0_59 = arith.constant 0 : index
    %c24 = arith.constant 24 : index
    %133 = vector.load %arg18[%c0_59, %c24] : memref<8x32xf32, #tpu.memory_space<vmem>>, vector<8x8xf32>
    tpu.vector_store %arg18[%c0_59, %c24], %132 {strides = array<i32>} : memref<8x32xf32, #tpu.memory_space<vmem>>, vector<8x8xf32>,
    %c0_60 = arith.constant 0 : index
    %c0_61 = arith.constant 0 : index
    %134 = vector.load %arg18[%c0_60, %c0_61] : memref<8x32xf32, #tpu.memory_space<vmem>>, vector<8x32xf32>
    %135 = arith.truncf %134 : vector<8x32xf32> to vector<8x32xbf16>
    %c0_62 = arith.constant 0 : index
    %c0_63 = arith.constant 0 : index
    %136 = vector.load %arg9[%c0_62, %c0_63] : memref<32x32xbf16, #tpu.memory_space<vmem>>, vector<32x32xbf16>
    %cst_64 = arith.constant dense<0.000000e+00> : vector<8x32xf32>
    %137 = tpu.matmul %135, %136, %cst_64 {dimension_numbers = #tpu.dot_dimension_numbers<[1], [0], [0], [1], [0, 0, 1, 1], [], []>} : vector<8x32xbf16>, vector<32x32xbf16>, vector<8x32xf32> -> vector<8x32xf32>
    %c0_65 = arith.constant 0 : index
    %c0_66 = arith.constant 0 : index
    %138 = vector.load %arg10[%c0_65, %c0_66] : memref<1x32xf32, #tpu.memory_space<vmem>>, vector<1x32xf32>
    %139 = vector.broadcast %138 : vector<1x32xf32> to vector<8x32xf32>
    %140 = arith.addf %137, %139 : vector<8x32xf32>
    %141 = arith.addf %140, %17 : vector<8x32xf32>
    %c0_67 = arith.constant 0 : index
    %c0_68 = arith.constant 0 : index
    %142 = vector.load %arg11[%c0_67, %c0_68] : memref<1x32xf32, #tpu.memory_space<vmem>>, vector<1x32xf32>
    %c0_69 = arith.constant 0 : index
    %c0_70 = arith.constant 0 : index
    %143 = vector.load %arg12[%c0_69, %c0_70] : memref<1x32xf32, #tpu.memory_space<vmem>>, vector<1x32xf32>
    %cst_71 = arith.constant dense<0.000000e+00> : vector<8xf32>
    %144 = vector.multi_reduction <add>, %141, %cst_71 [1] : vector<8x32xf32> to vector<8xf32>
    %145 = vector.shape_cast %144 : vector<8xf32> to vector<8x1xf32>
    %cst_72 = arith.constant 3.200000e+01 : f32
    %146 = vector.broadcast %cst_72 : f32 to vector<8x1xf32>
    %147 = arith.divf %145, %146 : vector<8x1xf32>
    %148 = vector.broadcast %147 : vector<8x1xf32> to vector<8x32xf32>
    %149 = arith.subf %141, %148 : vector<8x32xf32>
    %150 = arith.mulf %149, %149 : vector<8x32xf32>
    %cst_73 = arith.constant dense<0.000000e+00> : vector<8xf32>
    %151 = vector.multi_reduction <add>, %150, %cst_73 [1] : vector<8x32xf32> to vector<8xf32>
    %152 = vector.shape_cast %151 : vector<8xf32> to vector<8x1xf32>
    %cst_74 = arith.constant 3.200000e+01 : f32
    %153 = vector.broadcast %cst_74 : f32 to vector<8x1xf32>
    %154 = arith.divf %152, %153 : vector<8x1xf32>
    %155 = vector.broadcast %147 : vector<8x1xf32> to vector<8x32xf32>
    %156 = arith.subf %141, %155 : vector<8x32xf32>
    %cst_75 = arith.constant 9.99999996E-13 : f32
    %157 = vector.broadcast %cst_75 : f32 to vector<8x1xf32>
    %158 = arith.addf %154, %157 : vector<8x1xf32>
    %159 = math.rsqrt %158 : vector<8x1xf32>
    %160 = vector.broadcast %159 : vector<8x1xf32> to vector<8x32xf32>
    %161 = arith.mulf %156, %160 : vector<8x32xf32>
    %162 = vector.broadcast %142 : vector<1x32xf32> to vector<8x32xf32>
    %163 = arith.mulf %161, %162 : vector<8x32xf32>
    %164 = vector.broadcast %143 : vector<1x32xf32> to vector<8x32xf32>
    %165 = arith.addf %163, %164 : vector<8x32xf32>
    %c0_76 = arith.constant 0 : index
    %c0_77 = arith.constant 0 : index
    %c0_78 = arith.constant 0 : index
    %166 = vector.load %arg17[%c0_76, %c0_77, %c0_78] : memref<1x8x32xf32, #tpu.memory_space<vmem>>, vector<1x8x32xf32>
    %167 = vector.shape_cast %166 : vector<1x8x32xf32> to vector<8x32xf32>
    %168 = vector.shape_cast %165 : vector<8x32xf32> to vector<1x8x32xf32>
    tpu.vector_store %arg17[%c0_76, %c0_77, %c0_78], %168 {strides = array<i32>} : memref<1x8x32xf32, #tpu.memory_space<vmem>>, vector<1x8x32xf32>,
    return
  }
  func.func @transform_0(%arg0: i32, %arg1: i32) -> (i32, i32, i32) {
    %c0_i32 = arith.constant 0 : i32
    %c0_i32_0 = arith.constant 0 : i32
    return %arg0, %arg1, %c0_i32 : i32, i32, i32
  }
  func.func @transform_1(%arg0: i32, %arg1: i32) -> (i32, i32, i32) {
    %c0_i32 = arith.constant 0 : i32
    %c0_i32_0 = arith.constant 0 : i32
    %c0_i32_1 = arith.constant 0 : i32
    return %arg0, %c0_i32, %c0_i32_0 : i32, i32, i32
  }
  func.func @transform_2(%arg0: i32, %arg1: i32) -> (i32, i32, i32) {
    %c0_i32 = arith.constant 0 : i32
    %c0_i32_0 = arith.constant 0 : i32
    %c0_i32_1 = arith.constant 0 : i32
    return %arg0, %c0_i32, %c0_i32_0 : i32, i32, i32
  }
  func.func @transform_3(%arg0: i32, %arg1: i32) -> (i32, i32) {
    %c0_i32 = arith.constant 0 : i32
    %c0_i32_0 = arith.constant 0 : i32
    %c0_i32_1 = arith.constant 0 : i32
    return %c0_i32, %c0_i32_0 : i32, i32
  }
  func.func @transform_4(%arg0: i32, %arg1: i32) -> (i32, i32) {
    %c0_i32 = arith.constant 0 : i32
    %c0_i32_0 = arith.constant 0 : i32
    %c0_i32_1 = arith.constant 0 : i32
    return %c0_i32, %c0_i32_0 : i32, i32
  }
  func.func @transform_5(%arg0: i32, %arg1: i32) -> (i32, i32) {
    %c0_i32 = arith.constant 0 : i32
    %c0_i32_0 = arith.constant 0 : i32
    %c0_i32_1 = arith.constant 0 : i32
    return %c0_i32, %c0_i32_0 : i32, i32
  }
  func.func @transform_6(%arg0: i32, %arg1: i32) -> (i32, i32) {
    %c0_i32 = arith.constant 0 : i32
    %c0_i32_0 = arith.constant 0 : i32
    %c0_i32_1 = arith.constant 0 : i32
    return %c0_i32, %c0_i32_0 : i32, i32
  }
  func.func @transform_7(%arg0: i32, %arg1: i32) -> (i32, i32) {
    %c0_i32 = arith.constant 0 : i32
    %c0_i32_0 = arith.constant 0 : i32
    %c0_i32_1 = arith.constant 0 : i32
    return %c0_i32, %c0_i32_0 : i32, i32
  }
  func.func @transform_8(%arg0: i32, %arg1: i32) -> (i32, i32) {
    %c0_i32 = arith.constant 0 : i32
    %c0_i32_0 = arith.constant 0 : i32
    %c0_i32_1 = arith.constant 0 : i32
    return %c0_i32, %c0_i32_0 : i32, i32
  }
  func.func @transform_9(%arg0: i32, %arg1: i32) -> (i32, i32) {
    %c0_i32 = arith.constant 0 : i32
    %c0_i32_0 = arith.constant 0 : i32
    %c0_i32_1 = arith.constant 0 : i32
    return %c0_i32, %c0_i32_0 : i32, i32
  }
  func.func @transform_10(%arg0: i32, %arg1: i32) -> (i32, i32) {
    %c0_i32 = arith.constant 0 : i32
    %c0_i32_0 = arith.constant 0 : i32
    %c0_i32_1 = arith.constant 0 : i32
    return %c0_i32, %c0_i32_0 : i32, i32
  }
  func.func @transform_11(%arg0: i32, %arg1: i32) -> (i32, i32) {
    %c0_i32 = arith.constant 0 : i32
    %c0_i32_0 = arith.constant 0 : i32
    %c0_i32_1 = arith.constant 0 : i32
    return %c0_i32, %c0_i32_0 : i32, i32
  }
  func.func @transform_12(%arg0: i32, %arg1: i32) -> (i32, i32) {
    %c0_i32 = arith.constant 0 : i32
    %c0_i32_0 = arith.constant 0 : i32
    %c0_i32_1 = arith.constant 0 : i32
    return %c0_i32, %c0_i32_0 : i32, i32
  }
  func.func @transform_13(%arg0: i32, %arg1: i32) -> (i32, i32) {
    %c0_i32 = arith.constant 0 : i32
    %c0_i32_0 = arith.constant 0 : i32
    %c0_i32_1 = arith.constant 0 : i32
    return %c0_i32, %c0_i32_0 : i32, i32
  }
  func.func @transform_14(%arg0: i32, %arg1: i32) -> (i32, i32) {
    %c0_i32 = arith.constant 0 : i32
    %c0_i32_0 = arith.constant 0 : i32
    %c0_i32_1 = arith.constant 0 : i32
    return %c0_i32, %c0_i32_0 : i32, i32
  }
  func.func @transform_15(%arg0: i32, %arg1: i32) -> (i32, i32, i32) {
    %c0_i32 = arith.constant 0 : i32
    %c0_i32_0 = arith.constant 0 : i32
    return %arg0, %arg1, %c0_i32 : i32, i32, i32
  }
}

module attributes {stable_mosaic.version = 11 : i64} {
  func.func @_switch_ln_kernel(%arg0: i32, %arg1: i32, %arg2: memref<8x32xf32, #tpu.memory_space<vmem>>, %arg3: memref<32x2xbf16, #tpu.memory_space<vmem>>, %arg4: memref<1x2xf32, #tpu.memory_space<vmem>>, %arg5: memref<1x32x64xbf16, #tpu.memory_space<vmem>>, %arg6: memref<1x1x64xf32, #tpu.memory_space<vmem>>, %arg7: memref<1x64x32xbf16, #tpu.memory_space<vmem>>, %arg8: memref<1x1x32xf32, #tpu.memory_space<vmem>>, %arg9: memref<1x32xf32, #tpu.memory_space<vmem>>, %arg10: memref<1x32xf32, #tpu.memory_space<vmem>>, %arg11: memref<8x32xf32, #tpu.memory_space<vmem>>, %arg12: memref<8x1xf32, #tpu.memory_space<vmem>>, %arg13: memref<8x1xi32, #tpu.memory_space<vmem>>, %arg14: memref<8x32xf32, #tpu.memory_space<vmem>>) attributes {dimension_semantics = [#tpu.dimension_semantics<parallel>, #tpu.dimension_semantics<arbitrary>], iteration_bounds = array<i64: 1, 2>, scalar_prefetch = 0 : i64, scratch_operands = 3 : i64, tpu.core_type = #tpu.core_type<tc>, window_params = [{transform_indices = @transform_0, window_bounds = array<i64: 8, 32>}, {pipeline_mode = #tpu.pipeline_mode<synchronous>, transform_indices = @transform_1, window_bounds = array<i64: 32, 2>}, {pipeline_mode = #tpu.pipeline_mode<synchronous>, transform_indices = @transform_2, window_bounds = array<i64: 1, 2>}, {transform_indices = @transform_3, window_bounds = array<i64: 1, 32, 64>}, {transform_indices = @transform_4, window_bounds = array<i64: 1, 1, 64>}, {transform_indices = @transform_5, window_bounds = array<i64: 1, 64, 32>}, {transform_indices = @transform_6, window_bounds = array<i64: 1, 1, 32>}, {pipeline_mode = #tpu.pipeline_mode<synchronous>, transform_indices = @transform_7, window_bounds = array<i64: 1, 32>}, {pipeline_mode = #tpu.pipeline_mode<synchronous>, transform_indices = @transform_8, window_bounds = array<i64: 1, 32>}, {transform_indices = @transform_9, window_bounds = array<i64: 8, 32>}]} {
    %c0 = arith.constant 0 : index
    %c0_0 = arith.constant 0 : index
    %0 = vector.load %arg2[%c0, %c0_0] : memref<8x32xf32, #tpu.memory_space<vmem>>, vector<8x32xf32>
    %1 = arith.truncf %0 : vector<8x32xf32> to vector<8x32xbf16>
    %c0_i32 = arith.constant 0 : i32
    %2 = arith.cmpi eq, %arg1, %c0_i32 : i32
    %3 = arith.extui %2 : i1 to i32
    %c0_i32_1 = arith.constant 0 : i32
    %4 = arith.cmpi ne, %3, %c0_i32_1 : i32
    scf.if %4 {
      %c0_26 = arith.constant 0 : index
      %c0_27 = arith.constant 0 : index
      %46 = vector.load %arg3[%c0_26, %c0_27] : memref<32x2xbf16, #tpu.memory_space<vmem>>, vector<32x2xbf16>
      %cst_28 = arith.constant dense<0.000000e+00> : vector<8x2xf32>
      %47 = tpu.matmul %1, %46, %cst_28 {dimension_numbers = #tpu.dot_dimension_numbers<[1], [0], [0], [1], [0, 0, 1, 1], [], []>} : vector<8x32xbf16>, vector<32x2xbf16>, vector<8x2xf32> -> vector<8x2xf32>
      %c0_29 = arith.constant 0 : index
      %c0_30 = arith.constant 0 : index
      %48 = vector.load %arg4[%c0_29, %c0_30] : memref<1x2xf32, #tpu.memory_space<vmem>>, vector<1x2xf32>
      %49 = vector.broadcast %48 : vector<1x2xf32> to vector<8x2xf32>
      %50 = arith.addf %47, %49 : vector<8x2xf32>
      %cst_31 = arith.constant dense<0xFF800000> : vector<8xf32>
      %51 = vector.multi_reduction <maximumf>, %50, %cst_31 [1] : vector<8x2xf32> to vector<8xf32>
      %52 = vector.shape_cast %51 : vector<8xf32> to vector<8x1xf32>
      %53 = vector.broadcast %52 : vector<8x1xf32> to vector<8x2xf32>
      %54 = arith.subf %50, %53 : vector<8x2xf32>
      %55 = math.exp %54 : vector<8x2xf32>
      %cst_32 = arith.constant dense<0.000000e+00> : vector<8xf32>
      %56 = vector.multi_reduction <add>, %55, %cst_32 [1] : vector<8x2xf32> to vector<8xf32>
      %57 = vector.shape_cast %56 : vector<8xf32> to vector<8x1xf32>
      %58 = vector.broadcast %57 : vector<8x1xf32> to vector<8x2xf32>
      %59 = arith.divf %55, %58 : vector<8x2xf32>
      %cst_33 = arith.constant dense<0xFF800000> : vector<8xf32>
      %60 = vector.multi_reduction <maximumf>, %59, %cst_33 [1] : vector<8x2xf32> to vector<8xf32>
      %61 = vector.shape_cast %60 : vector<8xf32> to vector<8x1xf32>
      %62 = tpu.iota {dimensions = array<i32: 1>} : vector<8x2xi32>
      %63 = vector.broadcast %61 : vector<8x1xf32> to vector<8x2xf32>
      %64 = arith.cmpf oge, %59, %63 : vector<8x2xf32>
      %c2_i32 = arith.constant 2 : i32
      %65 = vector.broadcast %c2_i32 : i32 to vector<8x2xi32>
      %66 = arith.select %64, %62, %65 : vector<8x2xi1>, vector<8x2xi32>
      %cst_34 = arith.constant dense<2147483647> : vector<8xi32>
      %67 = vector.multi_reduction <minsi>, %66, %cst_34 [1] : vector<8x2xi32> to vector<8xi32>
      %68 = vector.shape_cast %67 : vector<8xi32> to vector<8x1xi32>
      %c0_35 = arith.constant 0 : index
      %c0_36 = arith.constant 0 : index
      %69 = vector.load %arg12[%c0_35, %c0_36] : memref<8x1xf32, #tpu.memory_space<vmem>>, vector<8x1xf32>
      tpu.vector_store %arg12[%c0_35, %c0_36], %61 {strides = array<i32>} : memref<8x1xf32, #tpu.memory_space<vmem>>, vector<8x1xf32>,
      %c0_37 = arith.constant 0 : index
      %c0_38 = arith.constant 0 : index
      %70 = vector.load %arg13[%c0_37, %c0_38] : memref<8x1xi32, #tpu.memory_space<vmem>>, vector<8x1xi32>
      tpu.vector_store %arg13[%c0_37, %c0_38], %68 {strides = array<i32>} : memref<8x1xi32, #tpu.memory_space<vmem>>, vector<8x1xi32>,
      %cst_39 = arith.constant 0.000000e+00 : f32
      %71 = vector.broadcast %cst_39 : f32 to vector<8x32xf32>
      %c0_40 = arith.constant 0 : index
      %c0_41 = arith.constant 0 : index
      %72 = vector.load %arg14[%c0_40, %c0_41] : memref<8x32xf32, #tpu.memory_space<vmem>>, vector<8x32xf32>
      tpu.vector_store %arg14[%c0_40, %c0_41], %71 {strides = array<i32>} : memref<8x32xf32, #tpu.memory_space<vmem>>, vector<8x32xf32>,
    } else {
    }
    %c0_2 = arith.constant 0 : index
    %c0_3 = arith.constant 0 : index
    %c0_4 = arith.constant 0 : index
    %5 = vector.load %arg5[%c0_2, %c0_3, %c0_4] : memref<1x32x64xbf16, #tpu.memory_space<vmem>>, vector<1x32x64xbf16>
    %6 = vector.shape_cast %5 : vector<1x32x64xbf16> to vector<32x64xbf16>
    %cst = arith.constant dense<0.000000e+00> : vector<8x64xf32>
    %7 = tpu.matmul %1, %6, %cst {dimension_numbers = #tpu.dot_dimension_numbers<[1], [0], [0], [1], [0, 0, 1, 1], [], []>} : vector<8x32xbf16>, vector<32x64xbf16>, vector<8x64xf32> -> vector<8x64xf32>
    %c0_5 = arith.constant 0 : index
    %c0_6 = arith.constant 0 : index
    %c0_7 = arith.constant 0 : index
    %8 = vector.load %arg6[%c0_5, %c0_6, %c0_7] : memref<1x1x64xf32, #tpu.memory_space<vmem>>, vector<1x1x64xf32>
    %9 = vector.shape_cast %8 : vector<1x1x64xf32> to vector<1x64xf32>
    %10 = vector.broadcast %9 : vector<1x64xf32> to vector<8x64xf32>
    %11 = arith.addf %7, %10 : vector<8x64xf32>
    %12 = arith.mulf %11, %11 : vector<8x64xf32>
    %13 = arith.mulf %11, %12 : vector<8x64xf32>
    %cst_8 = arith.constant 4.471500e-02 : f32
    %14 = vector.broadcast %cst_8 : f32 to vector<8x64xf32>
    %15 = arith.mulf %14, %13 : vector<8x64xf32>
    %16 = arith.addf %11, %15 : vector<8x64xf32>
    %cst_9 = arith.constant 0.797884583 : f32
    %17 = vector.broadcast %cst_9 : f32 to vector<8x64xf32>
    %18 = arith.mulf %17, %16 : vector<8x64xf32>
    %19 = math.tanh %18 : vector<8x64xf32>
    %cst_10 = arith.constant 1.000000e+00 : f32
    %20 = vector.broadcast %cst_10 : f32 to vector<8x64xf32>
    %21 = arith.addf %20, %19 : vector<8x64xf32>
    %cst_11 = arith.constant 5.000000e-01 : f32
    %22 = vector.broadcast %cst_11 : f32 to vector<8x64xf32>
    %23 = arith.mulf %22, %21 : vector<8x64xf32>
    %24 = arith.mulf %11, %23 : vector<8x64xf32>
    %25 = arith.truncf %24 : vector<8x64xf32> to vector<8x64xbf16>
    %c0_12 = arith.constant 0 : index
    %c0_13 = arith.constant 0 : index
    %c0_14 = arith.constant 0 : index
    %26 = vector.load %arg7[%c0_12, %c0_13, %c0_14] : memref<1x64x32xbf16, #tpu.memory_space<vmem>>, vector<1x64x32xbf16>
    %27 = vector.shape_cast %26 : vector<1x64x32xbf16> to vector<64x32xbf16>
    %cst_15 = arith.constant dense<0.000000e+00> : vector<8x32xf32>
    %28 = tpu.matmul %25, %27, %cst_15 {dimension_numbers = #tpu.dot_dimension_numbers<[1], [0], [0], [1], [0, 0, 1, 1], [], []>} : vector<8x64xbf16>, vector<64x32xbf16>, vector<8x32xf32> -> vector<8x32xf32>
    %c0_16 = arith.constant 0 : index
    %c0_17 = arith.constant 0 : index
    %c0_18 = arith.constant 0 : index
    %29 = vector.load %arg8[%c0_16, %c0_17, %c0_18] : memref<1x1x32xf32, #tpu.memory_space<vmem>>, vector<1x1x32xf32>
    %30 = vector.shape_cast %29 : vector<1x1x32xf32> to vector<1x32xf32>
    %31 = vector.broadcast %30 : vector<1x32xf32> to vector<8x32xf32>
    %32 = arith.addf %28, %31 : vector<8x32xf32>
    %c0_19 = arith.constant 0 : index
    %c0_20 = arith.constant 0 : index
    %33 = vector.load %arg13[%c0_19, %c0_20] : memref<8x1xi32, #tpu.memory_space<vmem>>, vector<8x1xi32>
    %34 = vector.broadcast %arg1 : i32 to vector<8x1xi32>
    %35 = arith.cmpi eq, %33, %34 : vector<8x1xi32>
    %36 = arith.extui %35 : vector<8x1xi1> to vector<8x1xi32>
    %37 = arith.sitofp %36 : vector<8x1xi32> to vector<8x1xf32>
    %c0_21 = arith.constant 0 : index
    %c0_22 = arith.constant 0 : index
    %38 = vector.load %arg14[%c0_21, %c0_22] : memref<8x32xf32, #tpu.memory_space<vmem>>, vector<8x32xf32>
    %39 = vector.broadcast %37 : vector<8x1xf32> to vector<8x32xf32>
    %40 = arith.mulf %32, %39 : vector<8x32xf32>
    %41 = arith.addf %38, %40 : vector<8x32xf32>
    %c0_23 = arith.constant 0 : index
    %c0_24 = arith.constant 0 : index
    %42 = vector.load %arg14[%c0_23, %c0_24] : memref<8x32xf32, #tpu.memory_space<vmem>>, vector<8x32xf32>
    tpu.vector_store %arg14[%c0_23, %c0_24], %41 {strides = array<i32>} : memref<8x32xf32, #tpu.memory_space<vmem>>, vector<8x32xf32>,
    %c1_i32 = arith.constant 1 : i32
    %43 = arith.cmpi eq, %arg1, %c1_i32 : i32
    %44 = arith.extui %43 : i1 to i32
    %c0_i32_25 = arith.constant 0 : i32
    %45 = arith.cmpi ne, %44, %c0_i32_25 : i32
    scf.if %45 {
      %c0_26 = arith.constant 0 : index
      %c0_27 = arith.constant 0 : index
      %46 = vector.load %arg14[%c0_26, %c0_27] : memref<8x32xf32, #tpu.memory_space<vmem>>, vector<8x32xf32>
      %c0_28 = arith.constant 0 : index
      %c0_29 = arith.constant 0 : index
      %47 = vector.load %arg12[%c0_28, %c0_29] : memref<8x1xf32, #tpu.memory_space<vmem>>, vector<8x1xf32>
      %48 = vector.broadcast %47 : vector<8x1xf32> to vector<8x32xf32>
      %49 = arith.mulf %46, %48 : vector<8x32xf32>
      %50 = arith.addf %0, %49 : vector<8x32xf32>
      %c0_30 = arith.constant 0 : index
      %c0_31 = arith.constant 0 : index
      %51 = vector.load %arg9[%c0_30, %c0_31] : memref<1x32xf32, #tpu.memory_space<vmem>>, vector<1x32xf32>
      %c0_32 = arith.constant 0 : index
      %c0_33 = arith.constant 0 : index
      %52 = vector.load %arg10[%c0_32, %c0_33] : memref<1x32xf32, #tpu.memory_space<vmem>>, vector<1x32xf32>
      %cst_34 = arith.constant dense<0.000000e+00> : vector<8xf32>
      %53 = vector.multi_reduction <add>, %50, %cst_34 [1] : vector<8x32xf32> to vector<8xf32>
      %54 = vector.shape_cast %53 : vector<8xf32> to vector<8x1xf32>
      %cst_35 = arith.constant 3.200000e+01 : f32
      %55 = vector.broadcast %cst_35 : f32 to vector<8x1xf32>
      %56 = arith.divf %54, %55 : vector<8x1xf32>
      %57 = vector.broadcast %56 : vector<8x1xf32> to vector<8x32xf32>
      %58 = arith.subf %50, %57 : vector<8x32xf32>
      %59 = arith.mulf %58, %58 : vector<8x32xf32>
      %cst_36 = arith.constant dense<0.000000e+00> : vector<8xf32>
      %60 = vector.multi_reduction <add>, %59, %cst_36 [1] : vector<8x32xf32> to vector<8xf32>
      %61 = vector.shape_cast %60 : vector<8xf32> to vector<8x1xf32>
      %cst_37 = arith.constant 3.200000e+01 : f32
      %62 = vector.broadcast %cst_37 : f32 to vector<8x1xf32>
      %63 = arith.divf %61, %62 : vector<8x1xf32>
      %64 = vector.broadcast %56 : vector<8x1xf32> to vector<8x32xf32>
      %65 = arith.subf %50, %64 : vector<8x32xf32>
      %cst_38 = arith.constant 9.99999996E-13 : f32
      %66 = vector.broadcast %cst_38 : f32 to vector<8x1xf32>
      %67 = arith.addf %63, %66 : vector<8x1xf32>
      %68 = math.rsqrt %67 : vector<8x1xf32>
      %69 = vector.broadcast %68 : vector<8x1xf32> to vector<8x32xf32>
      %70 = arith.mulf %65, %69 : vector<8x32xf32>
      %71 = vector.broadcast %51 : vector<1x32xf32> to vector<8x32xf32>
      %72 = arith.mulf %70, %71 : vector<8x32xf32>
      %73 = vector.broadcast %52 : vector<1x32xf32> to vector<8x32xf32>
      %74 = arith.addf %72, %73 : vector<8x32xf32>
      %c0_39 = arith.constant 0 : index
      %c0_40 = arith.constant 0 : index
      %75 = vector.load %arg11[%c0_39, %c0_40] : memref<8x32xf32, #tpu.memory_space<vmem>>, vector<8x32xf32>
      tpu.vector_store %arg11[%c0_39, %c0_40], %74 {strides = array<i32>} : memref<8x32xf32, #tpu.memory_space<vmem>>, vector<8x32xf32>,
    } else {
    }
    return
  }
  func.func @transform_0(%arg0: i32, %arg1: i32) -> (i32, i32) {
    %c0_i32 = arith.constant 0 : i32
    %c0_i32_0 = arith.constant 0 : i32
    return %arg0, %c0_i32 : i32, i32
  }
  func.func @transform_1(%arg0: i32, %arg1: i32) -> (i32, i32) {
    %c0_i32 = arith.constant 0 : i32
    %c0_i32_0 = arith.constant 0 : i32
    %c0_i32_1 = arith.constant 0 : i32
    return %c0_i32, %c0_i32_0 : i32, i32
  }
  func.func @transform_2(%arg0: i32, %arg1: i32) -> (i32, i32) {
    %c0_i32 = arith.constant 0 : i32
    %c0_i32_0 = arith.constant 0 : i32
    %c0_i32_1 = arith.constant 0 : i32
    return %c0_i32, %c0_i32_0 : i32, i32
  }
  func.func @transform_3(%arg0: i32, %arg1: i32) -> (i32, i32, i32) {
    %c0_i32 = arith.constant 0 : i32
    %c0_i32_0 = arith.constant 0 : i32
    %c0_i32_1 = arith.constant 0 : i32
    return %arg1, %c0_i32, %c0_i32_0 : i32, i32, i32
  }
  func.func @transform_4(%arg0: i32, %arg1: i32) -> (i32, i32, i32) {
    %c0_i32 = arith.constant 0 : i32
    %c0_i32_0 = arith.constant 0 : i32
    %c0_i32_1 = arith.constant 0 : i32
    return %arg1, %c0_i32, %c0_i32_0 : i32, i32, i32
  }
  func.func @transform_5(%arg0: i32, %arg1: i32) -> (i32, i32, i32) {
    %c0_i32 = arith.constant 0 : i32
    %c0_i32_0 = arith.constant 0 : i32
    %c0_i32_1 = arith.constant 0 : i32
    return %arg1, %c0_i32, %c0_i32_0 : i32, i32, i32
  }
  func.func @transform_6(%arg0: i32, %arg1: i32) -> (i32, i32, i32) {
    %c0_i32 = arith.constant 0 : i32
    %c0_i32_0 = arith.constant 0 : i32
    %c0_i32_1 = arith.constant 0 : i32
    return %arg1, %c0_i32, %c0_i32_0 : i32, i32, i32
  }
  func.func @transform_7(%arg0: i32, %arg1: i32) -> (i32, i32) {
    %c0_i32 = arith.constant 0 : i32
    %c0_i32_0 = arith.constant 0 : i32
    %c0_i32_1 = arith.constant 0 : i32
    return %c0_i32, %c0_i32_0 : i32, i32
  }
  func.func @transform_8(%arg0: i32, %arg1: i32) -> (i32, i32) {
    %c0_i32 = arith.constant 0 : i32
    %c0_i32_0 = arith.constant 0 : i32
    %c0_i32_1 = arith.constant 0 : i32
    return %c0_i32, %c0_i32_0 : i32, i32
  }
  func.func @transform_9(%arg0: i32, %arg1: i32) -> (i32, i32) {
    %c0_i32 = arith.constant 0 : i32
    %c0_i32_0 = arith.constant 0 : i32
    return %arg0, %c0_i32 : i32, i32
  }
}

module attributes {stable_mosaic.version = 11 : i64} {
  func.func @_switch_ln_kernel(%arg0: i32, %arg1: i32, %arg2: memref<8x32xf32, #tpu.memory_space<vmem>>, %arg3: memref<32x2xbf16, #tpu.memory_space<vmem>>, %arg4: memref<1x2xf32, #tpu.memory_space<vmem>>, %arg5: memref<1x32x64xbf16, #tpu.memory_space<vmem>>, %arg6: memref<1x1x64xf32, #tpu.memory_space<vmem>>, %arg7: memref<1x64x32xbf16, #tpu.memory_space<vmem>>, %arg8: memref<1x1x32xf32, #tpu.memory_space<vmem>>, %arg9: memref<1x32xf32, #tpu.memory_space<vmem>>, %arg10: memref<1x32xf32, #tpu.memory_space<vmem>>, %arg11: memref<8x32xf32, #tpu.memory_space<vmem>>, %arg12: memref<8x1xf32, #tpu.memory_space<vmem>>, %arg13: memref<8x1xi32, #tpu.memory_space<vmem>>, %arg14: memref<8x32xf32, #tpu.memory_space<vmem>>) attributes {dimension_semantics = [#tpu.dimension_semantics<parallel>, #tpu.dimension_semantics<arbitrary>], iteration_bounds = array<i64: 1, 2>, scalar_prefetch = 0 : i64, scratch_operands = 3 : i64, tpu.core_type = #tpu.core_type<tc>, window_params = [{transform_indices = @transform_0, window_bounds = array<i64: 8, 32>}, {pipeline_mode = #tpu.pipeline_mode<synchronous>, transform_indices = @transform_1, window_bounds = array<i64: 32, 2>}, {pipeline_mode = #tpu.pipeline_mode<synchronous>, transform_indices = @transform_2, window_bounds = array<i64: 1, 2>}, {transform_indices = @transform_3, window_bounds = array<i64: 1, 32, 64>}, {transform_indices = @transform_4, window_bounds = array<i64: 1, 1, 64>}, {transform_indices = @transform_5, window_bounds = array<i64: 1, 64, 32>}, {transform_indices = @transform_6, window_bounds = array<i64: 1, 1, 32>}, {pipeline_mode = #tpu.pipeline_mode<synchronous>, transform_indices = @transform_7, window_bounds = array<i64: 1, 32>}, {pipeline_mode = #tpu.pipeline_mode<synchronous>, transform_indices = @transform_8, window_bounds = array<i64: 1, 32>}, {transform_indices = @transform_9, window_bounds = array<i64: 8, 32>}]} {
    %c0 = arith.constant 0 : index
    %c0_0 = arith.constant 0 : index
    %0 = vector.load %arg2[%c0, %c0_0] : memref<8x32xf32, #tpu.memory_space<vmem>>, vector<8x32xf32>
    %1 = arith.truncf %0 : vector<8x32xf32> to vector<8x32xbf16>
    %c0_i32 = arith.constant 0 : i32
    %2 = arith.cmpi eq, %arg1, %c0_i32 : i32
    %3 = arith.extui %2 : i1 to i32
    %c0_i32_1 = arith.constant 0 : i32
    %4 = arith.cmpi ne, %3, %c0_i32_1 : i32
    scf.if %4 {
      %c0_26 = arith.constant 0 : index
      %c0_27 = arith.constant 0 : index
      %46 = vector.load %arg3[%c0_26, %c0_27] : memref<32x2xbf16, #tpu.memory_space<vmem>>, vector<32x2xbf16>
      %cst_28 = arith.constant dense<0.000000e+00> : vector<8x2xf32>
      %47 = tpu.matmul %1, %46, %cst_28 {dimension_numbers = #tpu.dot_dimension_numbers<[1], [0], [0], [1], [0, 0, 1, 1], [], []>} : vector<8x32xbf16>, vector<32x2xbf16>, vector<8x2xf32> -> vector<8x2xf32>
      %c0_29 = arith.constant 0 : index
      %c0_30 = arith.constant 0 : index
      %48 = vector.load %arg4[%c0_29, %c0_30] : memref<1x2xf32, #tpu.memory_space<vmem>>, vector<1x2xf32>
      %49 = vector.broadcast %48 : vector<1x2xf32> to vector<8x2xf32>
      %50 = arith.addf %47, %49 : vector<8x2xf32>
      %cst_31 = arith.constant dense<0xFF800000> : vector<8xf32>
      %51 = vector.multi_reduction <maximumf>, %50, %cst_31 [1] : vector<8x2xf32> to vector<8xf32>
      %52 = vector.shape_cast %51 : vector<8xf32> to vector<8x1xf32>
      %53 = vector.broadcast %52 : vector<8x1xf32> to vector<8x2xf32>
      %54 = arith.subf %50, %53 : vector<8x2xf32>
      %55 = math.exp %54 : vector<8x2xf32>
      %cst_32 = arith.constant dense<0.000000e+00> : vector<8xf32>
      %56 = vector.multi_reduction <add>, %55, %cst_32 [1] : vector<8x2xf32> to vector<8xf32>
      %57 = vector.shape_cast %56 : vector<8xf32> to vector<8x1xf32>
      %58 = vector.broadcast %57 : vector<8x1xf32> to vector<8x2xf32>
      %59 = arith.divf %55, %58 : vector<8x2xf32>
      %cst_33 = arith.constant dense<0xFF800000> : vector<8xf32>
      %60 = vector.multi_reduction <maximumf>, %59, %cst_33 [1] : vector<8x2xf32> to vector<8xf32>
      %61 = vector.shape_cast %60 : vector<8xf32> to vector<8x1xf32>
      %62 = tpu.iota {dimensions = array<i32: 1>} : vector<8x2xi32>
      %63 = vector.broadcast %61 : vector<8x1xf32> to vector<8x2xf32>
      %64 = arith.cmpf oge, %59, %63 : vector<8x2xf32>
      %c2_i32 = arith.constant 2 : i32
      %65 = vector.broadcast %c2_i32 : i32 to vector<8x2xi32>
      %66 = arith.select %64, %62, %65 : vector<8x2xi1>, vector<8x2xi32>
      %cst_34 = arith.constant dense<2147483647> : vector<8xi32>
      %67 = vector.multi_reduction <minsi>, %66, %cst_34 [1] : vector<8x2xi32> to vector<8xi32>
      %68 = vector.shape_cast %67 : vector<8xi32> to vector<8x1xi32>
      %c0_35 = arith.constant 0 : index
      %c0_36 = arith.constant 0 : index
      %69 = vector.load %arg12[%c0_35, %c0_36] : memref<8x1xf32, #tpu.memory_space<vmem>>, vector<8x1xf32>
      tpu.vector_store %arg12[%c0_35, %c0_36], %61 {strides = array<i32>} : memref<8x1xf32, #tpu.memory_space<vmem>>, vector<8x1xf32>,
      %c0_37 = arith.constant 0 : index
      %c0_38 = arith.constant 0 : index
      %70 = vector.load %arg13[%c0_37, %c0_38] : memref<8x1xi32, #tpu.memory_space<vmem>>, vector<8x1xi32>
      tpu.vector_store %arg13[%c0_37, %c0_38], %68 {strides = array<i32>} : memref<8x1xi32, #tpu.memory_space<vmem>>, vector<8x1xi32>,
      %cst_39 = arith.constant 0.000000e+00 : f32
      %71 = vector.broadcast %cst_39 : f32 to vector<8x32xf32>
      %c0_40 = arith.constant 0 : index
      %c0_41 = arith.constant 0 : index
      %72 = vector.load %arg14[%c0_40, %c0_41] : memref<8x32xf32, #tpu.memory_space<vmem>>, vector<8x32xf32>
      tpu.vector_store %arg14[%c0_40, %c0_41], %71 {strides = array<i32>} : memref<8x32xf32, #tpu.memory_space<vmem>>, vector<8x32xf32>,
    } else {
    }
    %c0_2 = arith.constant 0 : index
    %c0_3 = arith.constant 0 : index
    %c0_4 = arith.constant 0 : index
    %5 = vector.load %arg5[%c0_2, %c0_3, %c0_4] : memref<1x32x64xbf16, #tpu.memory_space<vmem>>, vector<1x32x64xbf16>
    %6 = vector.shape_cast %5 : vector<1x32x64xbf16> to vector<32x64xbf16>
    %cst = arith.constant dense<0.000000e+00> : vector<8x64xf32>
    %7 = tpu.matmul %1, %6, %cst {dimension_numbers = #tpu.dot_dimension_numbers<[1], [0], [0], [1], [0, 0, 1, 1], [], []>} : vector<8x32xbf16>, vector<32x64xbf16>, vector<8x64xf32> -> vector<8x64xf32>
    %c0_5 = arith.constant 0 : index
    %c0_6 = arith.constant 0 : index
    %c0_7 = arith.constant 0 : index
    %8 = vector.load %arg6[%c0_5, %c0_6, %c0_7] : memref<1x1x64xf32, #tpu.memory_space<vmem>>, vector<1x1x64xf32>
    %9 = vector.shape_cast %8 : vector<1x1x64xf32> to vector<1x64xf32>
    %10 = vector.broadcast %9 : vector<1x64xf32> to vector<8x64xf32>
    %11 = arith.addf %7, %10 : vector<8x64xf32>
    %12 = arith.mulf %11, %11 : vector<8x64xf32>
    %13 = arith.mulf %11, %12 : vector<8x64xf32>
    %cst_8 = arith.constant 4.471500e-02 : f32
    %14 = vector.broadcast %cst_8 : f32 to vector<8x64xf32>
    %15 = arith.mulf %14, %13 : vector<8x64xf32>
    %16 = arith.addf %11, %15 : vector<8x64xf32>
    %cst_9 = arith.constant 0.797884583 : f32
    %17 = vector.broadcast %cst_9 : f32 to vector<8x64xf32>
    %18 = arith.mulf %17, %16 : vector<8x64xf32>
    %19 = math.tanh %18 : vector<8x64xf32>
    %cst_10 = arith.constant 1.000000e+00 : f32
    %20 = vector.broadcast %cst_10 : f32 to vector<8x64xf32>
    %21 = arith.addf %20, %19 : vector<8x64xf32>
    %cst_11 = arith.constant 5.000000e-01 : f32
    %22 = vector.broadcast %cst_11 : f32 to vector<8x64xf32>
    %23 = arith.mulf %22, %21 : vector<8x64xf32>
    %24 = arith.mulf %11, %23 : vector<8x64xf32>
    %25 = arith.truncf %24 : vector<8x64xf32> to vector<8x64xbf16>
    %c0_12 = arith.constant 0 : index
    %c0_13 = arith.constant 0 : index
    %c0_14 = arith.constant 0 : index
    %26 = vector.load %arg7[%c0_12, %c0_13, %c0_14] : memref<1x64x32xbf16, #tpu.memory_space<vmem>>, vector<1x64x32xbf16>
    %27 = vector.shape_cast %26 : vector<1x64x32xbf16> to vector<64x32xbf16>
    %cst_15 = arith.constant dense<0.000000e+00> : vector<8x32xf32>
    %28 = tpu.matmul %25, %27, %cst_15 {dimension_numbers = #tpu.dot_dimension_numbers<[1], [0], [0], [1], [0, 0, 1, 1], [], []>} : vector<8x64xbf16>, vector<64x32xbf16>, vector<8x32xf32> -> vector<8x32xf32>
    %c0_16 = arith.constant 0 : index
    %c0_17 = arith.constant 0 : index
    %c0_18 = arith.constant 0 : index
    %29 = vector.load %arg8[%c0_16, %c0_17, %c0_18] : memref<1x1x32xf32, #tpu.memory_space<vmem>>, vector<1x1x32xf32>
    %30 = vector.shape_cast %29 : vector<1x1x32xf32> to vector<1x32xf32>
    %31 = vector.broadcast %30 : vector<1x32xf32> to vector<8x32xf32>
    %32 = arith.addf %28, %31 : vector<8x32xf32>
    %c0_19 = arith.constant 0 : index
    %c0_20 = arith.constant 0 : index
    %33 = vector.load %arg13[%c0_19, %c0_20] : memref<8x1xi32, #tpu.memory_space<vmem>>, vector<8x1xi32>
    %34 = vector.broadcast %arg1 : i32 to vector<8x1xi32>
    %35 = arith.cmpi eq, %33, %34 : vector<8x1xi32>
    %36 = arith.extui %35 : vector<8x1xi1> to vector<8x1xi32>
    %37 = arith.sitofp %36 : vector<8x1xi32> to vector<8x1xf32>
    %c0_21 = arith.constant 0 : index
    %c0_22 = arith.constant 0 : index
    %38 = vector.load %arg14[%c0_21, %c0_22] : memref<8x32xf32, #tpu.memory_space<vmem>>, vector<8x32xf32>
    %39 = vector.broadcast %37 : vector<8x1xf32> to vector<8x32xf32>
    %40 = arith.mulf %32, %39 : vector<8x32xf32>
    %41 = arith.addf %38, %40 : vector<8x32xf32>
    %c0_23 = arith.constant 0 : index
    %c0_24 = arith.constant 0 : index
    %42 = vector.load %arg14[%c0_23, %c0_24] : memref<8x32xf32, #tpu.memory_space<vmem>>, vector<8x32xf32>
    tpu.vector_store %arg14[%c0_23, %c0_24], %41 {strides = array<i32>} : memref<8x32xf32, #tpu.memory_space<vmem>>, vector<8x32xf32>,
    %c1_i32 = arith.constant 1 : i32
    %43 = arith.cmpi eq, %arg1, %c1_i32 : i32
    %44 = arith.extui %43 : i1 to i32
    %c0_i32_25 = arith.constant 0 : i32
    %45 = arith.cmpi ne, %44, %c0_i32_25 : i32
    scf.if %45 {
      %c0_26 = arith.constant 0 : index
      %c0_27 = arith.constant 0 : index
      %46 = vector.load %arg14[%c0_26, %c0_27] : memref<8x32xf32, #tpu.memory_space<vmem>>, vector<8x32xf32>
      %c0_28 = arith.constant 0 : index
      %c0_29 = arith.constant 0 : index
      %47 = vector.load %arg12[%c0_28, %c0_29] : memref<8x1xf32, #tpu.memory_space<vmem>>, vector<8x1xf32>
      %48 = vector.broadcast %47 : vector<8x1xf32> to vector<8x32xf32>
      %49 = arith.mulf %46, %48 : vector<8x32xf32>
      %50 = arith.addf %0, %49 : vector<8x32xf32>
      %c0_30 = arith.constant 0 : index
      %c0_31 = arith.constant 0 : index
      %51 = vector.load %arg9[%c0_30, %c0_31] : memref<1x32xf32, #tpu.memory_space<vmem>>, vector<1x32xf32>
      %c0_32 = arith.constant 0 : index
      %c0_33 = arith.constant 0 : index
      %52 = vector.load %arg10[%c0_32, %c0_33] : memref<1x32xf32, #tpu.memory_space<vmem>>, vector<1x32xf32>
      %cst_34 = arith.constant dense<0.000000e+00> : vector<8xf32>
      %53 = vector.multi_reduction <add>, %50, %cst_34 [1] : vector<8x32xf32> to vector<8xf32>
      %54 = vector.shape_cast %53 : vector<8xf32> to vector<8x1xf32>
      %cst_35 = arith.constant 3.200000e+01 : f32
      %55 = vector.broadcast %cst_35 : f32 to vector<8x1xf32>
      %56 = arith.divf %54, %55 : vector<8x1xf32>
      %57 = vector.broadcast %56 : vector<8x1xf32> to vector<8x32xf32>
      %58 = arith.subf %50, %57 : vector<8x32xf32>
      %59 = arith.mulf %58, %58 : vector<8x32xf32>
      %cst_36 = arith.constant dense<0.000000e+00> : vector<8xf32>
      %60 = vector.multi_reduction <add>, %59, %cst_36 [1] : vector<8x32xf32> to vector<8xf32>
      %61 = vector.shape_cast %60 : vector<8xf32> to vector<8x1xf32>
      %cst_37 = arith.constant 3.200000e+01 : f32
      %62 = vector.broadcast %cst_37 : f32 to vector<8x1xf32>
      %63 = arith.divf %61, %62 : vector<8x1xf32>
      %64 = vector.broadcast %56 : vector<8x1xf32> to vector<8x32xf32>
      %65 = arith.subf %50, %64 : vector<8x32xf32>
      %cst_38 = arith.constant 9.99999996E-13 : f32
      %66 = vector.broadcast %cst_38 : f32 to vector<8x1xf32>
      %67 = arith.addf %63, %66 : vector<8x1xf32>
      %68 = math.rsqrt %67 : vector<8x1xf32>
      %69 = vector.broadcast %68 : vector<8x1xf32> to vector<8x32xf32>
      %70 = arith.mulf %65, %69 : vector<8x32xf32>
      %71 = vector.broadcast %51 : vector<1x32xf32> to vector<8x32xf32>
      %72 = arith.mulf %70, %71 : vector<8x32xf32>
      %73 = vector.broadcast %52 : vector<1x32xf32> to vector<8x32xf32>
      %74 = arith.addf %72, %73 : vector<8x32xf32>
      %c0_39 = arith.constant 0 : index
      %c0_40 = arith.constant 0 : index
      %75 = vector.load %arg11[%c0_39, %c0_40] : memref<8x32xf32, #tpu.memory_space<vmem>>, vector<8x32xf32>
      tpu.vector_store %arg11[%c0_39, %c0_40], %74 {strides = array<i32>} : memref<8x32xf32, #tpu.memory_space<vmem>>, vector<8x32xf32>,
    } else {
    }
    return
  }
  func.func @transform_0(%arg0: i32, %arg1: i32) -> (i32, i32) {
    %c0_i32 = arith.constant 0 : i32
    %c0_i32_0 = arith.constant 0 : i32
    return %arg0, %c0_i32 : i32, i32
  }
  func.func @transform_1(%arg0: i32, %arg1: i32) -> (i32, i32) {
    %c0_i32 = arith.constant 0 : i32
    %c0_i32_0 = arith.constant 0 : i32
    %c0_i32_1 = arith.constant 0 : i32
    return %c0_i32, %c0_i32_0 : i32, i32
  }
  func.func @transform_2(%arg0: i32, %arg1: i32) -> (i32, i32) {
    %c0_i32 = arith.constant 0 : i32
    %c0_i32_0 = arith.constant 0 : i32
    %c0_i32_1 = arith.constant 0 : i32
    return %c0_i32, %c0_i32_0 : i32, i32
  }
  func.func @transform_3(%arg0: i32, %arg1: i32) -> (i32, i32, i32) {
    %c0_i32 = arith.constant 0 : i32
    %c0_i32_0 = arith.constant 0 : i32
    %c0_i32_1 = arith.constant 0 : i32
    return %arg1, %c0_i32, %c0_i32_0 : i32, i32, i32
  }
  func.func @transform_4(%arg0: i32, %arg1: i32) -> (i32, i32, i32) {
    %c0_i32 = arith.constant 0 : i32
    %c0_i32_0 = arith.constant 0 : i32
    %c0_i32_1 = arith.constant 0 : i32
    return %arg1, %c0_i32, %c0_i32_0 : i32, i32, i32
  }
  func.func @transform_5(%arg0: i32, %arg1: i32) -> (i32, i32, i32) {
    %c0_i32 = arith.constant 0 : i32
    %c0_i32_0 = arith.constant 0 : i32
    %c0_i32_1 = arith.constant 0 : i32
    return %arg1, %c0_i32, %c0_i32_0 : i32, i32, i32
  }
  func.func @transform_6(%arg0: i32, %arg1: i32) -> (i32, i32, i32) {
    %c0_i32 = arith.constant 0 : i32
    %c0_i32_0 = arith.constant 0 : i32
    %c0_i32_1 = arith.constant 0 : i32
    return %arg1, %c0_i32, %c0_i32_0 : i32, i32, i32
  }
  func.func @transform_7(%arg0: i32, %arg1: i32) -> (i32, i32) {
    %c0_i32 = arith.constant 0 : i32
    %c0_i32_0 = arith.constant 0 : i32
    %c0_i32_1 = arith.constant 0 : i32
    return %c0_i32, %c0_i32_0 : i32, i32
  }
  func.func @transform_8(%arg0: i32, %arg1: i32) -> (i32, i32) {
    %c0_i32 = arith.constant 0 : i32
    %c0_i32_0 = arith.constant 0 : i32
    %c0_i32_1 = arith.constant 0 : i32
    return %c0_i32, %c0_i32_0 : i32, i32
  }
  func.func @transform_9(%arg0: i32, %arg1: i32) -> (i32, i32) {
    %c0_i32 = arith.constant 0 : i32
    %c0_i32_0 = arith.constant 0 : i32
    return %arg0, %c0_i32 : i32, i32
  }
}

module attributes {stable_mosaic.version = 11 : i64} {
  func.func @_switch_ln_kernel(%arg0: i32, %arg1: i32, %arg2: memref<16x32xf32, #tpu.memory_space<vmem>>, %arg3: memref<32x2xbf16, #tpu.memory_space<vmem>>, %arg4: memref<1x2xf32, #tpu.memory_space<vmem>>, %arg5: memref<1x32x64xbf16, #tpu.memory_space<vmem>>, %arg6: memref<1x1x64xf32, #tpu.memory_space<vmem>>, %arg7: memref<1x64x32xbf16, #tpu.memory_space<vmem>>, %arg8: memref<1x1x32xf32, #tpu.memory_space<vmem>>, %arg9: memref<1x32xf32, #tpu.memory_space<vmem>>, %arg10: memref<1x32xf32, #tpu.memory_space<vmem>>, %arg11: memref<16x32xf32, #tpu.memory_space<vmem>>, %arg12: memref<16x1xf32, #tpu.memory_space<vmem>>, %arg13: memref<16x1xi32, #tpu.memory_space<vmem>>, %arg14: memref<16x32xf32, #tpu.memory_space<vmem>>) attributes {dimension_semantics = [#tpu.dimension_semantics<parallel>, #tpu.dimension_semantics<arbitrary>], iteration_bounds = array<i64: 1, 2>, scalar_prefetch = 0 : i64, scratch_operands = 3 : i64, tpu.core_type = #tpu.core_type<tc>, window_params = [{transform_indices = @transform_0, window_bounds = array<i64: 16, 32>}, {pipeline_mode = #tpu.pipeline_mode<synchronous>, transform_indices = @transform_1, window_bounds = array<i64: 32, 2>}, {pipeline_mode = #tpu.pipeline_mode<synchronous>, transform_indices = @transform_2, window_bounds = array<i64: 1, 2>}, {transform_indices = @transform_3, window_bounds = array<i64: 1, 32, 64>}, {transform_indices = @transform_4, window_bounds = array<i64: 1, 1, 64>}, {transform_indices = @transform_5, window_bounds = array<i64: 1, 64, 32>}, {transform_indices = @transform_6, window_bounds = array<i64: 1, 1, 32>}, {pipeline_mode = #tpu.pipeline_mode<synchronous>, transform_indices = @transform_7, window_bounds = array<i64: 1, 32>}, {pipeline_mode = #tpu.pipeline_mode<synchronous>, transform_indices = @transform_8, window_bounds = array<i64: 1, 32>}, {transform_indices = @transform_9, window_bounds = array<i64: 16, 32>}]} {
    %c0 = arith.constant 0 : index
    %c0_0 = arith.constant 0 : index
    %0 = vector.load %arg2[%c0, %c0_0] : memref<16x32xf32, #tpu.memory_space<vmem>>, vector<16x32xf32>
    %1 = arith.truncf %0 : vector<16x32xf32> to vector<16x32xbf16>
    %c0_i32 = arith.constant 0 : i32
    %2 = arith.cmpi eq, %arg1, %c0_i32 : i32
    %3 = arith.extui %2 : i1 to i32
    %c0_i32_1 = arith.constant 0 : i32
    %4 = arith.cmpi ne, %3, %c0_i32_1 : i32
    scf.if %4 {
      %c0_26 = arith.constant 0 : index
      %c0_27 = arith.constant 0 : index
      %46 = vector.load %arg3[%c0_26, %c0_27] : memref<32x2xbf16, #tpu.memory_space<vmem>>, vector<32x2xbf16>
      %cst_28 = arith.constant dense<0.000000e+00> : vector<16x2xf32>
      %47 = tpu.matmul %1, %46, %cst_28 {dimension_numbers = #tpu.dot_dimension_numbers<[1], [0], [0], [1], [0, 0, 1, 1], [], []>} : vector<16x32xbf16>, vector<32x2xbf16>, vector<16x2xf32> -> vector<16x2xf32>
      %c0_29 = arith.constant 0 : index
      %c0_30 = arith.constant 0 : index
      %48 = vector.load %arg4[%c0_29, %c0_30] : memref<1x2xf32, #tpu.memory_space<vmem>>, vector<1x2xf32>
      %49 = vector.broadcast %48 : vector<1x2xf32> to vector<16x2xf32>
      %50 = arith.addf %47, %49 : vector<16x2xf32>
      %cst_31 = arith.constant dense<0xFF800000> : vector<16xf32>
      %51 = vector.multi_reduction <maximumf>, %50, %cst_31 [1] : vector<16x2xf32> to vector<16xf32>
      %52 = vector.shape_cast %51 : vector<16xf32> to vector<16x1xf32>
      %53 = vector.broadcast %52 : vector<16x1xf32> to vector<16x2xf32>
      %54 = arith.subf %50, %53 : vector<16x2xf32>
      %55 = math.exp %54 : vector<16x2xf32>
      %cst_32 = arith.constant dense<0.000000e+00> : vector<16xf32>
      %56 = vector.multi_reduction <add>, %55, %cst_32 [1] : vector<16x2xf32> to vector<16xf32>
      %57 = vector.shape_cast %56 : vector<16xf32> to vector<16x1xf32>
      %58 = vector.broadcast %57 : vector<16x1xf32> to vector<16x2xf32>
      %59 = arith.divf %55, %58 : vector<16x2xf32>
      %cst_33 = arith.constant dense<0xFF800000> : vector<16xf32>
      %60 = vector.multi_reduction <maximumf>, %59, %cst_33 [1] : vector<16x2xf32> to vector<16xf32>
      %61 = vector.shape_cast %60 : vector<16xf32> to vector<16x1xf32>
      %62 = tpu.iota {dimensions = array<i32: 1>} : vector<16x2xi32>
      %63 = vector.broadcast %61 : vector<16x1xf32> to vector<16x2xf32>
      %64 = arith.cmpf oge, %59, %63 : vector<16x2xf32>
      %c2_i32 = arith.constant 2 : i32
      %65 = vector.broadcast %c2_i32 : i32 to vector<16x2xi32>
      %66 = arith.select %64, %62, %65 : vector<16x2xi1>, vector<16x2xi32>
      %cst_34 = arith.constant dense<2147483647> : vector<16xi32>
      %67 = vector.multi_reduction <minsi>, %66, %cst_34 [1] : vector<16x2xi32> to vector<16xi32>
      %68 = vector.shape_cast %67 : vector<16xi32> to vector<16x1xi32>
      %c0_35 = arith.constant 0 : index
      %c0_36 = arith.constant 0 : index
      %69 = vector.load %arg12[%c0_35, %c0_36] : memref<16x1xf32, #tpu.memory_space<vmem>>, vector<16x1xf32>
      tpu.vector_store %arg12[%c0_35, %c0_36], %61 {strides = array<i32>} : memref<16x1xf32, #tpu.memory_space<vmem>>, vector<16x1xf32>,
      %c0_37 = arith.constant 0 : index
      %c0_38 = arith.constant 0 : index
      %70 = vector.load %arg13[%c0_37, %c0_38] : memref<16x1xi32, #tpu.memory_space<vmem>>, vector<16x1xi32>
      tpu.vector_store %arg13[%c0_37, %c0_38], %68 {strides = array<i32>} : memref<16x1xi32, #tpu.memory_space<vmem>>, vector<16x1xi32>,
      %cst_39 = arith.constant 0.000000e+00 : f32
      %71 = vector.broadcast %cst_39 : f32 to vector<16x32xf32>
      %c0_40 = arith.constant 0 : index
      %c0_41 = arith.constant 0 : index
      %72 = vector.load %arg14[%c0_40, %c0_41] : memref<16x32xf32, #tpu.memory_space<vmem>>, vector<16x32xf32>
      tpu.vector_store %arg14[%c0_40, %c0_41], %71 {strides = array<i32>} : memref<16x32xf32, #tpu.memory_space<vmem>>, vector<16x32xf32>,
    } else {
    }
    %c0_2 = arith.constant 0 : index
    %c0_3 = arith.constant 0 : index
    %c0_4 = arith.constant 0 : index
    %5 = vector.load %arg5[%c0_2, %c0_3, %c0_4] : memref<1x32x64xbf16, #tpu.memory_space<vmem>>, vector<1x32x64xbf16>
    %6 = vector.shape_cast %5 : vector<1x32x64xbf16> to vector<32x64xbf16>
    %cst = arith.constant dense<0.000000e+00> : vector<16x64xf32>
    %7 = tpu.matmul %1, %6, %cst {dimension_numbers = #tpu.dot_dimension_numbers<[1], [0], [0], [1], [0, 0, 1, 1], [], []>} : vector<16x32xbf16>, vector<32x64xbf16>, vector<16x64xf32> -> vector<16x64xf32>
    %c0_5 = arith.constant 0 : index
    %c0_6 = arith.constant 0 : index
    %c0_7 = arith.constant 0 : index
    %8 = vector.load %arg6[%c0_5, %c0_6, %c0_7] : memref<1x1x64xf32, #tpu.memory_space<vmem>>, vector<1x1x64xf32>
    %9 = vector.shape_cast %8 : vector<1x1x64xf32> to vector<1x64xf32>
    %10 = vector.broadcast %9 : vector<1x64xf32> to vector<16x64xf32>
    %11 = arith.addf %7, %10 : vector<16x64xf32>
    %12 = arith.mulf %11, %11 : vector<16x64xf32>
    %13 = arith.mulf %11, %12 : vector<16x64xf32>
    %cst_8 = arith.constant 4.471500e-02 : f32
    %14 = vector.broadcast %cst_8 : f32 to vector<16x64xf32>
    %15 = arith.mulf %14, %13 : vector<16x64xf32>
    %16 = arith.addf %11, %15 : vector<16x64xf32>
    %cst_9 = arith.constant 0.797884583 : f32
    %17 = vector.broadcast %cst_9 : f32 to vector<16x64xf32>
    %18 = arith.mulf %17, %16 : vector<16x64xf32>
    %19 = math.tanh %18 : vector<16x64xf32>
    %cst_10 = arith.constant 1.000000e+00 : f32
    %20 = vector.broadcast %cst_10 : f32 to vector<16x64xf32>
    %21 = arith.addf %20, %19 : vector<16x64xf32>
    %cst_11 = arith.constant 5.000000e-01 : f32
    %22 = vector.broadcast %cst_11 : f32 to vector<16x64xf32>
    %23 = arith.mulf %22, %21 : vector<16x64xf32>
    %24 = arith.mulf %11, %23 : vector<16x64xf32>
    %25 = arith.truncf %24 : vector<16x64xf32> to vector<16x64xbf16>
    %c0_12 = arith.constant 0 : index
    %c0_13 = arith.constant 0 : index
    %c0_14 = arith.constant 0 : index
    %26 = vector.load %arg7[%c0_12, %c0_13, %c0_14] : memref<1x64x32xbf16, #tpu.memory_space<vmem>>, vector<1x64x32xbf16>
    %27 = vector.shape_cast %26 : vector<1x64x32xbf16> to vector<64x32xbf16>
    %cst_15 = arith.constant dense<0.000000e+00> : vector<16x32xf32>
    %28 = tpu.matmul %25, %27, %cst_15 {dimension_numbers = #tpu.dot_dimension_numbers<[1], [0], [0], [1], [0, 0, 1, 1], [], []>} : vector<16x64xbf16>, vector<64x32xbf16>, vector<16x32xf32> -> vector<16x32xf32>
    %c0_16 = arith.constant 0 : index
    %c0_17 = arith.constant 0 : index
    %c0_18 = arith.constant 0 : index
    %29 = vector.load %arg8[%c0_16, %c0_17, %c0_18] : memref<1x1x32xf32, #tpu.memory_space<vmem>>, vector<1x1x32xf32>
    %30 = vector.shape_cast %29 : vector<1x1x32xf32> to vector<1x32xf32>
    %31 = vector.broadcast %30 : vector<1x32xf32> to vector<16x32xf32>
    %32 = arith.addf %28, %31 : vector<16x32xf32>
    %c0_19 = arith.constant 0 : index
    %c0_20 = arith.constant 0 : index
    %33 = vector.load %arg13[%c0_19, %c0_20] : memref<16x1xi32, #tpu.memory_space<vmem>>, vector<16x1xi32>
    %34 = vector.broadcast %arg1 : i32 to vector<16x1xi32>
    %35 = arith.cmpi eq, %33, %34 : vector<16x1xi32>
    %36 = arith.extui %35 : vector<16x1xi1> to vector<16x1xi32>
    %37 = arith.sitofp %36 : vector<16x1xi32> to vector<16x1xf32>
    %c0_21 = arith.constant 0 : index
    %c0_22 = arith.constant 0 : index
    %38 = vector.load %arg14[%c0_21, %c0_22] : memref<16x32xf32, #tpu.memory_space<vmem>>, vector<16x32xf32>
    %39 = vector.broadcast %37 : vector<16x1xf32> to vector<16x32xf32>
    %40 = arith.mulf %32, %39 : vector<16x32xf32>
    %41 = arith.addf %38, %40 : vector<16x32xf32>
    %c0_23 = arith.constant 0 : index
    %c0_24 = arith.constant 0 : index
    %42 = vector.load %arg14[%c0_23, %c0_24] : memref<16x32xf32, #tpu.memory_space<vmem>>, vector<16x32xf32>
    tpu.vector_store %arg14[%c0_23, %c0_24], %41 {strides = array<i32>} : memref<16x32xf32, #tpu.memory_space<vmem>>, vector<16x32xf32>,
    %c1_i32 = arith.constant 1 : i32
    %43 = arith.cmpi eq, %arg1, %c1_i32 : i32
    %44 = arith.extui %43 : i1 to i32
    %c0_i32_25 = arith.constant 0 : i32
    %45 = arith.cmpi ne, %44, %c0_i32_25 : i32
    scf.if %45 {
      %c0_26 = arith.constant 0 : index
      %c0_27 = arith.constant 0 : index
      %46 = vector.load %arg14[%c0_26, %c0_27] : memref<16x32xf32, #tpu.memory_space<vmem>>, vector<16x32xf32>
      %c0_28 = arith.constant 0 : index
      %c0_29 = arith.constant 0 : index
      %47 = vector.load %arg12[%c0_28, %c0_29] : memref<16x1xf32, #tpu.memory_space<vmem>>, vector<16x1xf32>
      %48 = vector.broadcast %47 : vector<16x1xf32> to vector<16x32xf32>
      %49 = arith.mulf %46, %48 : vector<16x32xf32>
      %50 = arith.addf %0, %49 : vector<16x32xf32>
      %c0_30 = arith.constant 0 : index
      %c0_31 = arith.constant 0 : index
      %51 = vector.load %arg9[%c0_30, %c0_31] : memref<1x32xf32, #tpu.memory_space<vmem>>, vector<1x32xf32>
      %c0_32 = arith.constant 0 : index
      %c0_33 = arith.constant 0 : index
      %52 = vector.load %arg10[%c0_32, %c0_33] : memref<1x32xf32, #tpu.memory_space<vmem>>, vector<1x32xf32>
      %cst_34 = arith.constant dense<0.000000e+00> : vector<16xf32>
      %53 = vector.multi_reduction <add>, %50, %cst_34 [1] : vector<16x32xf32> to vector<16xf32>
      %54 = vector.shape_cast %53 : vector<16xf32> to vector<16x1xf32>
      %cst_35 = arith.constant 3.200000e+01 : f32
      %55 = vector.broadcast %cst_35 : f32 to vector<16x1xf32>
      %56 = arith.divf %54, %55 : vector<16x1xf32>
      %57 = vector.broadcast %56 : vector<16x1xf32> to vector<16x32xf32>
      %58 = arith.subf %50, %57 : vector<16x32xf32>
      %59 = arith.mulf %58, %58 : vector<16x32xf32>
      %cst_36 = arith.constant dense<0.000000e+00> : vector<16xf32>
      %60 = vector.multi_reduction <add>, %59, %cst_36 [1] : vector<16x32xf32> to vector<16xf32>
      %61 = vector.shape_cast %60 : vector<16xf32> to vector<16x1xf32>
      %cst_37 = arith.constant 3.200000e+01 : f32
      %62 = vector.broadcast %cst_37 : f32 to vector<16x1xf32>
      %63 = arith.divf %61, %62 : vector<16x1xf32>
      %64 = vector.broadcast %56 : vector<16x1xf32> to vector<16x32xf32>
      %65 = arith.subf %50, %64 : vector<16x32xf32>
      %cst_38 = arith.constant 9.99999996E-13 : f32
      %66 = vector.broadcast %cst_38 : f32 to vector<16x1xf32>
      %67 = arith.addf %63, %66 : vector<16x1xf32>
      %68 = math.rsqrt %67 : vector<16x1xf32>
      %69 = vector.broadcast %68 : vector<16x1xf32> to vector<16x32xf32>
      %70 = arith.mulf %65, %69 : vector<16x32xf32>
      %71 = vector.broadcast %51 : vector<1x32xf32> to vector<16x32xf32>
      %72 = arith.mulf %70, %71 : vector<16x32xf32>
      %73 = vector.broadcast %52 : vector<1x32xf32> to vector<16x32xf32>
      %74 = arith.addf %72, %73 : vector<16x32xf32>
      %c0_39 = arith.constant 0 : index
      %c0_40 = arith.constant 0 : index
      %75 = vector.load %arg11[%c0_39, %c0_40] : memref<16x32xf32, #tpu.memory_space<vmem>>, vector<16x32xf32>
      tpu.vector_store %arg11[%c0_39, %c0_40], %74 {strides = array<i32>} : memref<16x32xf32, #tpu.memory_space<vmem>>, vector<16x32xf32>,
    } else {
    }
    return
  }
  func.func @transform_0(%arg0: i32, %arg1: i32) -> (i32, i32) {
    %c0_i32 = arith.constant 0 : i32
    %c0_i32_0 = arith.constant 0 : i32
    return %arg0, %c0_i32 : i32, i32
  }
  func.func @transform_1(%arg0: i32, %arg1: i32) -> (i32, i32) {
    %c0_i32 = arith.constant 0 : i32
    %c0_i32_0 = arith.constant 0 : i32
    %c0_i32_1 = arith.constant 0 : i32
    return %c0_i32, %c0_i32_0 : i32, i32
  }
  func.func @transform_2(%arg0: i32, %arg1: i32) -> (i32, i32) {
    %c0_i32 = arith.constant 0 : i32
    %c0_i32_0 = arith.constant 0 : i32
    %c0_i32_1 = arith.constant 0 : i32
    return %c0_i32, %c0_i32_0 : i32, i32
  }
  func.func @transform_3(%arg0: i32, %arg1: i32) -> (i32, i32, i32) {
    %c0_i32 = arith.constant 0 : i32
    %c0_i32_0 = arith.constant 0 : i32
    %c0_i32_1 = arith.constant 0 : i32
    return %arg1, %c0_i32, %c0_i32_0 : i32, i32, i32
  }
  func.func @transform_4(%arg0: i32, %arg1: i32) -> (i32, i32, i32) {
    %c0_i32 = arith.constant 0 : i32
    %c0_i32_0 = arith.constant 0 : i32
    %c0_i32_1 = arith.constant 0 : i32
    return %arg1, %c0_i32, %c0_i32_0 : i32, i32, i32
  }
  func.func @transform_5(%arg0: i32, %arg1: i32) -> (i32, i32, i32) {
    %c0_i32 = arith.constant 0 : i32
    %c0_i32_0 = arith.constant 0 : i32
    %c0_i32_1 = arith.constant 0 : i32
    return %arg1, %c0_i32, %c0_i32_0 : i32, i32, i32
  }
  func.func @transform_6(%arg0: i32, %arg1: i32) -> (i32, i32, i32) {
    %c0_i32 = arith.constant 0 : i32
    %c0_i32_0 = arith.constant 0 : i32
    %c0_i32_1 = arith.constant 0 : i32
    return %arg1, %c0_i32, %c0_i32_0 : i32, i32, i32
  }
  func.func @transform_7(%arg0: i32, %arg1: i32) -> (i32, i32) {
    %c0_i32 = arith.constant 0 : i32
    %c0_i32_0 = arith.constant 0 : i32
    %c0_i32_1 = arith.constant 0 : i32
    return %c0_i32, %c0_i32_0 : i32, i32
  }
  func.func @transform_8(%arg0: i32, %arg1: i32) -> (i32, i32) {
    %c0_i32 = arith.constant 0 : i32
    %c0_i32_0 = arith.constant 0 : i32
    %c0_i32_1 = arith.constant 0 : i32
    return %c0_i32, %c0_i32_0 : i32, i32
  }
  func.func @transform_9(%arg0: i32, %arg1: i32) -> (i32, i32) {
    %c0_i32 = arith.constant 0 : i32
    %c0_i32_0 = arith.constant 0 : i32
    return %arg0, %c0_i32 : i32, i32
  }
}

</mosaic_0001>

<bundles_post_ra>
// kernel: _lambda_.10
= control target key start
LH: loop header
LB: loop body
LE: loop exit
PB: predicated region body
PF: predicated region fallthrough
CT: control target
= control target key end

     0   :  { %vm18_vm0 = vcmask 261120   ;;  %s118_s0 = inlined_call_operand.vmem [shape: f32[16,32], index: 0, kind: input, shape index: {}]   ;;  %s119_s1 = inlined_call_operand.vmem [shape: f32[1,32], index: 1, kind: input, shape index: {}]   ;;  %s120_s2 = inlined_call_operand.vmem [shape: f32[1,32], index: 2, kind: input, shape index: {}]   ;;  %s121_s3 = inlined_call_operand.vmem [shape: f32[16,32], index: 3, kind: output, shape index: {}]  }
   0x1   :  { %v14_v0 = vld [vmem:[%s118_s0] sm:$0xff]  ;;  %v15_v1 = vld [vmem:[%s118_s0 + $0x8] sm:$0xff] }
   0x2   :  { %v19_v2 = vsel %vm18_vm0, %v14_v0, 0.0  ;;  %v22_v3 = vsel %vm18_vm0, %v15_v1, 0.0  ;;  %v68_v21 = vld [vmem:[%s119_s1] ss:$0 sm:$0xff] }
   0x3   :  { %20 = vadd.xlane.f32.xlu0 %v19_v2  ;;  %v69_v23 = vld [vmem:[%s120_s2] ss:$0 sm:$0xff] }
   0x7   :  { %23 = vadd.xlane.f32.xlu0 %v22_v3 }
  0x90   :  { %v21_v4 = vpop.xlane.xlu0 %20 }
  0x91   :  { %v26_v5 = vmul.f32 0.03125, %v21_v4 }
  0x93   :  { %v28_v6 = vsub.f32 %v14_v0, %v26_v5 }
  0x94   :  { %v24_v7 = vpop.xlane.xlu0 %23 }
  0x95   :  { %v27_v8 = vmul.f32 0.03125, %v24_v7  ;;  %v30_v9 = vmul.f32 %v28_v6, %v28_v6 }
  0x97   :  { %v29_v10 = vsub.f32 %v15_v1, %v27_v8  ;;  %v32_v11 = vsel %vm18_vm0, %v30_v9, 0.0 }
  0x98   :  { %33 = vadd.xlane.f32.xlu1 %v32_v11 }
  0x99   :  { %v31_v12 = vmul.f32 %v29_v10, %v29_v10 }
  0x9b   :  { %v35_v13 = vsel %vm18_vm0, %v31_v12, 0.0 }
  0x9c   :  { %36 = vadd.xlane.f32.xlu1 %v35_v13 }
 0x125   :  { %v34_v14 = vpop.xlane.xlu1 %33 }
 0x126   :  { %v38_v15 = vmul.f32 0.03125, %v34_v14 }
 0x128   :  { %v40_v16 = vadd.f32 1e-12, %v38_v15 }
 0x129   :  { %v37_v17 = vpop.xlane.xlu1 %36 }
 0x12a   :  { %70 = vrsqrt.f32 %v40_v16  ;;  %v39_v18 = vmul.f32 0.03125, %v37_v17 }
 0x12c   :  { %v41_v19 = vadd.f32 1e-12, %v39_v18 }
 0x12e   :  { %72 = vrsqrt.f32 %v41_v19 }
 0x134   :  { %v71_v20 = vpop.eup %70 }
 0x135   :  { %v44_v22 = vmul.f32 %v71_v20, %v28_v6 }
 0x137   :  { %v52_v24 = vmul.f32 %v68_v21, %v44_v22 }
 0x138   :  { %v73_v25 = vpop.eup %72 }
 0x139   :  { %v60_v26 = vadd.f32 %v69_v23, %v52_v24  ;;  %v45_v27 = vmul.f32 %v73_v25, %v29_v10 }
 0x13b   :  { %62 = vst.msk [vmem:[%s121_s3] sm:$0xff] %vm18_vm0, %v60_v26  ;;  %v53_v28 = vmul.f32 %v68_v21, %v45_v27 }
 0x13d   :  { %v61_v29 = vadd.f32 %v69_v23, %v53_v28 }
 0x13f   :  { %63 = vst.msk [vmem:[%s121_s3 + $0x8] sm:$0xff] %vm18_vm0, %v61_v29 }

// kernel: _lambda_.12
= control target key start
LH: loop header
LB: loop body
LE: loop exit
PB: predicated region body
PF: predicated region fallthrough
CT: control target
= control target key end

     0   :  { %v312_v0 = vmov 0.0   ;;  %vm313_vm0 = vmmov 0   ;;  %vm53_vm1 = vcmask 261120   ;;  %vm149_vm2 = vcmask 523264   ;;  %s403_s1 = inlined_call_operand.vmem [shape: bf16[32,64], index: 1, kind: input, shape index: {}]   ;;  %s404_s0 = inlined_call_operand.vmem [shape: f32[16,32], index: 0, kind: input, shape index: {}]   ;;  %s405_s3 = inlined_call_operand.vmem [shape: bf16[64,32], index: 3, kind: input, shape index: {}]   ;;  %s406_s2 = inlined_call_operand.vmem [shape: f32[1,64], index: 2, kind: input, shape index: {}]   ;;  %s407_s4 = inlined_call_operand.vmem [shape: f32[1,32], index: 4, kind: input, shape index: {}]   ;;  %s408_s5 = inlined_call_operand.vmem [shape: f32[1,32], index: 5, kind: input, shape index: {}]   ;;  %s409_s6 = inlined_call_operand.vmem [shape: f32[1,32], index: 6, kind: input, shape index: {}]   ;;  %s410_s7 = inlined_call_operand.vmem [shape: f32[16,32], index: 7, kind: output, shape index: {}]  }
   0x1   :  { %276 = vmatprep.subr.bf16.mxu0 %v312_v0  ;;  %v298_v1 = vld [vmem:[%s403_s1] sm:$0xff]   ;;  %280 = vmatprep.mubr.msk.bf16.mxu0 %vm313_vm0, %v312_v0  ;;  %v299_v2 = vld [vmem:[%s403_s1 + $0x8] sm:$0xff]   ;;  %v302_v8 = vld [vmem:[%s405_s3 + $0x10] sm:$0xff]  }
   0x2   :  { %284 = vmatprep.subr.bf16.mxu1 %v312_v0  ;;  %292 = vmatprep.mubr.msk.bf16.mxu1 %vm313_vm0, %v312_v0  ;;  %v27_v3 = vld [vmem:[%s404_s0] sm:$0xff]  ;;  %v28_v4 = vld [vmem:[%s404_s0 + $0x8] sm:$0xff]  ;;  %v303_v9 = vld [vmem:[%s405_s3 + $0x18] sm:$0xff]  }
   0x3   :  { %277 = vmatpush3.bf16.msra.mxu0 %v298_v1  ;;  %v29_v5 = vpack.c.bf16 %v28_v4, %v27_v3  ;;  %v300_v6 = vld [vmem:[%s405_s3] sm:$0xff]   ;;  %v301_v7 = vld [vmem:[%s405_s3 + $0x8] sm:$0xff]  }
   0x4   :  { %278 = vmatprep.subr.bf16.mxu0 %v312_v0  ;;  %285 = vmatpush3.bf16.msra.mxu1 %v300_v6  ;;  %v256_v10 = vld [vmem:[%s406_s2] ss:$0 sm:$0xff] }
   0x5   :  { %286 = vmatprep.subr.bf16.mxu1 %v312_v0  ;;  %v265_v37 = vld [vmem:[%s407_s4] ss:$0 sm:$0xff] }
   0x7   :  { %279 = vmatpush3.bf16.msra.mxu0 %v299_v2  ;;  %v267_v2 = vld [vmem:[%s409_s6] ss:$0 sm:$0xff] }
   0x8   :  { %287 = vmatpush3.bf16.msra.mxu1 %v301_v7 }
   0x9   :  { %288 = vmatprep.subr.bf16.mxu1 %v312_v0 }
   0xa   :  { %281 = vmatmul.mubr.msk.bf16.vlgmr.msra.gmra.mrb[0].mxu0 %vm53_vm1, %v29_v5 }
   0xc   :  { %289 = vmatpush3.bf16.msra.mxu1 %v302_v8 }
   0xd   :  { %290 = vmatprep.subr.bf16.mxu1 %v312_v0  ;;  %v266_v0 = vld [vmem:[%s408_s5] ss:$0 sm:$0xff] }
  0x10   :  { %291 = vmatpush3.bf16.msra.mxu1 %v303_v9 }
  0xdd   :  { %v91_v11 = vpop.f32.mrb[0].mxu0 }
  0xde   :  { %v92_v12 = vadd.f32 %v256_v10, %v91_v11  ;;  %v282_v13 = vpop.f32.mrb[1].mxu0 }
  0xdf   :  { %v94_v14 = vpop.f32.mrb[2].mxu0 }
  0xe0   :  { %v98_v15 = vmul.f32 %v92_v12, %v92_v12  ;;  %v95_v16 = vadd.f32 %v256_v10, %v94_v14  ;;  %v283_v17 = vpop.f32.mrb[3].mxu0 }
  0xe2   :  { %v100_v18 = vmul.f32 %v98_v15, %v92_v12  ;;  %v99_v19 = vmul.f32 %v95_v16, %v95_v16 }
  0xe4   :  { %v102_v20 = vmul.f32 0.044715, %v100_v18  ;;  %v101_v21 = vmul.f32 %v99_v19, %v95_v16 }
  0xe6   :  { %v104_v22 = vadd.f32 %v102_v20, %v92_v12  ;;  %v103_v23 = vmul.f32 0.044715, %v101_v21 }
  0xe8   :  { %v106_v24 = vmul.f32 0.7978846, %v104_v22  ;;  %v105_v25 = vadd.f32 %v103_v23, %v95_v16 }
  0xea   :  { %304 = vtanh.f32 %v106_v24  ;;  %v107_v26 = vmul.f32 0.7978846, %v105_v25 }
  0xec   :  { %306 = vtanh.f32 %v107_v26 }
  0xf4   :  { %v305_v27 = vpop.eup %304 }
  0xf5   :  { %v110_v28 = vadd.f32 1.0, %v305_v27 }
  0xf6   :  { %v307_v29 = vpop.eup %306 }
  0xf7   :  { %v112_v30 = vmul.f32 0.5, %v110_v28  ;;  %v111_v31 = vadd.f32 1.0, %v307_v29 }
  0xf9   :  { %v113_v32 = vmul.f32 0.5, %v111_v31  ;;  %v114_v33 = vmul.f32 %v112_v30, %v92_v12 }
  0xfb   :  { %v115_v34 = vmul.f32 %v113_v32, %v95_v16 }
  0xfd   :  { %v116_v35 = vpack.c.bf16 %v115_v34, %v114_v33 }
  0xff   :  { %293 = vmatmul.mubr.msk.bf16.vlgmr.msra.gmra.mrb[0].mxu1 %vm149_vm2, %v116_v35 }
 0x1d2   :  { %v187_v36 = vpop.f32.mrb[0].mxu1 }
 0x1d3   :  { %v194_v38 = vadd.f32 %v187_v36, %v27_v3  ;;  %v294_v39 = vpop.f32.mrb[1].mxu1 }
 0x1d4   :  { %v190_v40 = vpop.f32.mrb[2].mxu1 }
 0x1d5   :  { %v195_v41 = vadd.f32 %v190_v40, %v28_v4  ;;  %v295_v42 = vpop.f32.mrb[3].mxu1  ;;  %v203_v43 = vadd.f32 %v265_v37, %v194_v38 }
 0x1d7   :  { %v207_v44 = vsel %vm53_vm1, %v203_v43, 0.0  ;;  %v204_v45 = vadd.f32 %v265_v37, %v195_v41 }
 0x1d8   :  { %208 = vadd.xlane.f32.xlu0 %v207_v44 }
 0x1d9   :  { %v210_v46 = vsel %vm53_vm1, %v204_v45, 0.0 }
 0x1dc   :  { %211 = vadd.xlane.f32.xlu0 %v210_v46 }
 0x265   :  { %v209_v47 = vpop.xlane.xlu0 %208 }
 0x266   :  { %v214_v48 = vmul.f32 0.03125, %v209_v47 }
 0x268   :  { %v216_v49 = vsub.f32 %v203_v43, %v214_v48 }
 0x269   :  { %v212_v50 = vpop.xlane.xlu0 %211 }
 0x26a   :  { %v215_v51 = vmul.f32 0.03125, %v212_v50  ;;  %v218_v52 = vmul.f32 %v216_v49, %v216_v49 }
 0x26c   :  { %v217_v53 = vsub.f32 %v204_v45, %v215_v51  ;;  %v220_v54 = vsel %vm53_vm1, %v218_v52, 0.0 }
 0x26d   :  { %221 = vadd.xlane.f32.xlu1 %v220_v54 }
 0x26e   :  { %v219_v55 = vmul.f32 %v217_v53, %v217_v53 }
 0x270   :  { %v223_v56 = vsel %vm53_vm1, %v219_v55, 0.0 }
 0x271   :  { %224 = vadd.xlane.f32.xlu1 %v223_v56 }
 0x2fa   :  { %v222_v57 = vpop.xlane.xlu1 %221 }
 0x2fb   :  { %v226_v58 = vmul.f32 0.03125, %v222_v57 }
 0x2fd   :  { %v228_v59 = vadd.f32 1e-12, %v226_v58 }
 0x2fe   :  { %v225_v60 = vpop.xlane.xlu1 %224 }
 0x2ff   :  { %308 = vrsqrt.f32 %v228_v59  ;;  %v227_v61 = vmul.f32 0.03125, %v225_v60 }
 0x301   :  { %v229_v62 = vadd.f32 1e-12, %v227_v61 }
 0x303   :  { %310 = vrsqrt.f32 %v229_v62 }
 0x309   :  { %v309_v63 = vpop.eup %308 }
 0x30a   :  { %v232_v1 = vmul.f32 %v309_v63, %v216_v49 }
 0x30c   :  { %v240_v3 = vmul.f32 %v266_v0, %v232_v1 }
 0x30d   :  { %v311_v4 = vpop.eup %310 }
 0x30e   :  { %v248_v5 = vadd.f32 %v267_v2, %v240_v3  ;;  %v233_v6 = vmul.f32 %v311_v4, %v217_v53 }
 0x310   :  { %250 = vst.msk [vmem:[%s410_s7] sm:$0xff] %vm53_vm1, %v248_v5  ;;  %v241_v7 = vmul.f32 %v266_v0, %v233_v6 }
 0x312   :  { %v249_v8 = vadd.f32 %v267_v2, %v241_v7 }
 0x314   :  { %251 = vst.msk [vmem:[%s410_s7 + $0x8] sm:$0xff] %vm53_vm1, %v249_v8 }

// kernel: _lambda_.11
= control target key start
LH: loop header
LB: loop body
LE: loop exit
PB: predicated region body
PF: predicated region fallthrough
CT: control target
= control target key end

     0   :  { %s1539_s17 = smov 0   ;;  %s1541_s18 = smov 0   ;;  %s1702_s0 = inlined_call_operand.vmem [shape: f32[2,8,32], index: 0, kind: input, shape index: {}, may-alias: {0,1}]   ;;  %s1703_s1 = inlined_call_operand.vmem [shape: f32[2,8,32], index: 1, kind: input, shape index: {}, may-alias: {0,1}]   ;;  %s1704_s2 = inlined_call_operand.vmem [shape: f32[2,1,8], index: 2, kind: input, shape index: {}]   ;;  %s1705_s3 = inlined_call_operand.vmem [shape: bf16[32,32], index: 3, kind: input, shape index: {}]   ;;  %s1706_s4 = inlined_call_operand.vmem [shape: f32[1,32], index: 4, kind: input, shape index: {}]   ;;  %s1707_s5 = inlined_call_operand.vmem [shape: bf16[32,64], index: 5, kind: input, shape index: {}]   ;;  %s1708_s6 = inlined_call_operand.vmem [shape: f32[1,64], index: 6, kind: input, shape index: {}]   ;;  %s1709_s7 = inlined_call_operand.vmem [shape: bf16[32,32], index: 7, kind: input, shape index: {}]   ;;  %s1710_s8 = inlined_call_operand.vmem [shape: f32[1,32], index: 8, kind: input, shape index: {}]   ;;  %s1711_s9 = inlined_call_operand.vmem [shape: f32[1,32], index: 9, kind: input, shape index: {}]   ;;  %s1712_s10 = inlined_call_operand.vmem [shape: f32[1,32], index: 10, kind: input, shape index: {}]   ;;  %s1713_s11 = inlined_call_operand.vmem [shape: f32[2,8,32], index: 11, kind: output, shape index: {}]  }
   0x1   :  { %s1543_s19 = smov 0  }
   0x2 LB: > { %s33_s20 = sadd.s32 1, %s1461_s18  ;;  %p1257_p0 = scmp.ge.s32.totalorder %s1465_s19, 1  ;;  %s1465_s19 = sphi %s1543_s19, %s21_s19   ;;  %s1461_s18 = sphi %s1541_s18, %s1715_s18   ;;  %s1457_s17 = sphi %s1539_s17, %s1714_s17  }
   0x3   : > { %p35_p1 = scmp.ge.s32.totalorder %s33_s20, 2  ;;  %p372_p2 = scmp.lt.s32.totalorder %s1465_s19, 3 }
   0x5   : > { %s1717_s20 = smov (%p35_p1, %s33_s20), 0  ;;  %p373_p3 = pnand %p1257_p0, %p372_p2 }
   0x6   : > { %v1419_v0 = vld [vmem:[%s1707_s5] sm:$0xff] (!%p373_p3)   ;;  %v1467_v1 = vmov (!%p373_p3), 0.0   ;;  %v1421_v3 = vld [vmem:[%s1707_s5 + $0x8] sm:$0xff] (!%p373_p3)   ;;  %vm1468_vm0 = vmmov (!%p373_p3), 0   ;;  %p423_p4 = scmp.lt.s32.totalorder (!%p373_p3), %s1457_s17, 1  ;;  %vm473_vm1 = vcmask (!%p373_p3), 261120  }
   0x7   : > { %376 = sbr.rel (%p373_p3) target bundleno = 1783 (0x6f7), region = 64  ;;  %1319 = vmatprep.subr.bf16.mxu1 (!%p373_p3), %v1467_v1  ;;  %1311 = vmatprep.subr.bf16.mxu0 (!%p373_p3), %v1467_v1  ;;  %v1420_v2 = vld [vmem:[%s1705_s3] sm:$0xff] (!%p373_p3)   ;;  %v1422_v4 = vld [vmem:[%s1705_s3 + $0x8] sm:$0xff] (!%p373_p3)   ;;  %vm585_vm2 = vcmask (!%p373_p3), 64512   ;;  %s1469_s25 = smov (!%p373_p3), 112   ;;  %vm658_vm3 = vcmask (!%p373_p3), 1043456  }
   0x8   : > { %1320 = vmatpush3.bf16.msra.mxu1 (!%p373_p3), %v1419_v0  ;;  %1323 = vmatprep.mubr.msk.bf16.mxu1 (!%p373_p3), %vm1468_vm0, %v1467_v1  ;;  %v1265_v9 = vld [vmem:[%s1708_s6] ss:$0 sm:$0xff] (!%p373_p3)  ;;  %s1470_s26 = smov (!%p373_p3), 120   ;;  %s1471_s27 = smov (!%p373_p3), 104   ;;  %vm820_vm4 = vcmask (!%p373_p3), 130112   ;;  %vm938_vm5 = vcmask (!%p373_p3), 195712  }
   0x9   : > { %1321 = vmatprep.subr.bf16.mxu1 (!%p373_p3), %v1467_v1  ;;  %1312 = vmatpush3.bf16.msra.mxu0 (!%p373_p3), %v1420_v2  ;;  %v1261_v10 = vld [vmem:[%s1706_s4] ss:$0 sm:$0xff] (!%p373_p3)  ;;  %s1474_s14 = smov (!%p373_p3), 72   ;;  %s1475_s15 = smov (!%p373_p3), 88   ;;  %vm1056_vm6 = vcmask (!%p373_p3), 261312  }
   0xa   : > { %1313 = vmatprep.subr.bf16.mxu0 (!%p373_p3), %v1467_v1  ;;  %1315 = vmatprep.mubr.msk.bf16.mxu0 (!%p373_p3), %vm1468_vm0, %v1467_v1 }
   0xc   : > { %1322 = vmatpush3.bf16.msra.mxu1 (!%p373_p3), %v1421_v3 }
   0xd   : > { %1314 = vmatpush3.bf16.msra.mxu0 (!%p373_p3), %v1422_v4  ;;  %1333 = vmatprep.subr.bf16.mxu1 (!%p373_p3), %v1467_v1 }
   0xe   : > { %s1719_s17 = smov (!%p423_p4, %s1457_s17), 1  ;;  %1327 = vmatprep.subr.bf16.mxu0 %v1467_v1 }
   0xf   : > { %s1580_s29 = sshll.u32 %s1719_s17, 3  ;;  %s436_s12 = scalar_lea.vmem %s1704_s2, %s1719_s17 }
  0x10   : > { %s433_s13 = scalar_lea.vmem %s1703_s1, %s1580_s29  ;;  %s429_s16 = scalar_lea.vmem %s1702_s0, %s1580_s29  ;;  %v1270_v34 = vld [vmem:[%s436_s12] ss:$0 sm:$0xff] }
  0x11   : > { %v446_v5 = vld [vmem:[%s433_s13] sm:$0xff]  ;;  %s1472_s17 = smov 96   ;;  %s1473_s13 = smov 80  }
  0x12   : > { %v449_v6 = vpack.c.bf16 %v446_v5, %v446_v5  ;;  %v1592_v7 = vld [vmem:[%s429_s16] sm:$0xff]  ;;  %s1476_s16 = smov 8  }
  0x13   : > { %v448_v8 = vpack.c.bf16 %v1592_v7, %v1592_v7 }
  0x14   : > { %1324 = vmatmul.mubr.msk.bf16.vlgmr.msra.gmra.mrb[0].mxu1 %vm473_vm1, %v449_v6 }
  0x15   : > { %1316 = vmatmul.mubr.msk.bf16.vlgmr.msra.gmra.mrb[0].mxu0 %vm473_vm1, %v448_v8  ;;  %1335 = vmatprep.mubr.msk.bf16.mxu1 %vm1468_vm0, %v1467_v1 }
  0x16   : > { %1329 = vmatprep.mubr.msk.bf16.mxu0 %vm1468_vm0, %v1467_v1 }
  0xe7   : > { %v577_v11 = vpop.f32.mrb[0].mxu1 }
  0xe8   : > { %v578_v12 = vadd.f32 %v1265_v9, %v577_v11  ;;  %v1325_v13 = vpop.f32.mrb[1].mxu1  ;;  %v511_v14 = vpop.f32.mrb[0].mxu0 }
  0xe9   : > { %v580_v15 = vpop.f32.mrb[2].mxu1  ;;  %v512_v16 = vadd.f32 %v1261_v10, %v511_v14  ;;  %v1317_v17 = vpop.f32.mrb[1].mxu0 }
  0xea   : > { %v1608_v18 = vpack.c.bf16 %v578_v12, %v578_v12  ;;  %v1326_v19 = vpop.f32.mrb[3].mxu1  ;;  %v514_v20 = vpop.f32.mrb[2].mxu0 }
  0xeb   : > { %v1318_v21 = vpop.f32.mrb[3].mxu0  ;;  %v583_v22 = vpack.c.bf16 %v512_v16, %v512_v16 }
  0xec   : > { %824 = vrot.lane.b32.xlu1 %v1608_v18, %s1469_s25  ;;  %706 = vrot.lane.b32.xlu0 %v1608_v18, %s1470_s26  ;;  %v590_v23 = vsel %vm585_vm2, %v1608_v18, 0 }
  0xed   : > { %1328 = vmatpush3.bf16.xpose.msra.mxu0 %v590_v23 }
  0xee   : > { %1339 = vmatprep.subr.bf16.mxu0 %v1467_v1 }
  0xf0   : > { %822 = vrot.lane.b32.xlu1 %v583_v22, %s1469_s25  ;;  %704 = vrot.lane.b32.xlu0 %v583_v22, %s1470_s26  ;;  %s1477_s25 = smov 16   ;;  %s1478_s26 = smov 24  }
  0xf4   : > { %940 = vrot.lane.b32.xlu1 %v583_v22, %s1471_s27  ;;  %942 = vrot.lane.b32.xlu0 %v1608_v18, %s1471_s27 }
  0xf5   : > { %1330 = vmatmul.mubr.msk.bf16.vlgmr.msra.gmra.mrb[4].mxu0 %vm585_vm2, %v583_v22 }
  0xf6   : > { %1341 = vmatprep.mubr.msk.bf16.mxu0 %vm1468_vm0, %v1467_v1 }
 0x15e   : > { %v707_v24 = vpop.permute.xlu0 %706  ;;  %v825_v26 = vpop.permute.xlu1 %824 }
 0x15f   : > { %v712_v25 = vsel %vm585_vm2, %v707_v24, 0  ;;  %v830_v28 = vsel %vm585_vm2, %v825_v26, 0 }
 0x160   : > { %1340 = vmatpush3.bf16.xpose.msra.mxu0 %v712_v25 }
 0x161   : > { %1351 = vmatprep.subr.bf16.mxu0 %v1467_v1 }
 0x162   : > { %v705_v27 = vpop.permute.xlu0 %704  ;;  %v823_v30 = vpop.permute.xlu1 %822 }
 0x166   : > { %v943_v29 = vpop.permute.xlu0 %942  ;;  %v941_v32 = vpop.permute.xlu1 %940 }
 0x167   : > { %1342 = vmatmul.mubr.msk.bf16.vlgmr.msra.gmra.mrb[8].mxu0 %vm585_vm2, %v705_v27  ;;  %v948_v31 = vsel %vm585_vm2, %v943_v29, 0 }
 0x168   : > { %1352 = vmatpush3.bf16.xpose.msra.mxu0 %v830_v28  ;;  %1353 = vmatprep.mubr.msk.bf16.mxu0 %vm1468_vm0, %v1467_v1 }
 0x169   : > { %1363 = vmatprep.subr.bf16.mxu0 %v1467_v1 }
 0x16f   : > { %1354 = vmatmul.mubr.msk.bf16.vlgmr.msra.gmra.mrb[12].mxu0 %vm585_vm2, %v823_v30 }
 0x170   : > { %1364 = vmatpush3.bf16.xpose.msra.mxu0 %v948_v31  ;;  %1365 = vmatprep.mubr.msk.bf16.mxu0 %vm1468_vm0, %v1467_v1 }
 0x171   : > { %1375 = vmatprep.subr.bf16.mxu0 %v1467_v1 }
 0x177   : > { %1366 = vmatmul.mubr.msk.bf16.vlgmr.msra.gmra.mrb[16].mxu0 %vm585_vm2, %v941_v32 }
 0x178   : > { %1379 = vmatprep.mubr.msk.bf16.mxu0 %vm1468_vm0, %v1467_v1 }
 0x1c8   : > { %v626_v33 = vpop.f32.mrb[4].mxu0 }
 0x1c9   : > { %v632_v35 = vmul.f32 0.35355338, %v626_v33  ;;  %v1331_v36 = vpop.f32.mrb[5].mxu0 }
 0x1ca   : > { %v629_v37 = vpop.f32.mrb[6].mxu0 }
 0x1cb   : > { %v1332_v38 = vpop.f32.mrb[7].mxu0  ;;  %v639_v39 = vadd.f32 %v1270_v34, %v632_v35 }
 0x1cd   : > { %v640_v40 = vsel %vm585_vm2, %v639_v39, -inf }
 0x1ce   : > { %641 = vmax.xlane.f32.xlu0 %v640_v40 }
 0x23a   : > { %v748_v41 = vpop.f32.mrb[8].mxu0 }
 0x23b   : > { %v754_v42 = vmul.f32 0.35355338, %v748_v41  ;;  %v1343_v43 = vpop.f32.mrb[9].mxu0 }
 0x23c   : > { %v751_v44 = vpop.f32.mrb[10].mxu0 }
 0x23d   : > { %v1344_v45 = vpop.f32.mrb[11].mxu0  ;;  %v755_v46 = vadd.f32 %v1270_v34, %v754_v42 }
 0x23f   : > { %v756_v47 = vsel %vm585_vm2, %v755_v46, -inf }
 0x240   : > { %757 = vmax.xlane.f32.xlu1 %v756_v47 }
 0x242   : > { %v866_v48 = vpop.f32.mrb[12].mxu0 }
 0x243   : > { %v872_v49 = vmul.f32 0.35355338, %v866_v48  ;;  %v1355_v50 = vpop.f32.mrb[13].mxu0 }
 0x244   : > { %v869_v51 = vpop.f32.mrb[14].mxu0 }
 0x245   : > { %v1356_v52 = vpop.f32.mrb[15].mxu0  ;;  %v873_v53 = vadd.f32 %v1270_v34, %v872_v49 }
 0x246   : > { %v1423_v52 = vld [vmem:[%s1709_s7] sm:$0xff]  }
 0x247   : > { %v874_v54 = vsel %vm585_vm2, %v873_v53, -inf  ;;  %1376 = vmatpush3.bf16.msra.mxu0 %v1423_v52 }
 0x248   : > { %875 = vmax.xlane.f32.xlu0 %v874_v54  ;;  %1377 = vmatprep.subr.bf16.mxu0 %v1467_v1 }
 0x24a   : > { %v984_v55 = vpop.f32.mrb[16].mxu0 }
 0x24b   : > { %v990_v56 = vmul.f32 0.35355338, %v984_v55  ;;  %v1367_v57 = vpop.f32.mrb[17].mxu0 }
 0x24c   : > { %v987_v58 = vpop.f32.mrb[18].mxu0 }
 0x24d   : > { %v1368_v59 = vpop.f32.mrb[19].mxu0  ;;  %v991_v60 = vadd.f32 %v1270_v34, %v990_v56 }
 0x24f   : > { %v992_v61 = vsel %vm585_vm2, %v991_v60, -inf }
 0x250   : > { %993 = vmax.xlane.f32.xlu0 %v992_v61 }
 0x25b   : > { %v642_v62 = vpop.xlane.xlu0 %641 }
 0x25c   : > { %v643_v63 = vsub.f32 %v639_v39, %v642_v62 }
 0x25e   : > { %v644_v0 = vmul.f32 1.442695, %v643_v63 }
 0x260   : > { %1425 = vpow2.f32 %v644_v0 }
 0x26a   : > { %v1426_v2 = vpop.eup %1425 }
 0x26b   : > { %v646_v3 = vsel %vm585_vm2, %v1426_v2, 0.0 }
 0x26c   : > { %647 = vadd.xlane.f32.xlu1 %v646_v3  ;;  %v1278_v3 = vld [vmem:[%s1710_s8] ss:$0 sm:$0xff] }
 0x27d   : > { %653 = vrot.lane.b32.xlu1 %v1608_v18, %s1472_s17 }
 0x2cd   : > { %v758_v4 = vpop.xlane.xlu1 %757 }
 0x2ce   : > { %v759_v5 = vsub.f32 %v755_v46, %v758_v4 }
 0x2d0   : > { %v760_v6 = vmul.f32 1.442695, %v759_v5 }
 0x2d2   : > { %1427 = vpow2.f32 %v760_v6 }
 0x2d5   : > { %v876_v8 = vpop.xlane.xlu0 %875 }
 0x2d6   : > { %v877_v9 = vsub.f32 %v873_v53, %v876_v8  ;;  %v1424_v53 = vld [vmem:[%s1709_s7 + $0x8] sm:$0xff]  }
 0x2d7   : > { %1378 = vmatpush3.bf16.msra.mxu0 %v1424_v53 }
 0x2d8   : > { %v878_v10 = vmul.f32 1.442695, %v877_v9 }
 0x2da   : > { %1429 = vpow2.f32 %v878_v10 }
 0x2dc   : > { %v1428_v11 = vpop.eup %1427 }
 0x2dd   : > { %v994_v12 = vpop.xlane.xlu0 %993  ;;  %v762_v13 = vsel %vm585_vm2, %v1428_v11, 0.0 }
 0x2de   : > { %v995_v14 = vsub.f32 %v991_v60, %v994_v12  ;;  %763 = vadd.xlane.f32.xlu0 %v762_v13 }
 0x2e0   : > { %v996_v15 = vmul.f32 1.442695, %v995_v14 }
 0x2e2   : > { %1431 = vpow2.f32 %v996_v15 }
 0x2e4   : > { %v1430_v16 = vpop.eup %1429 }
 0x2e5   : > { %v880_v17 = vsel %vm585_vm2, %v1430_v16, 0.0 }
 0x2e6   : > { %881 = vadd.xlane.f32.xlu1 %v880_v17 }
 0x2ec   : > { %v1432_v19 = vpop.eup %1431 }
 0x2ed   : > { %v998_v20 = vsel %vm585_vm2, %v1432_v19, 0.0 }
 0x2ee   : > { %999 = vadd.xlane.f32.xlu0 %v998_v20 }
 0x2f7   : > { %886 = vrot.lane.b32.xlu1 %v1608_v18, %s1473_s13 }
 0x2f9   : > { %v648_v21 = vpop.xlane.xlu1 %647 }
 0x2fa   : > { %1433 = vrcp.f32 %v648_v21 }
 0x2fb   : > { %1004 = vrot.lane.b32.xlu1 %v1608_v18, %s1474_s14 }
 0x2fd   : > { %v654_v22 = vpop.permute.xlu1 %653 }
 0x2fe   : > { %v660_v23 = vsel %vm658_vm3, %v654_v22, 0 }
 0x2ff   : > { %1334 = vmatpush3.bf16.msra.mxu1 %v660_v23  ;;  %v1283_v23 = vld [vmem:[%s1712_s10] ss:$0 sm:$0xff] }
 0x300   : > { %1345 = vmatprep.subr.bf16.mxu1 %v1467_v1 }
 0x304   : > { %v1434_v24 = vpop.eup %1433  ;;  %768 = vrot.lane.b32.xlu0 %v1608_v18, %s1475_s15 }
 0x305   : > { %v650_v25 = vmul.f32 %v1434_v24, %v1426_v2 }
 0x307   : > { %v651_v26 = vpack.c.bf16 %v650_v25, %v650_v25 }
 0x309   : > { %1336 = vmatmul.mubr.msk.bf16.vlgmr.msra.gmra.mrb[4].mxu1 %vm585_vm2, %v651_v26 }
 0x30a   : > { %1347 = vmatprep.mubr.msk.bf16.mxu1 %vm1468_vm0, %v1467_v1 }
 0x36b   : > { %v764_v27 = vpop.xlane.xlu0 %763 }
 0x36c   : > { %1435 = vrcp.f32 %v764_v27 }
 0x373   : > { %v882_v28 = vpop.xlane.xlu1 %881 }
 0x374   : > { %1437 = vrcp.f32 %v882_v28 }
 0x376   : > { %v1436_v29 = vpop.eup %1435 }
 0x377   : > { %v766_v31 = vmul.f32 %v1436_v29, %v1428_v11  ;;  %v887_v34 = vpop.permute.xlu1 %886 }
 0x378   : > { %v892_v36 = vsel %vm658_vm3, %v887_v34, 0 }
 0x379   : > { %v767_v18 = vpack.c.bf16 %v766_v31, %v766_v31 }
 0x37b   : > { %v1000_v30 = vpop.xlane.xlu0 %999  ;;  %v1005_v38 = vpop.permute.xlu1 %1004 }
 0x37c   : > { %1439 = vrcp.f32 %v1000_v30  ;;  %v1010_v41 = vsel %vm658_vm3, %v1005_v38, 0 }
 0x37e   : > { %v1438_v35 = vpop.eup %1437 }
 0x37f   : > { %v769_v32 = vpop.permute.xlu0 %768  ;;  %v884_v37 = vmul.f32 %v1438_v35, %v1430_v16 }
 0x380   : > { %v774_v33 = vsel %vm658_vm3, %v769_v32, 0 }
 0x381   : > { %1346 = vmatpush3.bf16.msra.mxu1 %v774_v33  ;;  %v885_v39 = vpack.c.bf16 %v884_v37, %v884_v37 }
 0x382   : > { %1357 = vmatprep.subr.bf16.mxu1 %v1467_v1 }
 0x384   : > { %1348 = vmatmul.mubr.msk.bf16.vlgmr.msra.gmra.mrb[8].mxu1 %vm585_vm2, %v767_v18 }
 0x385   : > { %1358 = vmatpush3.bf16.msra.mxu1 %v892_v36  ;;  %1359 = vmatprep.mubr.msk.bf16.mxu1 %vm1468_vm0, %v1467_v1 }
 0x386   : > { %1369 = vmatprep.subr.bf16.mxu1 %v1467_v1  ;;  %v1440_v40 = vpop.eup %1439 }
 0x387   : > { %v1002_v42 = vmul.f32 %v1440_v40, %v1432_v19 }
 0x389   : > { %v1003_v43 = vpack.c.bf16 %v1002_v42, %v1002_v42 }
 0x38c   : > { %1360 = vmatmul.mubr.msk.bf16.vlgmr.msra.gmra.mrb[12].mxu1 %vm585_vm2, %v885_v39 }
 0x38d   : > { %1370 = vmatpush3.bf16.msra.mxu1 %v1010_v41  ;;  %1371 = vmatprep.mubr.msk.bf16.mxu1 %vm1468_vm0, %v1467_v1 }
 0x394   : > { %1372 = vmatmul.mubr.msk.bf16.vlgmr.msra.gmra.mrb[16].mxu1 %vm585_vm2, %v1003_v43 }
 0x3dc   : > { %v696_v44 = vpop.f32.mrb[4].mxu1 }
 0x3dd   : > { %702 = vst.msk [vmem:[#allocation2] sm:$0xff] %vm585_vm2, %v696_v44  ;;  %v1337_v45 = vpop.f32.mrb[5].mxu1 }
 0x3de   : > { %v699_v46 = vpop.f32.mrb[6].mxu1 }
 0x3df   : > { %v1338_v47 = vpop.f32.mrb[7].mxu1 }
 0x457   : > { %v810_v48 = vpop.f32.mrb[8].mxu1 }
 0x458   : > { %817 = vrot.lane.b32.xlu0 %v810_v48, %s1476_s16  ;;  %v1349_v49 = vpop.f32.mrb[9].mxu1  ;;  %s443_s16 = scalar_lea.vmem %s1713_s11, %s1580_s29 }
 0x459   : > { %v813_v50 = vpop.f32.mrb[10].mxu1 }
 0x45a   : > { %v1350_v51 = vpop.f32.mrb[11].mxu1 }
 0x45f   : > { %v928_v54 = vpop.f32.mrb[12].mxu1 }
 0x460   : > { %935 = vrot.lane.b32.xlu1 %v928_v54, %s1477_s25  ;;  %v1361_v55 = vpop.f32.mrb[13].mxu1 }
 0x461   : > { %v931_v56 = vpop.f32.mrb[14].mxu1 }
 0x462   : > { %v1362_v57 = vpop.f32.mrb[15].mxu1 }
 0x467   : > { %v1046_v58 = vpop.f32.mrb[16].mxu1 }
 0x468   : > { %1053 = vrot.lane.b32.xlu0 %v1046_v58, %s1478_s26  ;;  %v1373_v59 = vpop.f32.mrb[17].mxu1 }
 0x469   : > { %v1049_v60 = vpop.f32.mrb[18].mxu1 }
 0x46a   : > { %v1374_v61 = vpop.f32.mrb[19].mxu1 }
 0x4ca   : > { %v818_v62 = vpop.permute.xlu0 %817 }
 0x4cb   : > { %821 = vst.msk [vmem:[#allocation2] sm:$0xff] %vm820_vm4, %v818_v62 }
 0x4d2   : > { %v936_v63 = vpop.permute.xlu1 %935 }
 0x4d3   : > { %939 = vst.msk [vmem:[#allocation2] sm:$0xff] %vm938_vm5, %v936_v63 }
 0x4da   : > { %v1054_v1 = vpop.permute.xlu0 %1053 }
 0x4db   : > { %1057 = vst.msk [vmem:[#allocation2] sm:$0xff] %vm1056_vm6, %v1054_v1 }
 0x4e2   : > { %v1058_v0 = vld [vmem:[#allocation2] sm:$0xff] }
 0x4e3   : > { %v1059_v2 = vpack.c.bf16 %v1058_v0, %v1058_v0 }
 0x4e5   : > { %1380 = vmatmul.mubr.msk.bf16.vlgmr.msra.gmra.mrb[20].mxu0 %vm473_vm1, %v1059_v2 }
 0x5b8   : > { %v1120_v4 = vpop.f32.mrb[20].mxu0 }
 0x5b9   : > { %v1121_v5 = vadd.f32 %v1278_v3, %v1120_v4  ;;  %v1381_v6 = vpop.f32.mrb[21].mxu0 }
 0x5ba   : > { %v1123_v8 = vpop.f32.mrb[22].mxu0 }
 0x5bb   : > { %v1382_v9 = vpop.f32.mrb[23].mxu0  ;;  %v1126_v10 = vadd.f32 %v1121_v5, %v1592_v7  ;;  %v1282_v7 = vld [vmem:[%s1711_s9] ss:$0 sm:$0xff] }
 0x5bd   : > { %v1129_v11 = vsel %vm473_vm1, %v1126_v10, 0.0 }
 0x5be   : > { %1130 = vadd.xlane.f32.xlu1 %v1129_v11 }
 0x64b   : > { %v1131_v12 = vpop.xlane.xlu1 %1130 }
 0x64c   : > { %v1133_v13 = vmul.f32 0.03125, %v1131_v12 }
 0x64e   : > { %v1134_v14 = vsub.f32 %v1126_v10, %v1133_v13 }
 0x650   : > { %v1135_v15 = vmul.f32 %v1134_v14, %v1134_v14 }
 0x652   : > { %v1136_v16 = vsel %vm473_vm1, %v1135_v15, 0.0 }
 0x653   : > { %1137 = vadd.xlane.f32.xlu0 %v1136_v16 }
 0x6e0   : > { %v1138_v17 = vpop.xlane.xlu0 %1137 }
 0x6e1   : > { %v1139_v19 = vmul.f32 0.03125, %v1138_v17 }
 0x6e3   : > { %v1140_v20 = vadd.f32 1e-12, %v1139_v19 }
 0x6e5   : > { %1441 = vrsqrt.f32 %v1140_v20 }
 0x6ef   : > { %v1442_v21 = vpop.eup %1441 }
 0x6f0   : > { %v1142_v22 = vmul.f32 %v1442_v21, %v1134_v14 }
 0x6f2   : > { %v1149_v24 = vmul.f32 %v1282_v7, %v1142_v22 }
 0x6f4   : > { %v1156_v25 = vadd.f32 %v1283_v23, %v1149_v24 }
 0x6f6   : > { %1157 = vst.msk [vmem:[%s443_s16] sm:$0xff] %vm473_vm1, %v1156_v25 }
 0x6f7 PF: > { %s21_s19 = sadd.s32 1, %s1465_s19   ;;  %s1714_s17 = smov %s1461_s18 }
 0x6f8   : > { %p18_p5 = scmp.ge.s32.totalorder %s21_s19, 4   ;;  %s1715_s18 = smov %s1717_s20 }
 0x6fa   :  { %20 = sbr.rel (!%p18_p5) target bundleno = 2 (0x2), region = 100 }

// kernel: _lambda_.15
= control target key start
LH: loop header
LB: loop body
LE: loop exit
PB: predicated region body
PF: predicated region fallthrough
CT: control target
= control target key end

     0   :  { %v1196_v0 = vmov 0.0   ;;  %vm1197_vm0 = vmmov 0   ;;  %vm71_vm1 = vcmask 261120   ;;  %vm121_vm2 = vcmask 1043456   ;;  %s1198_s23 = smov 112   ;;  %s1203_s25 = smov 80   ;;  %s1452_s11 = inlined_call_operand.vmem [shape: bf16[32,8], index: 11, kind: input, shape index: {}]   ;;  %s1453_s0 = inlined_call_operand.vmem [shape: f32[1,8,32], index: 0, kind: input, shape index: {}, may-alias: {0,1}]   ;;  %s1454_s12 = inlined_call_operand.vmem [shape: bf16[8,32], index: 12, kind: input, shape index: {}]   ;;  %s1455_s13 = inlined_call_operand.vmem [shape: bf16[32,8], index: 13, kind: input, shape index: {}]   ;;  %s1456_s3 = inlined_call_operand.vmem [shape: bf16[32,32], index: 3, kind: input, shape index: {}]   ;;  %s1457_s1 = inlined_call_operand.vmem [shape: f32[1,8,32], index: 1, kind: input, shape index: {}, may-alias: {0,1}]   ;;  %s1458_s14 = inlined_call_operand.vmem [shape: bf16[8,32], index: 14, kind: input, shape index: {}]   ;;  %s1459_s5 = inlined_call_operand.vmem [shape: bf16[32,64], index: 5, kind: input, shape index: {}]   ;;  %s1460_s6 = inlined_call_operand.vmem [shape: f32[1,64], index: 6, kind: input, shape index: {}]   ;;  %s1461_s4 = inlined_call_operand.vmem [shape: f32[1,32], index: 4, kind: input, shape index: {}]   ;;  %s1462_s2 = inlined_call_operand.vmem [shape: f32[1,1,8], index: 2, kind: input, shape index: {}]   ;;  %s1463_s7 = inlined_call_operand.vmem [shape: bf16[32,32], index: 7, kind: input, shape index: {}]   ;;  %s1464_s8 = inlined_call_operand.vmem [shape: f32[1,32], index: 8, kind: input, shape index: {}]   ;;  %s1465_s9 = inlined_call_operand.vmem [shape: f32[1,32], index: 9, kind: input, shape index: {}]   ;;  %s1466_s10 = inlined_call_operand.vmem [shape: f32[1,32], index: 10, kind: input, shape index: {}]   ;;  %s1467_s15 = inlined_call_operand.vmem [shape: f32[1,8,32], index: 15, kind: output, shape index: {}]  }
   0x1   :  { %1050 = vmatprep.subr.bf16.mxu0 %v1196_v0  ;;  %v1168_v1 = vld [vmem:[%s1452_s11] sm:$0xff]   ;;  %1054 = vmatprep.mubr.msk.bf16.mxu0 %vm1197_vm0, %v1196_v0  ;;  %v1169_v2 = vld [vmem:[%s1452_s11 + $0x8] sm:$0xff]   ;;  %vm117_vm3 = vcmask 64512   ;;  %s1199_s11 = smov 120   ;;  %s1205_s26 = smov 88   ;;  %vm642_vm4 = vcmask 130112  }
   0x2   :  { %1058 = vmatprep.subr.bf16.mxu1 %v1196_v0  ;;  %1060 = vmatprep.mubr.msk.bf16.mxu1 %vm1197_vm0, %v1196_v0  ;;  %v1304_v3 = vld [vmem:[%s1453_s0] sm:$0xff]  ;;  %v1171_v13 = vld [vmem:[%s1455_s13 + $0x8] sm:$0xff]   ;;  %s1202_s0 = smov 96   ;;  %s1206_s27 = smov 8   ;;  %vm760_vm5 = vcmask 195712   ;;  %vm878_vm6 = vcmask 261312  }
   0x3   :  { %1051 = vmatpush3.bf16.msra.mxu0 %v1168_v1  ;;  %v52_v4 = vpack.c.bf16 %v1304_v3, %v1304_v3  ;;  %v116_v5 = vld [vmem:[%s1454_s12] sm:$0xf]  ;;  %v1173_v17 = vld [vmem:[%s1456_s3 + $0x8] sm:$0xff]   ;;  %s1204_s12 = smov 72   ;;  %s1207_s16 = smov 16  }
   0x4   :  { %1052 = vmatprep.subr.bf16.mxu0 %v1196_v0  ;;  %v123_v6 = vsel %vm121_vm2, %v116_v5, 0  ;;  %v1170_v8 = vld [vmem:[%s1455_s13] sm:$0xff]   ;;  %v1175_v26 = vld [vmem:[%s1459_s5 + $0x8] sm:$0xff]  }
   0x5   :  { %1059 = vmatpush3.bf16.msra.mxu1 %v123_v6  ;;  %v53_v14 = vld [vmem:[%s1457_s1] sm:$0xff]  ;;  %s1208_s1 = smov 24  }
   0x6   :  { %1064 = vmatprep.subr.bf16.mxu1 %v1196_v0  ;;  %v54_v15 = vpack.c.bf16 %v53_v14, %v53_v14  ;;  %v1172_v16 = vld [vmem:[%s1456_s3] sm:$0xff]  }
   0x7   :  { %1053 = vmatpush3.bf16.msra.mxu0 %v1169_v2  ;;  %v225_v18 = vld [vmem:[%s1458_s14] sm:$0xf] }
   0x8   :  { %1072 = vmatprep.subr.bf16.mxu0 %v1196_v0  ;;  %v230_v19 = vsel %vm121_vm2, %v225_v18, 0  ;;  %v1174_v21 = vld [vmem:[%s1459_s5] sm:$0xff]  }
   0x9   :  { %v996_v35 = vld [vmem:[%s1460_s6] ss:$0 sm:$0xff] }
   0xa   :  { %1055 = vmatmul.mubr.msk.bf16.vlgmr.msra.gmra.mrb[0].mxu0 %vm71_vm1, %v52_v4  ;;  %v992_v36 = vld [vmem:[%s1461_s4] ss:$0 sm:$0xff]  ;;  %s1200_s4 = smov 104  }
   0xb   :  { %1074 = vmatprep.mubr.msk.bf16.mxu0 %vm1197_vm0, %v1196_v0  ;;  %1073 = vmatpush3.bf16.msra.mxu0 %v230_v19  ;;  %v1001_v56 = vld [vmem:[%s1462_s2] ss:$0 sm:$0xff]  ;;  %s1201_s2 = smov 32  }
   0xc   :  { %1086 = vmatprep.subr.bf16.mxu0 %v1196_v0 }
  0xdd   :  { %v109_v7 = vpop.f32.mrb[0].mxu0 }
  0xde   :  { %v115_v9 = vpack.c.bf16 %v109_v7, %v109_v7  ;;  %v1056_v10 = vpop.f32.mrb[1].mxu0 }
  0xdf   :  { %v112_v11 = vpop.f32.mrb[2].mxu0 }
  0xe0   :  { %v1057_v12 = vpop.f32.mrb[3].mxu0  ;;  %1061 = vmatmul.mubr.msk.bf16.vlgmr.msra.gmra.mrb[0].mxu1 %vm117_vm3, %v115_v9 }
  0xe1   :  { %1065 = vmatpush3.bf16.msra.mxu1 %v1170_v8  ;;  %1068 = vmatprep.mubr.msk.bf16.mxu1 %vm1197_vm0, %v1196_v0 }
  0xe2   :  { %1066 = vmatprep.subr.bf16.mxu1 %v1196_v0 }
  0xe5   :  { %1067 = vmatpush3.bf16.msra.mxu1 %v1171_v13 }
  0xe6   :  { %1078 = vmatprep.subr.bf16.mxu1 %v1196_v0 }
  0xe8   :  { %1069 = vmatmul.mubr.msk.bf16.vlgmr.msra.gmra.mrb[4].mxu1 %vm71_vm1, %v54_v15 }
  0xe9   :  { %1079 = vmatpush3.bf16.msra.mxu1 %v1172_v16  ;;  %1082 = vmatprep.mubr.msk.bf16.mxu1 %vm1197_vm0, %v1196_v0 }
  0xea   :  { %1080 = vmatprep.subr.bf16.mxu1 %v1196_v0 }
  0xed   :  { %1081 = vmatpush3.bf16.msra.mxu1 %v1173_v17 }
  0xee   :  { %1094 = vmatprep.subr.bf16.mxu1 %v1196_v0 }
  0xf0   :  { %1083 = vmatmul.mubr.msk.bf16.vlgmr.msra.gmra.mrb[0].mxu1 %vm71_vm1, %v52_v4 }
  0xf1   :  { %1096 = vmatprep.mubr.msk.bf16.mxu1 %vm1197_vm0, %v1196_v0 }
 0x1bb   :  { %v218_v20 = vpop.f32.mrb[4].mxu1 }
 0x1bc   :  { %v224_v22 = vpack.c.bf16 %v218_v20, %v218_v20  ;;  %v1070_v23 = vpop.f32.mrb[5].mxu1 }
 0x1bd   :  { %v221_v24 = vpop.f32.mrb[6].mxu1 }
 0x1be   :  { %v1071_v25 = vpop.f32.mrb[7].mxu1  ;;  %1075 = vmatmul.mubr.msk.bf16.vlgmr.msra.gmra.mrb[4].mxu0 %vm117_vm3, %v224_v22 }
 0x1bf   :  { %1087 = vmatpush3.bf16.msra.mxu0 %v1174_v21  ;;  %1090 = vmatprep.mubr.msk.bf16.mxu0 %vm1197_vm0, %v1196_v0 }
 0x1c0   :  { %1088 = vmatprep.subr.bf16.mxu0 %v1196_v0 }
 0x1c3   :  { %v330_v27 = vpop.f32.mrb[0].mxu1  ;;  %1089 = vmatpush3.bf16.msra.mxu0 %v1175_v26 }
 0x1c4   :  { %v1084_v28 = vpop.f32.mrb[1].mxu1  ;;  %1100 = vmatprep.subr.bf16.mxu0 %v1196_v0  ;;  %v331_v41 = vadd.f32 %v992_v36, %v330_v27 }
 0x1c5   :  { %v333_v29 = vpop.f32.mrb[2].mxu1 }
 0x1c6   :  { %v1085_v30 = vpop.f32.mrb[3].mxu1  ;;  %1091 = vmatmul.mubr.msk.bf16.vlgmr.msra.gmra.mrb[8].mxu0 %vm71_vm1, %v54_v15  ;;  %v405_v45 = vpack.c.bf16 %v331_v41, %v331_v41 }
 0x1c7   :  { %1102 = vmatprep.mubr.msk.bf16.mxu0 %vm1197_vm0, %v1196_v0 }
 0x291   :  { %v1365_v31 = vpop.f32.mrb[4].mxu0 }
 0x292   :  { %v1076_v32 = vpop.f32.mrb[5].mxu0 }
 0x293   :  { %v269_v33 = vpop.f32.mrb[6].mxu0 }
 0x294   :  { %v1077_v34 = vpop.f32.mrb[7].mxu0 }
 0x299   :  { %v393_v37 = vpop.f32.mrb[8].mxu0 }
 0x29a   :  { %v1373_v38 = vadd.f32 %v996_v35, %v393_v37  ;;  %v1092_v39 = vpop.f32.mrb[9].mxu0 }
 0x29b   :  { %v396_v40 = vpop.f32.mrb[10].mxu0 }
 0x29c   :  { %v406_v42 = vpack.c.bf16 %v1373_v38, %v1373_v38  ;;  %v1093_v43 = vpop.f32.mrb[11].mxu0 }
 0x29e   :  { %646 = vrot.lane.b32.xlu1 %v406_v42, %s1198_s23  ;;  %528 = vrot.lane.b32.xlu0 %v406_v42, %s1199_s11  ;;  %v412_v44 = vsel %vm117_vm3, %v406_v42, 0 }
 0x29f   :  { %1095 = vmatpush3.bf16.xpose.msra.mxu1 %v412_v44 }
 0x2a0   :  { %1106 = vmatprep.subr.bf16.mxu1 %v1196_v0 }
 0x2a2   :  { %644 = vrot.lane.b32.xlu1 %v405_v45, %s1198_s23  ;;  %525 = vrot.lane.b32.xlu0 %v405_v45, %s1199_s11 }
 0x2a6   :  { %762 = vrot.lane.b32.xlu1 %v405_v45, %s1200_s4  ;;  %764 = vrot.lane.b32.xlu0 %v406_v42, %s1200_s4 }
 0x2a7   :  { %1097 = vmatmul.mubr.msk.bf16.vlgmr.msra.gmra.mrb[8].mxu1 %vm117_vm3, %v405_v45 }
 0x2a8   :  { %1108 = vmatprep.mubr.msk.bf16.mxu1 %vm1197_vm0, %v1196_v0 }
 0x310   :  { %v529_v46 = vpop.permute.xlu0 %528  ;;  %v647_v48 = vpop.permute.xlu1 %646 }
 0x311   :  { %v534_v47 = vsel %vm117_vm3, %v529_v46, 0  ;;  %v652_v50 = vsel %vm117_vm3, %v647_v48, 0 }
 0x312   :  { %1107 = vmatpush3.bf16.xpose.msra.mxu1 %v534_v47 }
 0x313   :  { %1118 = vmatprep.subr.bf16.mxu1 %v1196_v0 }
 0x314   :  { %v526_v49 = vpop.permute.xlu0 %525  ;;  %v645_v52 = vpop.permute.xlu1 %644 }
 0x318   :  { %v765_v51 = vpop.permute.xlu0 %764  ;;  %v763_v54 = vpop.permute.xlu1 %762 }
 0x319   :  { %1109 = vmatmul.mubr.msk.bf16.vlgmr.msra.gmra.mrb[12].mxu1 %vm117_vm3, %v526_v49  ;;  %v770_v53 = vsel %vm117_vm3, %v765_v51, 0 }
 0x31a   :  { %1119 = vmatpush3.bf16.xpose.msra.mxu1 %v652_v50  ;;  %1120 = vmatprep.mubr.msk.bf16.mxu1 %vm1197_vm0, %v1196_v0 }
 0x31b   :  { %1130 = vmatprep.subr.bf16.mxu1 %v1196_v0 }
 0x321   :  { %1121 = vmatmul.mubr.msk.bf16.vlgmr.msra.gmra.mrb[16].mxu1 %vm117_vm3, %v645_v52 }
 0x322   :  { %1131 = vmatpush3.bf16.xpose.msra.mxu1 %v770_v53  ;;  %1132 = vmatprep.mubr.msk.bf16.mxu1 %vm1197_vm0, %v1196_v0 }
 0x323   :  { %1142 = vmatprep.subr.bf16.mxu1 %v1196_v0 }
 0x329   :  { %1133 = vmatmul.mubr.msk.bf16.vlgmr.msra.gmra.mrb[20].mxu1 %vm117_vm3, %v763_v54 }
 0x32a   :  { %1146 = vmatprep.mubr.msk.bf16.mxu1 %vm1197_vm0, %v1196_v0 }
 0x37a   :  { %v448_v55 = vpop.f32.mrb[8].mxu1 }
 0x37b   :  { %v454_v57 = vmul.f32 0.35355338, %v448_v55  ;;  %v1098_v58 = vpop.f32.mrb[9].mxu1 }
 0x37c   :  { %v451_v59 = vpop.f32.mrb[10].mxu1 }
 0x37d   :  { %v1099_v60 = vpop.f32.mrb[11].mxu1  ;;  %v461_v61 = vadd.f32 %v1001_v56, %v454_v57 }
 0x37f   :  { %v462_v62 = vsel %vm117_vm3, %v461_v61, -inf }
 0x380   :  { %463 = vmax.xlane.f32.xlu0 %v462_v62 }
 0x3ec   :  { %v570_v63 = vpop.f32.mrb[12].mxu1 }
 0x3ed   :  { %v576_v1 = vmul.f32 0.35355338, %v570_v63  ;;  %v1110_v2 = vpop.f32.mrb[13].mxu1 }
 0x3ee   :  { %v573_v4 = vpop.f32.mrb[14].mxu1 }
 0x3ef   :  { %v1111_v5 = vpop.f32.mrb[15].mxu1  ;;  %v577_v6 = vadd.f32 %v1001_v56, %v576_v1 }
 0x3f1   :  { %v578_v7 = vsel %vm117_vm3, %v577_v6, -inf }
 0x3f2   :  { %579 = vmax.xlane.f32.xlu1 %v578_v7 }
 0x3f4   :  { %v688_v8 = vpop.f32.mrb[16].mxu1 }
 0x3f5   :  { %v694_v9 = vmul.f32 0.35355338, %v688_v8  ;;  %v1122_v10 = vpop.f32.mrb[17].mxu1 }
 0x3f6   :  { %v691_v11 = vpop.f32.mrb[18].mxu1 }
 0x3f7   :  { %v1123_v12 = vpop.f32.mrb[19].mxu1  ;;  %v695_v13 = vadd.f32 %v1001_v56, %v694_v9 }
 0x3f9   :  { %v696_v14 = vsel %vm117_vm3, %v695_v13, -inf }
 0x3fa   :  { %697 = vmax.xlane.f32.xlu0 %v696_v14 }
 0x3fc   :  { %v806_v15 = vpop.f32.mrb[20].mxu1 }
 0x3fd   :  { %v812_v16 = vmul.f32 0.35355338, %v806_v15  ;;  %v1134_v17 = vpop.f32.mrb[21].mxu1  ;;  %v1176_v15 = vld [vmem:[%s1463_s7] sm:$0xff]  }
 0x3fe   :  { %v809_v18 = vpop.f32.mrb[22].mxu1  ;;  %1143 = vmatpush3.bf16.msra.mxu1 %v1176_v15 }
 0x3ff   :  { %v1135_v19 = vpop.f32.mrb[23].mxu1  ;;  %v813_v20 = vadd.f32 %v1001_v56, %v812_v16  ;;  %v1177_v16 = vld [vmem:[%s1463_s7 + $0x8] sm:$0xff]   ;;  %1144 = vmatprep.subr.bf16.mxu1 %v1196_v0 }
 0x401   :  { %v814_v21 = vsel %vm117_vm3, %v813_v20, -inf }
 0x402   :  { %815 = vmax.xlane.f32.xlu0 %v814_v21  ;;  %1145 = vmatpush3.bf16.msra.mxu1 %v1177_v16 }
 0x403   :  { %401 = vrot.lane.b32.xlu1 %v1365_v31, %s1201_s2 }
 0x40d   :  { %v464_v22 = vpop.xlane.xlu0 %463 }
 0x40e   :  { %v465_v23 = vsub.f32 %v461_v61, %v464_v22 }
 0x410   :  { %v466_v24 = vmul.f32 1.442695, %v465_v23 }
 0x412   :  { %1178 = vpow2.f32 %v466_v24 }
 0x41c   :  { %v1179_v25 = vpop.eup %1178 }
 0x41d   :  { %v468_v26 = vsel %vm117_vm3, %v1179_v25, 0.0 }
 0x41e   :  { %469 = vadd.xlane.f32.xlu0 %v468_v26 }
 0x47f   :  { %v580_v27 = vpop.xlane.xlu1 %579 }
 0x480   :  { %v581_v28 = vsub.f32 %v577_v6, %v580_v27 }
 0x482   :  { %v582_v29 = vmul.f32 1.442695, %v581_v28 }
 0x483   :  { %v402_v30 = vpop.permute.xlu1 %401 }
 0x484   :  { %1180 = vpow2.f32 %v582_v29  ;;  %v404_v32 = vadd.f32 %v402_v30, %v1373_v38  ;;  %v1009_v29 = vld [vmem:[%s1464_s8] ss:$0 sm:$0xff] }
 0x486   :  { %v407_v33 = vpack.c.bf16 %v404_v32, %v404_v32 }
 0x487   :  { %v698_v34 = vpop.xlane.xlu0 %697 }
 0x488   :  { %v699_v35 = vsub.f32 %v695_v13, %v698_v34  ;;  %475 = vrot.lane.b32.xlu1 %v407_v33, %s1202_s0 }
 0x48a   :  { %v700_v31 = vmul.f32 1.442695, %v699_v35 }
 0x48c   :  { %1182 = vpow2.f32 %v700_v31  ;;  %708 = vrot.lane.b32.xlu1 %v407_v33, %s1203_s25 }
 0x48e   :  { %v1181_v36 = vpop.eup %1180 }
 0x48f   :  { %v816_v37 = vpop.xlane.xlu0 %815  ;;  %v584_v39 = vsel %vm117_vm3, %v1181_v36, 0.0 }
 0x490   :  { %v817_v40 = vsub.f32 %v813_v20, %v816_v37  ;;  %826 = vrot.lane.b32.xlu1 %v407_v33, %s1204_s12  ;;  %585 = vadd.xlane.f32.xlu0 %v584_v39 }
 0x492   :  { %v818_v41 = vmul.f32 1.442695, %v817_v40 }
 0x494   :  { %1184 = vpow2.f32 %v818_v41 }
 0x496   :  { %v1183_v38 = vpop.eup %1182 }
 0x497   :  { %v702_v42 = vsel %vm117_vm3, %v1183_v38, 0.0 }
 0x498   :  { %703 = vadd.xlane.f32.xlu0 %v702_v42 }
 0x49e   :  { %v1185_v43 = vpop.eup %1184 }
 0x49f   :  { %v820_v44 = vsel %vm117_vm3, %v1185_v43, 0.0 }
 0x4a0   :  { %821 = vadd.xlane.f32.xlu0 %v820_v44 }
 0x4ab   :  { %v470_v45 = vpop.xlane.xlu0 %469 }
 0x4ac   :  { %1186 = vrcp.f32 %v470_v45 }
 0x4b6   :  { %590 = vrot.lane.b32.xlu0 %v407_v33, %s1205_s26  ;;  %v1187_v46 = vpop.eup %1186 }
 0x4b7   :  { %v472_v47 = vmul.f32 %v1187_v46, %v1179_v25  ;;  %v1013_v46 = vld [vmem:[%s1465_s9] ss:$0 sm:$0xff] }
 0x4b9   :  { %v473_v50 = vpack.c.bf16 %v472_v47, %v472_v47  ;;  %v1014_v47 = vld [vmem:[%s1466_s10] ss:$0 sm:$0xff] }
 0x4fa   :  { %v476_v48 = vpop.permute.xlu1 %475 }
 0x4fb   :  { %v481_v49 = vsel %vm121_vm2, %v476_v48, 0 }
 0x4fc   :  { %1101 = vmatpush3.bf16.msra.mxu0 %v481_v49 }
 0x4fd   :  { %1112 = vmatprep.subr.bf16.mxu0 %v1196_v0 }
 0x4fe   :  { %v709_v58 = vpop.permute.xlu1 %708 }
 0x4ff   :  { %1103 = vmatmul.mubr.msk.bf16.vlgmr.msra.gmra.mrb[12].mxu0 %vm117_vm3, %v473_v50  ;;  %v714_v61 = vsel %vm121_vm2, %v709_v58, 0 }
 0x500   :  { %1114 = vmatprep.mubr.msk.bf16.mxu0 %vm1197_vm0, %v1196_v0 }
 0x502   :  { %v827_v63 = vpop.permute.xlu1 %826 }
 0x503   :  { %v832_v4 = vsel %vm121_vm2, %v827_v63, 0 }
 0x51d   :  { %v586_v51 = vpop.xlane.xlu0 %585 }
 0x51e   :  { %1188 = vrcp.f32 %v586_v51 }
 0x525   :  { %v704_v52 = vpop.xlane.xlu0 %703 }
 0x526   :  { %1190 = vrcp.f32 %v704_v52 }
 0x528   :  { %v1189_v53 = vpop.eup %1188 }
 0x529   :  { %v588_v55 = vmul.f32 %v1189_v53, %v1181_v36 }
 0x52b   :  { %v589_v59 = vpack.c.bf16 %v588_v55, %v588_v55 }
 0x52d   :  { %v822_v54 = vpop.xlane.xlu0 %821 }
 0x52e   :  { %1192 = vrcp.f32 %v822_v54 }
 0x530   :  { %v1191_v60 = vpop.eup %1190 }
 0x531   :  { %v591_v56 = vpop.permute.xlu0 %590  ;;  %v706_v62 = vmul.f32 %v1191_v60, %v1183_v38 }
 0x532   :  { %v596_v57 = vsel %vm121_vm2, %v591_v56, 0 }
 0x533   :  { %1113 = vmatpush3.bf16.msra.mxu0 %v596_v57  ;;  %v707_v1 = vpack.c.bf16 %v706_v62, %v706_v62 }
 0x534   :  { %1124 = vmatprep.subr.bf16.mxu0 %v1196_v0 }
 0x536   :  { %1115 = vmatmul.mubr.msk.bf16.vlgmr.msra.gmra.mrb[16].mxu0 %vm117_vm3, %v589_v59 }
 0x537   :  { %1125 = vmatpush3.bf16.msra.mxu0 %v714_v61  ;;  %1126 = vmatprep.mubr.msk.bf16.mxu0 %vm1197_vm0, %v1196_v0 }
 0x538   :  { %1136 = vmatprep.subr.bf16.mxu0 %v1196_v0  ;;  %v1193_v2 = vpop.eup %1192 }
 0x539   :  { %v824_v5 = vmul.f32 %v1193_v2, %v1185_v43 }
 0x53b   :  { %v825_v6 = vpack.c.bf16 %v824_v5, %v824_v5 }
 0x53e   :  { %1127 = vmatmul.mubr.msk.bf16.vlgmr.msra.gmra.mrb[20].mxu0 %vm117_vm3, %v707_v1 }
 0x53f   :  { %1137 = vmatpush3.bf16.msra.mxu0 %v832_v4  ;;  %1138 = vmatprep.mubr.msk.bf16.mxu0 %vm1197_vm0, %v1196_v0 }
 0x546   :  { %1139 = vmatmul.mubr.msk.bf16.vlgmr.msra.gmra.mrb[24].mxu0 %vm117_vm3, %v825_v6 }
 0x5d2   :  { %v517_v7 = vpop.f32.mrb[12].mxu0 }
 0x5d3   :  { %523 = vst.msk [vmem:[#allocation2] sm:$0xff] %vm117_vm3, %v517_v7  ;;  %v1104_v8 = vpop.f32.mrb[13].mxu0 }
 0x5d4   :  { %v520_v9 = vpop.f32.mrb[14].mxu0 }
 0x5d5   :  { %v1105_v10 = vpop.f32.mrb[15].mxu0 }
 0x609   :  { %v632_v11 = vpop.f32.mrb[16].mxu0 }
 0x60a   :  { %639 = vrot.lane.b32.xlu1 %v632_v11, %s1206_s27  ;;  %v1116_v12 = vpop.f32.mrb[17].mxu0 }
 0x60b   :  { %v635_v13 = vpop.f32.mrb[18].mxu0 }
 0x60c   :  { %v1117_v14 = vpop.f32.mrb[19].mxu0 }
 0x611   :  { %v750_v17 = vpop.f32.mrb[20].mxu0 }
 0x612   :  { %757 = vrot.lane.b32.xlu1 %v750_v17, %s1207_s16  ;;  %v1128_v18 = vpop.f32.mrb[21].mxu0 }
 0x613   :  { %v753_v19 = vpop.f32.mrb[22].mxu0 }
 0x614   :  { %v1129_v20 = vpop.f32.mrb[23].mxu0 }
 0x619   :  { %v868_v21 = vpop.f32.mrb[24].mxu0 }
 0x61a   :  { %875 = vrot.lane.b32.xlu1 %v868_v21, %s1208_s1  ;;  %v1140_v22 = vpop.f32.mrb[25].mxu0 }
 0x61b   :  { %v871_v23 = vpop.f32.mrb[26].mxu0 }
 0x61c   :  { %v1141_v24 = vpop.f32.mrb[27].mxu0 }
 0x67c   :  { %v640_v25 = vpop.permute.xlu1 %639 }
 0x67d   :  { %643 = vst.msk [vmem:[#allocation2] sm:$0xff] %vm642_vm4, %v640_v25 }
 0x684   :  { %v758_v26 = vpop.permute.xlu1 %757 }
 0x685   :  { %761 = vst.msk [vmem:[#allocation2] sm:$0xff] %vm760_vm5, %v758_v26 }
 0x68c   :  { %v876_v0 = vpop.permute.xlu1 %875 }
 0x68d   :  { %879 = vst.msk [vmem:[#allocation2] sm:$0xff] %vm878_vm6, %v876_v0 }
 0x694   :  { %v880_v27 = vld [vmem:[#allocation2] sm:$0xff] }
 0x695   :  { %v881_v28 = vpack.c.bf16 %v880_v27, %v880_v27 }
 0x697   :  { %1147 = vmatmul.mubr.msk.bf16.vlgmr.msra.gmra.mrb[24].mxu1 %vm71_vm1, %v881_v28 }
 0x76a   :  { %v942_v30 = vpop.f32.mrb[24].mxu1 }
 0x76b   :  { %v943_v32 = vadd.f32 %v1009_v29, %v942_v30  ;;  %v1148_v33 = vpop.f32.mrb[25].mxu1 }
 0x76c   :  { %v945_v34 = vpop.f32.mrb[26].mxu1 }
 0x76d   :  { %v1149_v35 = vpop.f32.mrb[27].mxu1  ;;  %v948_v31 = vadd.f32 %v943_v32, %v1304_v3 }
 0x76f   :  { %v951_v36 = vsel %vm71_vm1, %v948_v31, 0.0 }
 0x770   :  { %952 = vadd.xlane.f32.xlu0 %v951_v36 }
 0x7fd   :  { %v953_v37 = vpop.xlane.xlu0 %952 }
 0x7fe   :  { %v955_v39 = vmul.f32 0.03125, %v953_v37 }
 0x800   :  { %v956_v40 = vsub.f32 %v948_v31, %v955_v39 }
 0x802   :  { %v957_v41 = vmul.f32 %v956_v40, %v956_v40 }
 0x804   :  { %v958_v38 = vsel %vm71_vm1, %v957_v41, 0.0 }
 0x805   :  { %959 = vadd.xlane.f32.xlu1 %v958_v38 }
 0x892   :  { %v960_v42 = vpop.xlane.xlu1 %959 }
 0x893   :  { %v961_v43 = vmul.f32 0.03125, %v960_v42 }
 0x895   :  { %v962_v44 = vadd.f32 1e-12, %v961_v43 }
 0x897   :  { %1194 = vrsqrt.f32 %v962_v44 }
 0x8a1   :  { %v1195_v45 = vpop.eup %1194 }
 0x8a2   :  { %v964_v3 = vmul.f32 %v1195_v45, %v956_v40 }
 0x8a4   :  { %v971_v48 = vmul.f32 %v1013_v46, %v964_v3 }
 0x8a6   :  { %v978_v49 = vadd.f32 %v1014_v47, %v971_v48 }
 0x8a8   :  { %979 = vst.msk [vmem:[%s1467_s15] sm:$0xff] %vm71_vm1, %v978_v49 }

// kernel: _lambda_.18
= control target key start
LH: loop header
LB: loop body
LE: loop exit
PB: predicated region body
PF: predicated region fallthrough
CT: control target
= control target key end

     0   :  { %s1067_s12 = smov 0   ;;  %s1069_s13 = smov 0   ;;  %s1183_s0 = inlined_call_operand.vmem [shape: f32[2,8,32], index: 0, kind: input, shape index: {}, may-alias: {0,10}]   ;;  %s1184_s1 = inlined_call_operand.vmem [shape: f32[8,32], index: 1, kind: input, shape index: {}]   ;;  %s1185_s2 = inlined_call_operand.vmem [shape: bf16[32,2], index: 2, kind: input, shape index: {}]   ;;  %s1186_s3 = inlined_call_operand.vmem [shape: f32[1,2], index: 3, kind: input, shape index: {}]   ;;  %s1187_s4 = inlined_call_operand.vmem [shape: bf16[2,32,64], index: 4, kind: input, shape index: {}]   ;;  %s1188_s5 = inlined_call_operand.vmem [shape: f32[2,1,64], index: 5, kind: input, shape index: {}]   ;;  %s1189_s6 = inlined_call_operand.vmem [shape: bf16[2,64,32], index: 6, kind: input, shape index: {}]   ;;  %s1190_s7 = inlined_call_operand.vmem [shape: f32[2,1,32], index: 7, kind: input, shape index: {}]   ;;  %s1191_s8 = inlined_call_operand.vmem [shape: f32[1,32], index: 8, kind: input, shape index: {}]   ;;  %s1192_s9 = inlined_call_operand.vmem [shape: f32[1,32], index: 9, kind: input, shape index: {}]   ;;  %s1193_s10 = inlined_call_operand.vmem [shape: f32[2,8,32], index: 10, kind: output, shape index: {}, may-alias: {0,10}]  }
   0x1   :  { %s1071_s14 = smov 0  }
   0x2 LB: > { %s861_s15 = sadd.s32 4294967295, %s1004_s14   ;;  %s30_s16 = sadd.s32 1, %s1000_s13  ;;  %s1004_s14 = sphi %s1071_s14, %s21_s14   ;;  %s1000_s13 = sphi %s1069_s13, %s1195_s13   ;;  %s996_s12 = sphi %s1067_s12, %s1194_s12  }
   0x3   : > { %p31_p0 = scmp.ge.s32.totalorder %s30_s16, 2  ;;  %p865_p1 = scmp.ge.s32.totalorder %s1004_s14, 1 }
   0x4   : > { %p336_p2 = scmp.lt.s32.totalorder %s1004_s14, 3 }
   0x5   : > { %s1197_s16 = smov (%p31_p0, %s30_s16), 0 }
   0x6   : > { %p337_p3 = pnand %p865_p1, %p336_p2 }
   0x7   : > { %p386_p4 = scmp.lt.s32.totalorder (!%p337_p3), %s996_s12, 1  ;;  %v1092_v0 = vld [vmem:[%s1184_s1] sm:$0xff] (!%p337_p3)  ;;  %p870_p5 = scmp.ne.s32.totalorder (!%p337_p3), %s996_s12, 0 }
   0x8   : > { %340 = sbr.rel (%p337_p3) target bundleno = 1799 (0x707), region = 56  ;;  %v1096_v1 = vpack.c.bf16 (!%p337_p3), %v1092_v0, %v1092_v0 }
   0xf   : > { %s1099_s19 = scalar_select %p386_p4, %s996_s12, 1 }
  0x10   : > { %408 = sbr.rel (%p870_p5) target bundleno = 994 (0x3e2), region = 60  ;;  %v964_v2 = vld [vmem:[%s1185_s2] sm:$0xff] (!%p870_p5)   ;;  %v1006_v3 = vmov (!%p870_p5), 0.0   ;;  %v965_v4 = vld [vmem:[%s1185_s2 + $0x8] sm:$0xff] (!%p870_p5)   ;;  %vm1007_vm0 = vmmov (!%p870_p5), 0   ;;  %vm432_vm1 = vcmask (!%p870_p5), 261120   ;;  %v491_v21 = vlaneseq (!%p870_p5) }
  0x11   : > { %s893_s20 = sshll.u32 %s1099_s19, 4  ;;  %s393_s23 = scalar_lea.vmem %s1188_s5, %s1099_s19  ;;  %906 = vmatprep.subr.bf16.mxu0 (!%p870_p5), %v1006_v3  ;;  %910 = vmatprep.mubr.msk.bf16.mxu0 (!%p870_p5), %vm1007_vm0, %v1006_v3  ;;  %513 = vst.msk [vmem:[#allocation4] sm:$0xff] (!%p870_p5), %vm432_vm1, %v1006_v3  ;;  %v871_v5 = vld [vmem:[%s1186_s3] ss:$0 sm:$0xff] (!%p870_p5)  ;;  %vm476_vm2 = vcmask (!%p870_p5), 15360   ;;  %vm510_vm3 = vcmask (!%p870_p5), 7168  }
  0x12   : > { %s1109_s0 = scalar_lea.vmem %s1187_s4, %s893_s20  ;;  %s894_s26 = sshll.u32 %s1099_s19, 5  ;;  %907 = vmatpush3.bf16.msra.mxu0 (!%p870_p5), %v964_v2  ;;  %v492_v22 = vand.u32 (!%p870_p5), 127, %v491_v21 }
  0x13   : > { %s1115_s29 = scalar_lea.vmem %s1189_s6, %s894_s26  ;;  %s401_s17 = scalar_lea.vmem %s1190_s7, %s1099_s19  ;;  %908 = vmatprep.subr.bf16.mxu0 (!%p870_p5), %v1006_v3 }
  0x16   : > { %909 = vmatpush3.bf16.msra.mxu0 (!%p870_p5), %v965_v4 }
  0x19   : > { %911 = vmatmul.mubr.msk.bf16.vlgmr.msra.gmra.mrb[0].mxu0 %vm432_vm1, %v1096_v1 }
  0xec   : > { %v470_v6 = vpop.f32.mrb[0].mxu0 }
  0xed   : > { %v471_v7 = vadd.f32 %v871_v5, %v470_v6  ;;  %v912_v8 = vpop.f32.mrb[1].mxu0 }
  0xee   : > { %v473_v9 = vpop.f32.mrb[2].mxu0 }
  0xef   : > { %v913_v10 = vpop.f32.mrb[3].mxu0  ;;  %v477_v11 = vsel %vm476_vm2, %v471_v7, -inf }
  0xf0   : > { %478 = vmax.xlane.f32.xlu0 %v477_v11 }
 0x17d   : > { %v479_v12 = vpop.xlane.xlu0 %478 }
 0x17e   : > { %v480_v13 = vsub.f32 %v471_v7, %v479_v12 }
 0x180   : > { %v481_v14 = vmul.f32 1.442695, %v480_v13 }
 0x182   : > { %966 = vpow2.f32 %v481_v14 }
 0x18c   : > { %v967_v15 = vpop.eup %966 }
 0x18d   : > { %v483_v16 = vsel %vm476_vm2, %v967_v15, 0.0 }
 0x18e   : > { %484 = vadd.xlane.f32.xlu0 %v483_v16 }
 0x21b   : > { %v485_v17 = vpop.xlane.xlu0 %484 }
 0x21c   : > { %968 = vrcp.f32 %v485_v17 }
 0x226   : > { %v969_v18 = vpop.eup %968 }
 0x227   : > { %v487_v19 = vmul.f32 %v969_v18, %v967_v15 }
 0x229   : > { %v488_v20 = vsel %vm476_vm2, %v487_v19, -inf }
 0x22a   : > { %489 = vmax.xlane.f32.xlu1 %v488_v20 }
 0x2b7   : > { %v490_v23 = vpop.xlane.xlu1 %489 }
 0x2b8   : > { %vm493_vm4 = vcmp.ge.f32.partialorder %v487_v19, %v490_v23  ;;  %511 = vst.msk [vmem:[#allocation2] sm:$0xff] %vm510_vm3, %v490_v23 }
 0x2b9   : > { %v494_v24 = vsel %vm493_vm4, %v492_v22, 2 }
 0x2ba   : > { %v495_v25 = vsel %vm476_vm2, %v494_v24, 2147483647 }
 0x2bb   : > { %v497_v26 = vshra.s32 %v495_v25, 16  ;;  %v496_v28 = vand.u32 65535, %v495_v25 }
 0x2bd   : > { %v499_v27 = vcvt.s32.f32 %v497_v26  ;;  %v498_v30 = vcvt.s32.f32 %v496_v28 }
 0x2bf   : > { %500 = vmin.xlane.f32.xlu1 %v499_v27 }
 0x34c   : > { %v501_v29 = vpop.xlane.xlu1 %500 }
 0x34d   : > { %vm502_vm5 = vcmp.eq.f32.partialorder %v499_v27, %v501_v29  ;;  %v507_v32 = vcvt.f32.s32 %v501_v29 }
 0x34e   : > { %v503_v31 = vsel %vm502_vm5, %v498_v30, inf }
 0x34f   : > { %504 = vmin.xlane.f32.xlu0 %v503_v31  ;;  %v508_v34 = vshll.u32 %v507_v32, 16 }
 0x3dc   : > { %v505_v33 = vpop.xlane.xlu0 %504 }
 0x3dd   : > { %v506_v35 = vcvt.f32.s32 %v505_v33 }
 0x3df   : > { %v509_v36 = vadd.s32 %v508_v34, %v506_v35 }
 0x3e1   : > { %512 = vst.msk [vmem:[#allocation3] sm:$0xff] %vm510_vm3, %v509_v36 }
 0x3e2 PF: > { %v971_v37 = vld [vmem:[%s1109_s0] sm:$0xff]   ;;  %v1008_v38 = vmov 0.0   ;;  %v972_v39 = vld [vmem:[%s1109_s0 + $0x8] sm:$0xff]   ;;  %vm1009_vm6 = vmmov 0   ;;  %vm537_vm7 = vcmask 261120   ;;  %v975_v42 = vld [vmem:[%s1115_s29 + $0x10] sm:$0xff]   ;;  %v675_v45 = vstv %s996_s12 }
 0x3e3   : > { %914 = vmatprep.subr.bf16.mxu0 %v1008_v38  ;;  %922 = vmatprep.subr.bf16.mxu1 %v1008_v38  ;;  %v973_v40 = vld [vmem:[%s1115_s29] sm:$0xff]   ;;  %v974_v41 = vld [vmem:[%s1115_s29 + $0x8] sm:$0xff]   ;;  %v976_v43 = vld [vmem:[%s1115_s29 + $0x18] sm:$0xff]   ;;  %v1010_v46 = vmov 0   ;;  %vm630_vm9 = vcmask 523264   ;;  %p886_p6 = scmp.ne.s32.totalorder %s996_s12, 1 }
 0x3e4   : > { %915 = vmatpush3.bf16.msra.mxu0 %v971_v37  ;;  %918 = vmatprep.mubr.msk.bf16.mxu0 %vm1009_vm6, %v1008_v38  ;;  %v875_v48 = vld [vmem:[%s393_s23] ss:$0 sm:$0xff]  ;;  %v679_v6 = vld [vmem:[#allocation4] sm:$0xff]  ;;  %v1011_v12 = vmov (!%p886_p6), 0  }
 0x3e5   : > { %916 = vmatprep.subr.bf16.mxu0 %v1008_v38  ;;  %930 = vmatprep.mubr.msk.bf16.mxu1 %vm1009_vm6, %v1008_v38  ;;  %v693_v11 = vld [vmem:[#allocation2] sm:$0xff] (!%p886_p6) }
 0x3e6   : > { %923 = vmatpush3.bf16.msra.mxu1 %v973_v40  ;;  %970 = vset.pattern.permute.xlu0 %v1010_v46  ;;  %v887_v27 = vld [vmem:[%s1191_s8] ss:$0 sm:$0xff] (!%p886_p6) }
 0x3e7   : > { %924 = vmatprep.subr.bf16.mxu1 %v1008_v38  ;;  %v888_v28 = vld [vmem:[%s1192_s9] ss:$0 sm:$0xff] (!%p886_p6) }
 0x3e8   : > { %917 = vmatpush3.bf16.msra.mxu0 %v972_v39  ;;  %v674_v44 = vld [vmem:[#allocation3] sm:$0xff] }
 0x3e9   : > { %vm676_vm8 = vcmp.eq.s32.totalorder %v674_v44, %v675_v45 }
 0x3ea   : > { %925 = vmatpush3.bf16.msra.mxu1 %v974_v41  ;;  %v885_v47 = vsel %vm676_vm8, 1.0, %v1008_v38 }
 0x3eb   : > { %919 = vmatmul.mubr.msk.bf16.vlgmr.msra.gmra.mrb[0].mxu0 %vm537_vm7, %v1096_v1  ;;  %926 = vmatprep.subr.bf16.mxu1 %v1008_v38  ;;  %v879_v1 = vld [vmem:[%s401_s17] ss:$0 sm:$0xff] }
 0x3ec   : > { %682 = vperm.xlu0 %970, %v885_v47  }
 0x3ee   : > { %927 = vmatpush3.bf16.msra.mxu1 %v975_v42 }
 0x3ef   : > { %928 = vmatprep.subr.bf16.mxu1 %v1008_v38 }
 0x3f0   : > { %979 = vset.pattern.permute.xlu0 (!%p886_p6), %v1011_v12 }
 0x3f1   : > { %696 = vperm.xlu0 (!%p886_p6), %979, %v693_v11  }
 0x3f2   : > { %929 = vmatpush3.bf16.msra.mxu1 %v976_v43 }
 0x46b   : > { %v683_v3 = vpop.permute.xlu0 %682 }
 0x470   : > { %v697_v14 = vpop.permute.xlu0 (!%p886_p6), %696 }
 0x4be   : > { %v575_v49 = vpop.f32.mrb[0].mxu0 }
 0x4bf   : > { %v576_v50 = vadd.f32 %v875_v48, %v575_v49  ;;  %v920_v51 = vpop.f32.mrb[1].mxu0 }
 0x4c0   : > { %v578_v52 = vpop.f32.mrb[2].mxu0 }
 0x4c1   : > { %v581_v53 = vmul.f32 %v576_v50, %v576_v50  ;;  %v921_v54 = vpop.f32.mrb[3].mxu0 }
 0x4c3   : > { %v582_v55 = vmul.f32 %v581_v53, %v576_v50 }
 0x4c5   : > { %v583_v56 = vmul.f32 0.044715, %v582_v55 }
 0x4c7   : > { %v584_v57 = vadd.f32 %v583_v56, %v576_v50 }
 0x4c9   : > { %v585_v58 = vmul.f32 0.7978846, %v584_v57 }
 0x4cb   : > { %977 = vtanh.f32 %v585_v58 }
 0x4d5   : > { %v978_v59 = vpop.eup %977 }
 0x4d6   : > { %v587_v60 = vadd.f32 1.0, %v978_v59 }
 0x4d8   : > { %v588_v61 = vmul.f32 0.5, %v587_v60 }
 0x4da   : > { %v589_v62 = vmul.f32 %v588_v61, %v576_v50 }
 0x4dc   : > { %v590_v63 = vpack.c.bf16 %v589_v62, %v589_v62 }
 0x4de   : > { %931 = vmatmul.mubr.msk.bf16.vlgmr.msra.gmra.mrb[0].mxu1 %vm630_vm9, %v590_v63 }
 0x5b1   : > { %v668_v2 = vpop.f32.mrb[0].mxu1 }
 0x5b2   : > { %v669_v4 = vadd.f32 %v879_v1, %v668_v2  ;;  %v932_v5 = vpop.f32.mrb[1].mxu1  ;;  %691 = sbr.rel (%p886_p6) target bundleno = 1790 (0x6fe), region = 64 }
 0x5b3   : > { %v671_v7 = vpop.f32.mrb[2].mxu1 }
 0x5b4   : > { %v685_v8 = vmul.f32 %v683_v3, %v669_v4  ;;  %v933_v9 = vpop.f32.mrb[3].mxu1 }
 0x5b6   : > { %v686_v10 = vadd.f32 %v685_v8, %v679_v6 }
 0x5b8   : > { %687 = vst.msk [vmem:[#allocation4] sm:$0xff] %vm537_vm7, %v686_v10 }
 0x5bf   : > { %v692_v13 = vld [vmem:[#allocation4] sm:$0xff] }
 0x5c0   : > { %v699_v15 = vmul.f32 %v697_v14, %v692_v13 }
 0x5c2   : > { %v700_v16 = vadd.f32 %v699_v15, %v1092_v0 }
 0x5c4   : > { %v703_v17 = vsel %vm537_vm7, %v700_v16, 0.0 }
 0x5c5   : > { %704 = vadd.xlane.f32.xlu0 %v703_v17 }
 0x652   : > { %v705_v18 = vpop.xlane.xlu0 %704 }
 0x653   : > { %v707_v19 = vmul.f32 0.03125, %v705_v18 }
 0x655   : > { %v708_v20 = vsub.f32 %v700_v16, %v707_v19 }
 0x657   : > { %v709_v21 = vmul.f32 %v708_v20, %v708_v20 }
 0x659   : > { %v710_v22 = vsel %vm537_vm7, %v709_v21, 0.0 }
 0x65a   : > { %711 = vadd.xlane.f32.xlu1 %v710_v22 }
 0x6e7   : > { %v712_v23 = vpop.xlane.xlu1 %711 }
 0x6e8   : > { %v713_v24 = vmul.f32 0.03125, %v712_v23 }
 0x6ea   : > { %v714_v25 = vadd.f32 1e-12, %v713_v24 }
 0x6ec   : > { %980 = vrsqrt.f32 %v714_v25 }
 0x6f6   : > { %v981_v26 = vpop.eup %980 }
 0x6f7   : > { %v716_v0 = vmul.f32 %v981_v26, %v708_v20 }
 0x6f9   : > { %v723_v29 = vmul.f32 %v887_v27, %v716_v0 }
 0x6fb   : > { %v730_v30 = vadd.f32 %v888_v28, %v723_v29 }
 0x6fd   : > { %731 = vst.msk [vmem:[#allocation5] sm:$0xff] %vm537_vm7, %v730_v30 }
 0x6fe PF: > { %p889_p7 = scmp.ne.s32.totalorder %s861_s15, 1 }
 0x700   : > { %734 = sbr.rel (%p889_p7) target bundleno = 1799 (0x707), region = 68 }
 0x704   : > { %v764_v31 = vld [vmem:[#allocation5] sm:$0xff] (!%p889_p7) }
 0x705   : > { %890 = vst [vmem:[%s1193_s10 + $0x8] sm:$0xff] (!%p889_p7), %v764_v31 }
 0x707 PF: > { %s21_s14 = sadd.s32 1, %s1004_s14   ;;  %s1194_s12 = smov %s1000_s13 }
 0x708   : > { %p18_p8 = scmp.ge.s32.totalorder %s21_s14, 4   ;;  %s1195_s13 = smov %s1197_s16 }
 0x70a   :  { %20 = sbr.rel (!%p18_p8) target bundleno = 2 (0x2), region = 142 }

// kernel: _lambda_.14
= control target key start
LH: loop header
LB: loop body
LE: loop exit
PB: predicated region body
PF: predicated region fallthrough
CT: control target
= control target key end

     0   :  { %s1042_s30 = smov 0   ;;  %s1044_s10 = smov 0   ;;  %s1155_s0 = inlined_call_operand.vmem [shape: f32[8,32], index: 0, kind: input, shape index: {}]   ;;  %s1156_s1 = inlined_call_operand.vmem [shape: bf16[32,2], index: 1, kind: input, shape index: {}]   ;;  %s1157_s2 = inlined_call_operand.vmem [shape: f32[1,2], index: 2, kind: input, shape index: {}]   ;;  %s1158_s3 = inlined_call_operand.vmem [shape: bf16[2,32,64], index: 3, kind: input, shape index: {}]   ;;  %s1159_s4 = inlined_call_operand.vmem [shape: f32[2,1,64], index: 4, kind: input, shape index: {}]   ;;  %s1160_s5 = inlined_call_operand.vmem [shape: bf16[2,64,32], index: 5, kind: input, shape index: {}]   ;;  %s1161_s6 = inlined_call_operand.vmem [shape: f32[2,1,32], index: 6, kind: input, shape index: {}]   ;;  %s1162_s7 = inlined_call_operand.vmem [shape: f32[1,32], index: 7, kind: input, shape index: {}]   ;;  %s1163_s8 = inlined_call_operand.vmem [shape: f32[1,32], index: 8, kind: input, shape index: {}]   ;;  %s1164_s9 = inlined_call_operand.vmem [shape: f32[8,32], index: 9, kind: output, shape index: {}]  }
   0x1   :  { %s1046_s11 = smov 0  }
   0x2 LB: > { %s28_s12 = sadd.s32 1, %s980_s10  ;;  %p846_p0 = scmp.ge.s32.totalorder %s984_s11, 1  ;;  %s984_s11 = sphi %s1046_s11, %s19_s11   ;;  %s980_s10 = sphi %s1044_s10, %s1166_s10   ;;  %s976_s30 = sphi %s1042_s30, %s1165_s30  }
   0x3   : > { %p29_p1 = scmp.ge.s32.totalorder %s28_s12, 2  ;;  %p334_p2 = scmp.lt.s32.totalorder %s984_s11, 3 }
   0x5   : > { %s1168_s12 = smov (%p29_p1, %s28_s12), 0  ;;  %p335_p3 = pnand %p846_p0, %p334_p2 }
   0x6   : > { %p388_p4 = scmp.lt.s32.totalorder (!%p335_p3), %s976_s30, 1  ;;  %v1066_v0 = vld [vmem:[%s1155_s0] sm:$0xff] (!%p335_p3)  ;;  %p851_p5 = scmp.ne.s32.totalorder (!%p335_p3), %s976_s30, 0 }
   0x7   : > { %338 = sbr.rel (%p335_p3) target bundleno = 1789 (0x6fd), region = 56  ;;  %v1070_v1 = vpack.c.bf16 (!%p335_p3), %v1066_v0, %v1066_v0 }
   0xe   : > { %s1073_s15 = scalar_select %p388_p4, %s976_s30, 1 }
   0xf   : > { %414 = sbr.rel (%p851_p5) target bundleno = 993 (0x3e1), region = 60  ;;  %v944_v2 = vld [vmem:[%s1156_s1] sm:$0xff] (!%p851_p5)   ;;  %v986_v3 = vmov (!%p851_p5), 0.0   ;;  %v945_v4 = vld [vmem:[%s1156_s1 + $0x8] sm:$0xff] (!%p851_p5)   ;;  %vm987_vm0 = vmmov (!%p851_p5), 0   ;;  %vm438_vm1 = vcmask (!%p851_p5), 261120   ;;  %v497_v21 = vlaneseq (!%p851_p5) }
  0x10   : > { %s873_s16 = sshll.u32 %s1073_s15, 4  ;;  %s395_s19 = scalar_lea.vmem %s1159_s4, %s1073_s15  ;;  %886 = vmatprep.subr.bf16.mxu0 (!%p851_p5), %v986_v3  ;;  %890 = vmatprep.mubr.msk.bf16.mxu0 (!%p851_p5), %vm987_vm0, %v986_v3  ;;  %519 = vst.msk [vmem:[#allocation4] sm:$0xff] (!%p851_p5), %vm438_vm1, %v986_v3  ;;  %v852_v5 = vld [vmem:[%s1157_s2] ss:$0 sm:$0xff] (!%p851_p5)  ;;  %vm482_vm2 = vcmask (!%p851_p5), 15360   ;;  %vm516_vm3 = vcmask (!%p851_p5), 7168  }
  0x11   : > { %s1083_s22 = scalar_lea.vmem %s1158_s3, %s873_s16  ;;  %s874_s23 = sshll.u32 %s1073_s15, 5  ;;  %887 = vmatpush3.bf16.msra.mxu0 (!%p851_p5), %v944_v2  ;;  %v498_v22 = vand.u32 (!%p851_p5), 127, %v497_v21 }
  0x12   : > { %s1089_s26 = scalar_lea.vmem %s1160_s5, %s874_s23  ;;  %s403_s29 = scalar_lea.vmem %s1161_s6, %s1073_s15  ;;  %888 = vmatprep.subr.bf16.mxu0 (!%p851_p5), %v986_v3 }
  0x15   : > { %889 = vmatpush3.bf16.msra.mxu0 (!%p851_p5), %v945_v4 }
  0x18   : > { %891 = vmatmul.mubr.msk.bf16.vlgmr.msra.gmra.mrb[0].mxu0 %vm438_vm1, %v1070_v1 }
  0xeb   : > { %v476_v6 = vpop.f32.mrb[0].mxu0 }
  0xec   : > { %v477_v7 = vadd.f32 %v852_v5, %v476_v6  ;;  %v892_v8 = vpop.f32.mrb[1].mxu0 }
  0xed   : > { %v479_v9 = vpop.f32.mrb[2].mxu0 }
  0xee   : > { %v893_v10 = vpop.f32.mrb[3].mxu0  ;;  %v483_v11 = vsel %vm482_vm2, %v477_v7, -inf }
  0xef   : > { %484 = vmax.xlane.f32.xlu0 %v483_v11 }
 0x17c   : > { %v485_v12 = vpop.xlane.xlu0 %484 }
 0x17d   : > { %v486_v13 = vsub.f32 %v477_v7, %v485_v12 }
 0x17f   : > { %v487_v14 = vmul.f32 1.442695, %v486_v13 }
 0x181   : > { %946 = vpow2.f32 %v487_v14 }
 0x18b   : > { %v947_v15 = vpop.eup %946 }
 0x18c   : > { %v489_v16 = vsel %vm482_vm2, %v947_v15, 0.0 }
 0x18d   : > { %490 = vadd.xlane.f32.xlu0 %v489_v16 }
 0x21a   : > { %v491_v17 = vpop.xlane.xlu0 %490 }
 0x21b   : > { %948 = vrcp.f32 %v491_v17 }
 0x225   : > { %v949_v18 = vpop.eup %948 }
 0x226   : > { %v493_v19 = vmul.f32 %v949_v18, %v947_v15 }
 0x228   : > { %v494_v20 = vsel %vm482_vm2, %v493_v19, -inf }
 0x229   : > { %495 = vmax.xlane.f32.xlu1 %v494_v20 }
 0x2b6   : > { %v496_v23 = vpop.xlane.xlu1 %495 }
 0x2b7   : > { %vm499_vm4 = vcmp.ge.f32.partialorder %v493_v19, %v496_v23  ;;  %517 = vst.msk [vmem:[#allocation2] sm:$0xff] %vm516_vm3, %v496_v23 }
 0x2b8   : > { %v500_v24 = vsel %vm499_vm4, %v498_v22, 2 }
 0x2b9   : > { %v501_v25 = vsel %vm482_vm2, %v500_v24, 2147483647 }
 0x2ba   : > { %v503_v26 = vshra.s32 %v501_v25, 16  ;;  %v502_v28 = vand.u32 65535, %v501_v25 }
 0x2bc   : > { %v505_v27 = vcvt.s32.f32 %v503_v26  ;;  %v504_v30 = vcvt.s32.f32 %v502_v28 }
 0x2be   : > { %506 = vmin.xlane.f32.xlu1 %v505_v27 }
 0x34b   : > { %v507_v29 = vpop.xlane.xlu1 %506 }
 0x34c   : > { %vm508_vm5 = vcmp.eq.f32.partialorder %v505_v27, %v507_v29  ;;  %v513_v32 = vcvt.f32.s32 %v507_v29 }
 0x34d   : > { %v509_v31 = vsel %vm508_vm5, %v504_v30, inf }
 0x34e   : > { %510 = vmin.xlane.f32.xlu0 %v509_v31  ;;  %v514_v34 = vshll.u32 %v513_v32, 16 }
 0x3db   : > { %v511_v33 = vpop.xlane.xlu0 %510 }
 0x3dc   : > { %v512_v35 = vcvt.f32.s32 %v511_v33 }
 0x3de   : > { %v515_v36 = vadd.s32 %v514_v34, %v512_v35 }
 0x3e0   : > { %518 = vst.msk [vmem:[#allocation3] sm:$0xff] %vm516_vm3, %v515_v36 }
 0x3e1 PF: > { %v951_v37 = vld [vmem:[%s1083_s22] sm:$0xff]   ;;  %v988_v38 = vmov 0.0   ;;  %v952_v39 = vld [vmem:[%s1083_s22 + $0x8] sm:$0xff]   ;;  %vm989_vm6 = vmmov 0   ;;  %vm543_vm7 = vcmask 261120   ;;  %v955_v42 = vld [vmem:[%s1089_s26 + $0x10] sm:$0xff]   ;;  %v681_v45 = vstv %s976_s30 }
 0x3e2   : > { %894 = vmatprep.subr.bf16.mxu0 %v988_v38  ;;  %902 = vmatprep.subr.bf16.mxu1 %v988_v38  ;;  %v953_v40 = vld [vmem:[%s1089_s26] sm:$0xff]   ;;  %v954_v41 = vld [vmem:[%s1089_s26 + $0x8] sm:$0xff]   ;;  %v956_v43 = vld [vmem:[%s1089_s26 + $0x18] sm:$0xff]   ;;  %v990_v46 = vmov 0   ;;  %vm636_vm9 = vcmask 523264   ;;  %p867_p6 = scmp.ne.s32.totalorder %s976_s30, 1 }
 0x3e3   : > { %895 = vmatpush3.bf16.msra.mxu0 %v951_v37  ;;  %898 = vmatprep.mubr.msk.bf16.mxu0 %vm989_vm6, %v988_v38  ;;  %v856_v48 = vld [vmem:[%s395_s19] ss:$0 sm:$0xff]  ;;  %v685_v6 = vld [vmem:[#allocation4] sm:$0xff]  ;;  %v991_v12 = vmov (!%p867_p6), 0  }
 0x3e4   : > { %896 = vmatprep.subr.bf16.mxu0 %v988_v38  ;;  %910 = vmatprep.mubr.msk.bf16.mxu1 %vm989_vm6, %v988_v38  ;;  %v699_v11 = vld [vmem:[#allocation2] sm:$0xff] (!%p867_p6) }
 0x3e5   : > { %903 = vmatpush3.bf16.msra.mxu1 %v953_v40  ;;  %950 = vset.pattern.permute.xlu0 %v990_v46  ;;  %v868_v27 = vld [vmem:[%s1162_s7] ss:$0 sm:$0xff] (!%p867_p6) }
 0x3e6   : > { %904 = vmatprep.subr.bf16.mxu1 %v988_v38  ;;  %v869_v28 = vld [vmem:[%s1163_s8] ss:$0 sm:$0xff] (!%p867_p6) }
 0x3e7   : > { %897 = vmatpush3.bf16.msra.mxu0 %v952_v39  ;;  %v680_v44 = vld [vmem:[#allocation3] sm:$0xff] }
 0x3e8   : > { %vm682_vm8 = vcmp.eq.s32.totalorder %v680_v44, %v681_v45 }
 0x3e9   : > { %905 = vmatpush3.bf16.msra.mxu1 %v954_v41  ;;  %v866_v47 = vsel %vm682_vm8, 1.0, %v988_v38 }
 0x3ea   : > { %899 = vmatmul.mubr.msk.bf16.vlgmr.msra.gmra.mrb[0].mxu0 %vm543_vm7, %v1070_v1  ;;  %906 = vmatprep.subr.bf16.mxu1 %v988_v38  ;;  %v860_v1 = vld [vmem:[%s403_s29] ss:$0 sm:$0xff] }
 0x3eb   : > { %688 = vperm.xlu0 %950, %v866_v47  }
 0x3ed   : > { %907 = vmatpush3.bf16.msra.mxu1 %v955_v42 }
 0x3ee   : > { %908 = vmatprep.subr.bf16.mxu1 %v988_v38 }
 0x3ef   : > { %959 = vset.pattern.permute.xlu0 (!%p867_p6), %v991_v12 }
 0x3f0   : > { %702 = vperm.xlu0 (!%p867_p6), %959, %v699_v11  }
 0x3f1   : > { %909 = vmatpush3.bf16.msra.mxu1 %v956_v43 }
 0x46a   : > { %v689_v3 = vpop.permute.xlu0 %688 }
 0x46f   : > { %v703_v14 = vpop.permute.xlu0 (!%p867_p6), %702 }
 0x4bd   : > { %v581_v49 = vpop.f32.mrb[0].mxu0 }
 0x4be   : > { %v582_v50 = vadd.f32 %v856_v48, %v581_v49  ;;  %v900_v51 = vpop.f32.mrb[1].mxu0 }
 0x4bf   : > { %v584_v52 = vpop.f32.mrb[2].mxu0 }
 0x4c0   : > { %v587_v53 = vmul.f32 %v582_v50, %v582_v50  ;;  %v901_v54 = vpop.f32.mrb[3].mxu0 }
 0x4c2   : > { %v588_v55 = vmul.f32 %v587_v53, %v582_v50 }
 0x4c4   : > { %v589_v56 = vmul.f32 0.044715, %v588_v55 }
 0x4c6   : > { %v590_v57 = vadd.f32 %v589_v56, %v582_v50 }
 0x4c8   : > { %v591_v58 = vmul.f32 0.7978846, %v590_v57 }
 0x4ca   : > { %957 = vtanh.f32 %v591_v58 }
 0x4d4   : > { %v958_v59 = vpop.eup %957 }
 0x4d5   : > { %v593_v60 = vadd.f32 1.0, %v958_v59 }
 0x4d7   : > { %v594_v61 = vmul.f32 0.5, %v593_v60 }
 0x4d9   : > { %v595_v62 = vmul.f32 %v594_v61, %v582_v50 }
 0x4db   : > { %v596_v63 = vpack.c.bf16 %v595_v62, %v595_v62 }
 0x4dd   : > { %911 = vmatmul.mubr.msk.bf16.vlgmr.msra.gmra.mrb[0].mxu1 %vm636_vm9, %v596_v63 }
 0x5b0   : > { %v674_v2 = vpop.f32.mrb[0].mxu1 }
 0x5b1   : > { %v675_v4 = vadd.f32 %v860_v1, %v674_v2  ;;  %v912_v5 = vpop.f32.mrb[1].mxu1  ;;  %697 = sbr.rel (%p867_p6) target bundleno = 1789 (0x6fd), region = 64 }
 0x5b2   : > { %v677_v7 = vpop.f32.mrb[2].mxu1 }
 0x5b3   : > { %v691_v8 = vmul.f32 %v689_v3, %v675_v4  ;;  %v913_v9 = vpop.f32.mrb[3].mxu1 }
 0x5b5   : > { %v692_v10 = vadd.f32 %v691_v8, %v685_v6 }
 0x5b7   : > { %693 = vst.msk [vmem:[#allocation4] sm:$0xff] %vm543_vm7, %v692_v10 }
 0x5be   : > { %v698_v13 = vld [vmem:[#allocation4] sm:$0xff] }
 0x5bf   : > { %v705_v15 = vmul.f32 %v703_v14, %v698_v13 }
 0x5c1   : > { %v706_v16 = vadd.f32 %v705_v15, %v1066_v0 }
 0x5c3   : > { %v709_v17 = vsel %vm543_vm7, %v706_v16, 0.0 }
 0x5c4   : > { %710 = vadd.xlane.f32.xlu0 %v709_v17 }
 0x651   : > { %v711_v18 = vpop.xlane.xlu0 %710 }
 0x652   : > { %v713_v19 = vmul.f32 0.03125, %v711_v18 }
 0x654   : > { %v714_v20 = vsub.f32 %v706_v16, %v713_v19 }
 0x656   : > { %v715_v21 = vmul.f32 %v714_v20, %v714_v20 }
 0x658   : > { %v716_v22 = vsel %vm543_vm7, %v715_v21, 0.0 }
 0x659   : > { %717 = vadd.xlane.f32.xlu1 %v716_v22 }
 0x6e6   : > { %v718_v23 = vpop.xlane.xlu1 %717 }
 0x6e7   : > { %v719_v24 = vmul.f32 0.03125, %v718_v23 }
 0x6e9   : > { %v720_v25 = vadd.f32 1e-12, %v719_v24 }
 0x6eb   : > { %960 = vrsqrt.f32 %v720_v25 }
 0x6f5   : > { %v961_v26 = vpop.eup %960 }
 0x6f6   : > { %v722_v0 = vmul.f32 %v961_v26, %v714_v20 }
 0x6f8   : > { %v729_v29 = vmul.f32 %v868_v27, %v722_v0 }
 0x6fa   : > { %v736_v30 = vadd.f32 %v869_v28, %v729_v29 }
 0x6fc   : > { %737 = vst.msk [vmem:[%s1164_s9] sm:$0xff] %vm543_vm7, %v736_v30 }
 0x6fd PF: > { %s19_s11 = sadd.s32 1, %s984_s11   ;;  %s1165_s30 = smov %s980_s10 }
 0x6fe   : > { %p16_p7 = scmp.ge.s32.totalorder %s19_s11, 4   ;;  %s1166_s10 = smov %s1168_s12 }
 0x700   :  { %18 = sbr.rel (!%p16_p7) target bundleno = 2 (0x2), region = 106 }

// kernel: _lambda_.17
= control target key start
LH: loop header
LB: loop body
LE: loop exit
PB: predicated region body
PF: predicated region fallthrough
CT: control target
= control target key end

     0   :  { %s1153_s30 = smov 0   ;;  %s1155_s10 = smov 0   ;;  %s1285_s0 = inlined_call_operand.vmem [shape: f32[16,32], index: 0, kind: input, shape index: {}]   ;;  %s1286_s1 = inlined_call_operand.vmem [shape: bf16[32,2], index: 1, kind: input, shape index: {}]   ;;  %s1287_s2 = inlined_call_operand.vmem [shape: f32[1,2], index: 2, kind: input, shape index: {}]   ;;  %s1288_s3 = inlined_call_operand.vmem [shape: bf16[2,32,64], index: 3, kind: input, shape index: {}]   ;;  %s1289_s4 = inlined_call_operand.vmem [shape: f32[2,1,64], index: 4, kind: input, shape index: {}]   ;;  %s1290_s5 = inlined_call_operand.vmem [shape: bf16[2,64,32], index: 5, kind: input, shape index: {}]   ;;  %s1291_s6 = inlined_call_operand.vmem [shape: f32[2,1,32], index: 6, kind: input, shape index: {}]   ;;  %s1292_s7 = inlined_call_operand.vmem [shape: f32[1,32], index: 7, kind: input, shape index: {}]   ;;  %s1293_s8 = inlined_call_operand.vmem [shape: f32[1,32], index: 8, kind: input, shape index: {}]   ;;  %s1294_s9 = inlined_call_operand.vmem [shape: f32[16,32], index: 9, kind: output, shape index: {}]  }
   0x1   :  { %s1157_s11 = smov 0  }
   0x2 LB: > { %s28_s12 = sadd.s32 1, %s1091_s10  ;;  %p942_p0 = scmp.ge.s32.totalorder %s1095_s11, 1  ;;  %s1095_s11 = sphi %s1157_s11, %s19_s11   ;;  %s1091_s10 = sphi %s1155_s10, %s1296_s10   ;;  %s1087_s30 = sphi %s1153_s30, %s1295_s30  }
   0x3   : > { %p29_p1 = scmp.ge.s32.totalorder %s28_s12, 2  ;;  %p336_p2 = scmp.lt.s32.totalorder %s1095_s11, 3 }
   0x5   : > { %s1298_s12 = smov (%p29_p1, %s28_s12), 0  ;;  %p337_p3 = pnand %p942_p0, %p336_p2 }
   0x6   : > { %p394_p4 = scmp.lt.s32.totalorder (!%p337_p3), %s1087_s30, 1  ;;  %v1177_v0 = vld [vmem:[%s1285_s0] sm:$0xff] (!%p337_p3)  ;;  %v1182_v1 = vld [vmem:[%s1285_s0 + $0x8] sm:$0xff] (!%p337_p3)  ;;  %p947_p5 = scmp.ne.s32.totalorder (!%p337_p3), %s1087_s30, 0 }
   0x7   : > { %340 = sbr.rel (%p337_p3) target bundleno = 1799 (0x707), region = 56  ;;  %v1186_v2 = vpack.c.bf16 (!%p337_p3), %v1182_v1, %v1177_v0 }
   0xe   : > { %s1189_s17 = scalar_select %p394_p4, %s1087_s30, 1 }
   0xf   : > { %423 = sbr.rel (%p947_p5) target bundleno = 997 (0x3e5), region = 60  ;;  %v1042_v3 = vld [vmem:[%s1286_s1] sm:$0xff] (!%p947_p5)   ;;  %v1097_v4 = vmov (!%p947_p5), 0.0   ;;  %v1043_v5 = vld [vmem:[%s1286_s1 + $0x8] sm:$0xff] (!%p947_p5)   ;;  %vm1098_vm0 = vmmov (!%p947_p5), 0   ;;  %vm447_vm1 = vcmask (!%p947_p5), 261120   ;;  %v521_v33 = vlaneseq (!%p947_p5) }
  0x10   : > { %s971_s18 = sshll.u32 %s1189_s17, 4  ;;  %s401_s21 = scalar_lea.vmem %s1289_s4, %s1189_s17  ;;  %984 = vmatprep.subr.bf16.mxu0 (!%p947_p5), %v1097_v4  ;;  %988 = vmatprep.mubr.msk.bf16.mxu0 (!%p947_p5), %vm1098_vm0, %v1097_v4  ;;  %562 = vst.msk [vmem:[#allocation4] sm:$0xff] (!%p947_p5), %vm447_vm1, %v1097_v4  ;;  %563 = vst.msk [vmem:[#allocation4 + $0x8] sm:$0xff] (!%p947_p5), %vm447_vm1, %v1097_v4  ;;  %v948_v6 = vld [vmem:[%s1287_s2] ss:$0 sm:$0xff] (!%p947_p5)  ;;  %vm492_vm2 = vcmask (!%p947_p5), 15360  }
  0x11   : > { %s1199_s24 = scalar_lea.vmem %s1288_s3, %s971_s18  ;;  %s972_s25 = sshll.u32 %s1189_s17, 5  ;;  %985 = vmatpush3.bf16.msra.mxu0 (!%p947_p5), %v1042_v3  ;;  %v522_v34 = vand.u32 (!%p947_p5), 127, %v521_v33  ;;  %vm557_vm3 = vcmask (!%p947_p5), 7168  }
  0x12   : > { %s1205_s28 = scalar_lea.vmem %s1290_s5, %s972_s25  ;;  %s409_s14 = scalar_lea.vmem %s1291_s6, %s1189_s17  ;;  %986 = vmatprep.subr.bf16.mxu0 (!%p947_p5), %v1097_v4 }
  0x15   : > { %987 = vmatpush3.bf16.msra.mxu0 (!%p947_p5), %v1043_v5 }
  0x18   : > { %989 = vmatmul.mubr.msk.bf16.vlgmr.msra.gmra.mrb[0].mxu0 %vm447_vm1, %v1186_v2 }
  0xeb   : > { %v485_v7 = vpop.f32.mrb[0].mxu0 }
  0xec   : > { %v486_v8 = vadd.f32 %v948_v6, %v485_v7  ;;  %v990_v9 = vpop.f32.mrb[1].mxu0 }
  0xed   : > { %v488_v10 = vpop.f32.mrb[2].mxu0 }
  0xee   : > { %v489_v11 = vadd.f32 %v948_v6, %v488_v10  ;;  %v991_v12 = vpop.f32.mrb[3].mxu0  ;;  %v493_v13 = vsel %vm492_vm2, %v486_v8, -inf }
  0xef   : > { %494 = vmax.xlane.f32.xlu0 %v493_v13 }
  0xf0   : > { %v496_v14 = vsel %vm492_vm2, %v489_v11, -inf }
  0xf3   : > { %497 = vmax.xlane.f32.xlu0 %v496_v14 }
 0x17c   : > { %v495_v15 = vpop.xlane.xlu0 %494 }
 0x17d   : > { %v499_v16 = vsub.f32 %v486_v8, %v495_v15 }
 0x17f   : > { %v501_v17 = vmul.f32 1.442695, %v499_v16 }
 0x180   : > { %v498_v18 = vpop.xlane.xlu0 %497 }
 0x181   : > { %1044 = vpow2.f32 %v501_v17  ;;  %v500_v19 = vsub.f32 %v489_v11, %v498_v18 }
 0x183   : > { %v503_v20 = vmul.f32 1.442695, %v500_v19 }
 0x185   : > { %1046 = vpow2.f32 %v503_v20 }
 0x18b   : > { %v1045_v21 = vpop.eup %1044 }
 0x18c   : > { %v505_v22 = vsel %vm492_vm2, %v1045_v21, 0.0 }
 0x18d   : > { %506 = vadd.xlane.f32.xlu1 %v505_v22 }
 0x18f   : > { %v1047_v23 = vpop.eup %1046 }
 0x190   : > { %v508_v24 = vsel %vm492_vm2, %v1047_v23, 0.0 }
 0x191   : > { %509 = vadd.xlane.f32.xlu1 %v508_v24 }
 0x21a   : > { %v507_v25 = vpop.xlane.xlu1 %506 }
 0x21b   : > { %1048 = vrcp.f32 %v507_v25 }
 0x21e   : > { %v510_v26 = vpop.xlane.xlu1 %509 }
 0x21f   : > { %1050 = vrcp.f32 %v510_v26 }
 0x225   : > { %v1049_v27 = vpop.eup %1048 }
 0x226   : > { %v512_v28 = vmul.f32 %v1049_v27, %v1045_v21 }
 0x228   : > { %v515_v29 = vsel %vm492_vm2, %v512_v28, -inf }
 0x229   : > { %v1051_v30 = vpop.eup %1050  ;;  %516 = vmax.xlane.f32.xlu0 %v515_v29 }
 0x22a   : > { %v514_v31 = vmul.f32 %v1051_v30, %v1047_v23 }
 0x22c   : > { %v518_v32 = vsel %vm492_vm2, %v514_v31, -inf }
 0x22d   : > { %519 = vmax.xlane.f32.xlu1 %v518_v32 }
 0x2b6   : > { %v517_v35 = vpop.xlane.xlu0 %516 }
 0x2b7   : > { %vm523_vm4 = vcmp.ge.f32.partialorder %v512_v28, %v517_v35  ;;  %558 = vst.msk [vmem:[#allocation2] sm:$0xff] %vm557_vm3, %v517_v35 }
 0x2b8   : > { %v525_v36 = vsel %vm523_vm4, %v522_v34, 2 }
 0x2b9   : > { %v527_v37 = vsel %vm492_vm2, %v525_v36, 2147483647 }
 0x2ba   : > { %v520_v38 = vpop.xlane.xlu1 %519  ;;  %v529_v39 = vshra.s32 %v527_v37, 16  ;;  %v528_v45 = vand.u32 65535, %v527_v37 }
 0x2bb   : > { %vm524_vm5 = vcmp.ge.f32.partialorder %v514_v31, %v520_v38  ;;  %559 = vst.msk [vmem:[#allocation2 + $0x8] sm:$0xff] %vm557_vm3, %v520_v38 }
 0x2bc   : > { %v526_v40 = vsel %vm524_vm5, %v522_v34, 2  ;;  %v531_v41 = vcvt.s32.f32 %v529_v39  ;;  %v530_v47 = vcvt.s32.f32 %v528_v45 }
 0x2bd   : > { %v542_v42 = vsel %vm492_vm2, %v526_v40, 2147483647 }
 0x2be   : > { %532 = vmin.xlane.f32.xlu0 %v531_v41  ;;  %v544_v43 = vshra.s32 %v542_v42, 16  ;;  %v543_v48 = vand.u32 65535, %v542_v42 }
 0x2c0   : > { %v546_v44 = vcvt.s32.f32 %v544_v43  ;;  %v545_v51 = vcvt.s32.f32 %v543_v48 }
 0x2c2   : > { %547 = vmin.xlane.f32.xlu1 %v546_v44 }
 0x34b   : > { %v533_v46 = vpop.xlane.xlu0 %532 }
 0x34c   : > { %vm534_vm6 = vcmp.eq.f32.partialorder %v531_v41, %v533_v46  ;;  %v539_v53 = vcvt.f32.s32 %v533_v46 }
 0x34d   : > { %v535_v49 = vsel %vm534_vm6, %v530_v47, inf }
 0x34e   : > { %536 = vmin.xlane.f32.xlu0 %v535_v49  ;;  %v540_v55 = vshll.u32 %v539_v53, 16 }
 0x34f   : > { %v548_v50 = vpop.xlane.xlu1 %547 }
 0x350   : > { %vm549_vm7 = vcmp.eq.f32.partialorder %v546_v44, %v548_v50  ;;  %v554_v56 = vcvt.f32.s32 %v548_v50 }
 0x351   : > { %v550_v52 = vsel %vm549_vm7, %v545_v51, inf }
 0x352   : > { %551 = vmin.xlane.f32.xlu1 %v550_v52  ;;  %v555_v60 = vshll.u32 %v554_v56, 16 }
 0x3db   : > { %v537_v54 = vpop.xlane.xlu0 %536 }
 0x3dc   : > { %v538_v57 = vcvt.f32.s32 %v537_v54 }
 0x3de   : > { %v541_v58 = vadd.s32 %v540_v55, %v538_v57 }
 0x3df   : > { %v552_v59 = vpop.xlane.xlu1 %551 }
 0x3e0   : > { %560 = vst.msk [vmem:[#allocation3] sm:$0xff] %vm557_vm3, %v541_v58  ;;  %v553_v61 = vcvt.f32.s32 %v552_v59 }
 0x3e2   : > { %v556_v62 = vadd.s32 %v555_v60, %v553_v61 }
 0x3e4   : > { %561 = vst.msk [vmem:[#allocation3 + $0x8] sm:$0xff] %vm557_vm3, %v556_v62 }
 0x3e5 PF: > { %v1058_v63 = vld [vmem:[%s1199_s24] sm:$0xff]   ;;  %v1099_v3 = vmov 0.0   ;;  %v1059_v4 = vld [vmem:[%s1199_s24 + $0x8] sm:$0xff]   ;;  %vm1100_vm8 = vmmov 0   ;;  %vm587_vm9 = vcmask 261120   ;;  %v1062_v7 = vld [vmem:[%s1205_s28 + $0x10] sm:$0xff]   ;;  %v737_v11 = vstv %s1087_s30 }
 0x3e6   : > { %992 = vmatprep.subr.bf16.mxu0 %v1099_v3  ;;  %1000 = vmatprep.subr.bf16.mxu1 %v1099_v3  ;;  %v1060_v5 = vld [vmem:[%s1205_s28] sm:$0xff]   ;;  %v1061_v6 = vld [vmem:[%s1205_s28 + $0x8] sm:$0xff]   ;;  %v1063_v8 = vld [vmem:[%s1205_s28 + $0x18] sm:$0xff]   ;;  %v1101_v12 = vmov 0   ;;  %vm690_vm12 = vcmask 523264   ;;  %p964_p6 = scmp.ne.s32.totalorder %s1087_s30, 1 }
 0x3e7   : > { %993 = vmatpush3.bf16.msra.mxu0 %v1058_v63  ;;  %996 = vmatprep.mubr.msk.bf16.mxu0 %vm1100_vm8, %v1099_v3  ;;  %v735_v9 = vld [vmem:[#allocation3] sm:$0xff]  ;;  %v952_v15 = vld [vmem:[%s401_s21] ss:$0 sm:$0xff]  ;;  %v745_v53 = vld [vmem:[#allocation4 + $0x8] sm:$0xff]  ;;  %v1102_v58 = vmov (!%p964_p6), 0  }
 0x3e8   : > { %994 = vmatprep.subr.bf16.mxu0 %v1099_v3  ;;  %1008 = vmatprep.mubr.msk.bf16.mxu1 %vm1100_vm8, %v1099_v3  ;;  %vm738_vm10 = vcmp.eq.s32.totalorder %v735_v9, %v737_v11  ;;  %v956_v42 = vld [vmem:[%s409_s14] ss:$0 sm:$0xff]  ;;  %v769_v59 = vld [vmem:[#allocation2 + $0x8] sm:$0xff] (!%p964_p6) }
 0x3e9   : > { %1001 = vmatpush3.bf16.msra.mxu1 %v1060_v5  ;;  %1052 = vset.pattern.permute.xlu0 %v1101_v12  ;;  %v744_v48 = vld [vmem:[#allocation4] sm:$0xff] }
 0x3ea   : > { %1002 = vmatprep.subr.bf16.mxu1 %v1099_v3  ;;  %v768_v57 = vld [vmem:[#allocation2] sm:$0xff] (!%p964_p6) }
 0x3eb   : > { %995 = vmatpush3.bf16.msra.mxu0 %v1059_v4  ;;  %v736_v10 = vld [vmem:[#allocation3 + $0x8] sm:$0xff] }
 0x3ec   : > { %vm739_vm11 = vcmp.eq.s32.totalorder %v736_v10, %v737_v11 }
 0x3ed   : > { %1003 = vmatpush3.bf16.msra.mxu1 %v1061_v6  ;;  %v963_v13 = vsel %vm739_vm11, 1.0, %v1099_v3 }
 0x3ee   : > { %997 = vmatmul.mubr.msk.bf16.vlgmr.msra.gmra.mrb[0].mxu0 %vm587_vm9, %v1186_v2  ;;  %1004 = vmatprep.subr.bf16.mxu1 %v1099_v3  ;;  %v962_v2 = vsel %vm738_vm10, 1.0, %v1099_v3 }
 0x3ef   : > { %v1053_v14 = vpack.i.bf16 %v963_v13, %v962_v2 }
 0x3f1   : > { %1005 = vmatpush3.bf16.msra.mxu1 %v1062_v7  ;;  %1054 = vperm.xlu0 %1052, %v1053_v14  }
 0x3f2   : > { %1006 = vmatprep.subr.bf16.mxu1 %v1099_v3 }
 0x3f5   : > { %1007 = vmatpush3.bf16.msra.mxu1 %v1063_v8  ;;  %1068 = vset.pattern.permute.xlu0 (!%p964_p6), %v1102_v58 }
 0x3f6   : > { %772 = vperm.xlu0 (!%p964_p6), %1068, %v768_v57  }
 0x3fa   : > { %777 = vperm.xlu0 (!%p964_p6), %1068, %v769_v59  }
 0x470   : > { %v1055_v41 = vpop.permute.xlu0 %1054 }
 0x471   : > { %v1056_v43 = vunpack.i.l.bf16 %v1055_v41  ;;  %v1057_v45 = vunpack.i.h.bf16 %v1055_v41 }
 0x475   : > { %v773_v61 = vpop.permute.xlu0 (!%p964_p6), %772 }
 0x479   : > { %v778_v4 = vpop.permute.xlu0 (!%p964_p6), %777 }
 0x4c1   : > { %v625_v16 = vpop.f32.mrb[0].mxu0 }
 0x4c2   : > { %v626_v17 = vadd.f32 %v952_v15, %v625_v16  ;;  %v998_v18 = vpop.f32.mrb[1].mxu0 }
 0x4c3   : > { %v628_v19 = vpop.f32.mrb[2].mxu0 }
 0x4c4   : > { %v632_v20 = vmul.f32 %v626_v17, %v626_v17  ;;  %v629_v21 = vadd.f32 %v952_v15, %v628_v19  ;;  %v999_v22 = vpop.f32.mrb[3].mxu0 }
 0x4c6   : > { %v634_v23 = vmul.f32 %v632_v20, %v626_v17  ;;  %v633_v24 = vmul.f32 %v629_v21, %v629_v21 }
 0x4c8   : > { %v636_v25 = vmul.f32 0.044715, %v634_v23  ;;  %v635_v26 = vmul.f32 %v633_v24, %v629_v21  ;;  %v965_v23 = vld [vmem:[%s1292_s7] ss:$0 sm:$0xff] (!%p964_p6) }
 0x4ca   : > { %v638_v27 = vadd.f32 %v636_v25, %v626_v17  ;;  %v637_v28 = vmul.f32 0.044715, %v635_v26  ;;  %v966_v25 = vld [vmem:[%s1293_s8] ss:$0 sm:$0xff] (!%p964_p6) }
 0x4cc   : > { %v640_v29 = vmul.f32 0.7978846, %v638_v27  ;;  %v639_v30 = vadd.f32 %v637_v28, %v629_v21 }
 0x4ce   : > { %1064 = vtanh.f32 %v640_v29  ;;  %v641_v31 = vmul.f32 0.7978846, %v639_v30 }
 0x4d0   : > { %1066 = vtanh.f32 %v641_v31 }
 0x4d8   : > { %v1065_v32 = vpop.eup %1064 }
 0x4d9   : > { %v644_v33 = vadd.f32 1.0, %v1065_v32 }
 0x4da   : > { %v1067_v34 = vpop.eup %1066 }
 0x4db   : > { %v646_v35 = vmul.f32 0.5, %v644_v33  ;;  %v645_v36 = vadd.f32 1.0, %v1067_v34 }
 0x4dd   : > { %v647_v37 = vmul.f32 0.5, %v645_v36  ;;  %v648_v38 = vmul.f32 %v646_v35, %v626_v17 }
 0x4df   : > { %v649_v39 = vmul.f32 %v647_v37, %v629_v21 }
 0x4e1   : > { %v650_v40 = vpack.c.bf16 %v649_v39, %v648_v38 }
 0x4e3   : > { %1009 = vmatmul.mubr.msk.bf16.vlgmr.msra.gmra.mrb[0].mxu1 %vm690_vm12, %v650_v40 }
 0x5b6   : > { %v728_v44 = vpop.f32.mrb[0].mxu1 }
 0x5b7   : > { %v729_v46 = vadd.f32 %v956_v42, %v728_v44  ;;  %v1010_v47 = vpop.f32.mrb[1].mxu1 }
 0x5b8   : > { %v731_v49 = vpop.f32.mrb[2].mxu1 }
 0x5b9   : > { %v756_v50 = vmul.f32 %v1056_v43, %v729_v46  ;;  %v732_v51 = vadd.f32 %v956_v42, %v731_v49  ;;  %v1011_v52 = vpop.f32.mrb[3].mxu1  ;;  %765 = sbr.rel (%p964_p6) target bundleno = 1799 (0x707), region = 64 }
 0x5bb   : > { %v758_v54 = vadd.f32 %v756_v50, %v744_v48  ;;  %v757_v55 = vmul.f32 %v1057_v45, %v732_v51 }
 0x5bd   : > { %760 = vst.msk [vmem:[#allocation4] sm:$0xff] %vm587_vm9, %v758_v54  ;;  %v759_v56 = vadd.f32 %v757_v55, %v745_v53 }
 0x5bf   : > { %761 = vst.msk [vmem:[#allocation4 + $0x8] sm:$0xff] %vm587_vm9, %v759_v56 }
 0x5c4   : > { %v766_v60 = vld [vmem:[#allocation4] sm:$0xff] }
 0x5c5   : > { %v780_v62 = vmul.f32 %v773_v61, %v766_v60 }
 0x5c6   : > { %v767_v63 = vld [vmem:[#allocation4 + $0x8] sm:$0xff] }
 0x5c7   : > { %v782_v3 = vadd.f32 %v780_v62, %v1177_v0  ;;  %v781_v5 = vmul.f32 %v778_v4, %v767_v63 }
 0x5c9   : > { %v786_v6 = vsel %vm587_vm9, %v782_v3, 0.0  ;;  %v783_v7 = vadd.f32 %v781_v5, %v1182_v1 }
 0x5ca   : > { %787 = vadd.xlane.f32.xlu1 %v786_v6 }
 0x5cb   : > { %v789_v8 = vsel %vm587_vm9, %v783_v7, 0.0 }
 0x5ce   : > { %790 = vadd.xlane.f32.xlu1 %v789_v8 }
 0x657   : > { %v788_v9 = vpop.xlane.xlu1 %787 }
 0x658   : > { %v793_v10 = vmul.f32 0.03125, %v788_v9 }
 0x65a   : > { %v795_v11 = vsub.f32 %v782_v3, %v793_v10 }
 0x65b   : > { %v791_v12 = vpop.xlane.xlu1 %790 }
 0x65c   : > { %v794_v2 = vmul.f32 0.03125, %v791_v12  ;;  %v797_v13 = vmul.f32 %v795_v11, %v795_v11 }
 0x65e   : > { %v796_v14 = vsub.f32 %v783_v7, %v794_v2  ;;  %v799_v15 = vsel %vm587_vm9, %v797_v13, 0.0 }
 0x65f   : > { %800 = vadd.xlane.f32.xlu0 %v799_v15 }
 0x660   : > { %v798_v0 = vmul.f32 %v796_v14, %v796_v14 }
 0x662   : > { %v802_v16 = vsel %vm587_vm9, %v798_v0, 0.0 }
 0x663   : > { %803 = vadd.xlane.f32.xlu1 %v802_v16 }
 0x6ec   : > { %v801_v17 = vpop.xlane.xlu0 %800 }
 0x6ed   : > { %v805_v18 = vmul.f32 0.03125, %v801_v17 }
 0x6ef   : > { %v807_v1 = vadd.f32 1e-12, %v805_v18 }
 0x6f0   : > { %v804_v19 = vpop.xlane.xlu1 %803 }
 0x6f1   : > { %1069 = vrsqrt.f32 %v807_v1  ;;  %v806_v20 = vmul.f32 0.03125, %v804_v19 }
 0x6f3   : > { %v808_v21 = vadd.f32 1e-12, %v806_v20 }
 0x6f5   : > { %1071 = vrsqrt.f32 %v808_v21 }
 0x6fb   : > { %v1070_v22 = vpop.eup %1069 }
 0x6fc   : > { %v811_v24 = vmul.f32 %v1070_v22, %v795_v11 }
 0x6fe   : > { %v819_v26 = vmul.f32 %v965_v23, %v811_v24 }
 0x6ff   : > { %v1072_v27 = vpop.eup %1071 }
 0x700   : > { %v827_v28 = vadd.f32 %v966_v25, %v819_v26  ;;  %v812_v29 = vmul.f32 %v1072_v27, %v796_v14 }
 0x702   : > { %829 = vst.msk [vmem:[%s1294_s9] sm:$0xff] %vm587_vm9, %v827_v28  ;;  %v820_v30 = vmul.f32 %v965_v23, %v812_v29 }
 0x704   : > { %v828_v31 = vadd.f32 %v966_v25, %v820_v30 }
 0x706   : > { %830 = vst.msk [vmem:[%s1294_s9 + $0x8] sm:$0xff] %vm587_vm9, %v828_v31 }
 0x707 PF: > { %s19_s11 = sadd.s32 1, %s1095_s11   ;;  %s1295_s30 = smov %s1091_s10 }
 0x708   : > { %p16_p7 = scmp.ge.s32.totalorder %s19_s11, 4   ;;  %s1296_s10 = smov %s1298_s12 }
 0x70a   :  { %18 = sbr.rel (!%p16_p7) target bundleno = 2 (0x2), region = 106 }

</bundles_post_ra>
